<compile_context>
chip_gen: v7x
topology: tpu7x:2x2x1
jax: 0.10.0
libtpu: 0.0.40
codegen_flags: <defaults>
</compile_context>

<pallas_src>
import jax
import jax.numpy as jnp
from jax.experimental import pallas as pl
from jax.experimental.pallas import tpu as pltpu


def _round_up(x, m):
    return ((x + m - 1) // m) * m


def _pick_tm(m, *, cap, min_tile=16):
    """Row tile: >=2 grid blocks whenever m > min_tile (v7x megacore), multiple
    of 16 (bf16 sublane packing), capped so tiles stay comfortably in VMEM."""
    if m <= min_tile:
        return m                                   # single block == full dim (legal)
    return min(_round_up(pl.cdiv(m, 2), min_tile), cap)


_COMPILER_PARAMS = pltpu.CompilerParams(
    dimension_semantics=("parallel",),
    vmem_limit_bytes=32 << 20,
)


# ----------------------------- Pallas kernels -----------------------------

def _matmul_bias_relu_kernel(x_ref, w_ref, b_ref, o_ref):
    # x: (tm, K) bf16, w: (K, N) bf16, b: (1, N) f32 -> o: (tm, N) bf16
    acc = jnp.dot(x_ref[...], w_ref[...], preferred_element_type=jnp.float32)
    o_ref[...] = jnp.maximum(acc + b_ref[...], 0.0).astype(o_ref.dtype)


def _fc_stack_kernel(x_ref, w1_ref, b1_ref, w2_ref, b2_ref, w3_ref, b3_ref, o_ref):
    # Fused fc1 -> relu -> fc2 -> relu -> fc3 (weights resident in VMEM).
    h1 = jnp.dot(x_ref[...], w1_ref[...], preferred_element_type=jnp.float32)
    h1 = jnp.maximum(h1 + b1_ref[...], 0.0).astype(jnp.bfloat16)
    h2 = jnp.dot(h1, w2_ref[...], preferred_element_type=jnp.float32)
    h2 = jnp.maximum(h2 + b2_ref[...], 0.0).astype(jnp.bfloat16)
    out = jnp.dot(h2, w3_ref[...], preferred_element_type=jnp.float32)
    o_ref[...] = out + b3_ref[...]


# ----------------------------- Pallas wrappers -----------------------------

def pallas_matmul_bias_relu(x, w, b):
    """relu(x @ w + b) with a ragged, M-parallel grid.  x: (M, K) bf16,
    w: (K, N) bf16, b: (1, N) f32.  Only the N live channels are written."""
    M, K = x.shape
    Kw, N = w.shape
    assert K == Kw, (K, Kw)
    tm = _pick_tm(M, cap=1024)
    grid = (pl.cdiv(M, tm),)
    return pl.pallas_call(
        _matmul_bias_relu_kernel,
        out_shape=jax.ShapeDtypeStruct((M, N), jnp.bfloat16),
        grid=grid,
        in_specs=[
            pl.BlockSpec((tm, K), lambda i: (i, 0)),
            pl.BlockSpec((K, N), lambda i: (0, 0)),
            pl.BlockSpec((1, N), lambda i: (0, 0)),
        ],
        out_specs=pl.BlockSpec((tm, N), lambda i: (i, 0)),
        compiler_params=_COMPILER_PARAMS,
    )(x, w, b)


def pallas_fc_stack(x, prep):
    """Fused fc1+relu -> fc2+relu -> fc3, tiled over the batch dimension.
    x: (M, 3136) bf16.  Returns (M, num_actions) f32 (no padding, no slice)."""
    M, K1 = x.shape
    w1, b1 = prep["fc1_w"], prep["fc1_b"]
    w2, b2 = prep["fc2_w"], prep["fc2_b"]
    w3, b3 = prep["fc3_w"], prep["fc3_b"]
    H1, H2, NO = w1.shape[1], w2.shape[1], w3.shape[1]
    tm = _pick_tm(M, cap=256)
    grid = (pl.cdiv(M, tm),)
    return pl.pallas_call(
        _fc_stack_kernel,
        out_shape=jax.ShapeDtypeStruct((M, NO), jnp.float32),
        grid=grid,
        in_specs=[
            pl.BlockSpec((tm, K1), lambda i: (i, 0)),
            pl.BlockSpec((K1, H1), lambda i: (0, 0)),
            pl.BlockSpec((1, H1), lambda i: (0, 0)),
            pl.BlockSpec((H1, H2), lambda i: (0, 0)),
            pl.BlockSpec((1, H2), lambda i: (0, 0)),
            pl.BlockSpec((H2, NO), lambda i: (0, 0)),
            pl.BlockSpec((1, NO), lambda i: (0, 0)),
        ],
        out_specs=pl.BlockSpec((tm, NO), lambda i: (i, 0)),
        compiler_params=_COMPILER_PARAMS,
    )(x, w1, b1, w2, b2, w3, b3)


# ------------------------------ conv via im2col ------------------------------

def _im2col_nhwc(x, kh, kw, stride):
    """x: (N, H, W, C) -> patches (N*OH*OW, KH*KW*C), (kh, kw, c) channel-minor."""
    N, H, W, C = x.shape
    oh = (H - kh) // stride + 1
    ow = (W - kw) // stride + 1
    cols = []
    for i in range(kh):
        for j in range(kw):
            cols.append(x[:, i:i + stride * oh:stride, j:j + stride * ow:stride, :])
    p = jnp.stack(cols, axis=3)                      # (N, OH, OW, KH*KW, C)
    return p.reshape(N * oh * ow, kh * kw * C), oh, ow


def conv2d_relu(x, w, b, *, kh, kw, stride):
    """x: (N, H, W, C) bf16 NHWC; w: (KH*KW*C, out_c) bf16; b: (1, out_c) f32.
    Returns relu(conv) in NHWC bf16, shape (N, OH, OW, out_c)."""
    N = x.shape[0]
    out_c = w.shape[1]
    patches, oh, ow = _im2col_nhwc(x, kh, kw, stride)
    y = pallas_matmul_bias_relu(patches, w, b)       # (N*OH*OW, out_c)
    return y.reshape(N, oh, ow, out_c)               # metadata-only reshape


# ------------------------------ parameters ------------------------------

def init_params(key, num_actions):
    """Parameters in the exact PyTorch layouts (conv OIHW, fc (out, in))."""
    def _init(k, shape, fan_in):
        return jax.random.normal(k, shape, dtype=jnp.float32) / jnp.sqrt(fan_in)

    ks = jax.random.split(key, 12)
    return {
        "conv1_w": _init(ks[0], (32, 4, 8, 8), 4 * 8 * 8),
        "conv1_b": _init(ks[1], (32,), 4 * 8 * 8),
        "conv2_w": _init(ks[2], (64, 32, 4, 4), 32 * 4 * 4),
        "conv2_b": _init(ks[3], (64,), 32 * 4 * 4),
        "conv3_w": _init(ks[4], (64, 64, 3, 3), 64 * 3 * 3),
        "conv3_b": _init(ks[5], (64,), 64 * 3 * 3),
        "fc1_w": _init(ks[6], (512, 64 * 7 * 7), 64 * 7 * 7),
        "fc1_b": _init(ks[7], (512,), 64 * 7 * 7),
        "fc2_w": _init(ks[8], (64, 512), 512),
        "fc2_b": _init(ks[9], (64,), 512),
        "fc3_w": _init(ks[10], (num_actions, 64), 64),
        "fc3_b": _init(ks[11], (num_actions,), 64),
    }


def _prep_conv(w, b):
    # torch OIHW -> (KH*KW*C, O) matching the NHWC im2col (kh, kw, c) ordering.
    O, C, kh, kw = w.shape
    wf = w.transpose(2, 3, 1, 0).reshape(kh * kw * C, O).astype(jnp.bfloat16)
    bf = b.reshape(1, O).astype(jnp.float32)
    return wf, bf


def prepare_params(params):
    """One-time weight prep: permute / flatten / cast for the Pallas kernels."""
    prep = {}
    for name in ("conv1", "conv2", "conv3"):
        prep[f"{name}_w"], prep[f"{name}_b"] = _prep_conv(
            params[f"{name}_w"], params[f"{name}_b"])

    # fc1: (out, in) -> (in, out); permute rows from torch's (C, H, W) flatten
    # order to our NHWC (H, W, C) flatten order so no activation transpose is
    # needed before the flatten in the forward pass.
    w1 = params["fc1_w"].T                                   # (3136, 512)
    w1 = w1.reshape(64, 7, 7, 512).transpose(1, 2, 0, 3).reshape(64 * 7 * 7, 512)
    prep["fc1_w"] = w1.astype(jnp.bfloat16)
    prep["fc1_b"] = params["fc1_b"].reshape(1, -1).astype(jnp.float32)

    prep["fc2_w"] = params["fc2_w"].T.astype(jnp.bfloat16)   # (512, 64)
    prep["fc2_b"] = params["fc2_b"].reshape(1, -1).astype(jnp.float32)
    prep["fc3_w"] = params["fc3_w"].T.astype(jnp.bfloat16)   # (64, num_actions)
    prep["fc3_b"] = params["fc3_b"].reshape(1, -1).astype(jnp.float32)
    return prep


# ------------------------------ forward ------------------------------

def dqn_forward(prep, x):
    # x: (N, 4, 84, 84) NCHW f32 -> NHWC bf16 once.
    N = x.shape[0]
    x = jnp.transpose(x, (0, 2, 3, 1)).astype(jnp.bfloat16)                    # (N, 84, 84, 4)
    x = conv2d_relu(x, prep["conv1_w"], prep["conv1_b"], kh=8, kw=8, stride=4)  # (N, 20, 20, 32)
    x = conv2d_relu(x, prep["conv2_w"], prep["conv2_b"], kh=4, kw=4, stride=2)  # (N,  9,  9, 64)
    x = conv2d_relu(x, prep["conv3_w"], prep["conv3_b"], kh=3, kw=3, stride=1)  # (N,  7,  7, 64)
    # NHWC flatten (metadata-only); fc1 weight rows were pre-permuted to match
    # torch's NCHW x.view(-1, 64*7*7) flatten order.
    x = x.reshape(N, 7 * 7 * 64)
    return pallas_fc_stack(x, prep)                                            # (N, num_actions) f32


if __name__ == "__main__":
    num_actions = 6
    key = jax.random.PRNGKey(0)
    k_params, k_x = jax.random.split(key)

    params = init_params(k_params, num_actions)
    prep = prepare_params(params)
    # Spatial size 84x84 is required by fc1's 64*7*7 input; batch kept small.
    x = jax.random.normal(k_x, (2, 4, 84, 84), dtype=jnp.float32)

    fwd = jax.jit(dqn_forward)
    out = fwd(prep, x)
    out = jax.block_until_ready(out)
    assert out.shape == (2, num_actions), out.shape
    assert out.dtype == jnp.float32, out.dtype
    assert bool(jnp.isfinite(out).all())
    print("KERNEL_OK")
</pallas_src>

<mosaic_0001>
module attributes {stable_mosaic.version = 11 : i64} {
  func.func @_matmul_bias_relu_kernel(%arg0: i32, %arg1: memref<400x256xbf16, #tpu.memory_space<vmem>>, %arg2: memref<256x32xbf16, #tpu.memory_space<vmem>>, %arg3: memref<1x32xf32, #tpu.memory_space<vmem>>, %arg4: memref<400x32xbf16, #tpu.memory_space<vmem>>) attributes {dimension_semantics = [#tpu.dimension_semantics<parallel>], iteration_bounds = array<i64: 2>, scalar_prefetch = 0 : i64, scratch_operands = 0 : i64, tpu.core_type = #tpu.core_type<tc>, window_params = [{transform_indices = @transform_0, window_bounds = array<i64: 400, 256>}, {pipeline_mode = #tpu.pipeline_mode<synchronous>, transform_indices = @transform_1, window_bounds = array<i64: 256, 32>}, {pipeline_mode = #tpu.pipeline_mode<synchronous>, transform_indices = @transform_2, window_bounds = array<i64: 1, 32>}, {transform_indices = @transform_3, window_bounds = array<i64: 400, 32>}]} {
    %c0 = arith.constant 0 : index
    %c0_0 = arith.constant 0 : index
    %0 = vector.load %arg1[%c0, %c0_0] : memref<400x256xbf16, #tpu.memory_space<vmem>>, vector<400x256xbf16>
    %c0_1 = arith.constant 0 : index
    %c0_2 = arith.constant 0 : index
    %1 = vector.load %arg2[%c0_1, %c0_2] : memref<256x32xbf16, #tpu.memory_space<vmem>>, vector<256x32xbf16>
    %cst = arith.constant dense<0.000000e+00> : vector<400x32xf32>
    %2 = tpu.matmul %0, %1, %cst {dimension_numbers = #tpu.dot_dimension_numbers<[1], [0], [0], [1], [0, 0, 1, 1], [], []>} : vector<400x256xbf16>, vector<256x32xbf16>, vector<400x32xf32> -> vector<400x32xf32>
    %c0_3 = arith.constant 0 : index
    %c0_4 = arith.constant 0 : index
    %3 = vector.load %arg3[%c0_3, %c0_4] : memref<1x32xf32, #tpu.memory_space<vmem>>, vector<1x32xf32>
    %4 = vector.broadcast %3 : vector<1x32xf32> to vector<400x32xf32>
    %5 = arith.addf %2, %4 : vector<400x32xf32>
    %cst_5 = arith.constant 0.000000e+00 : f32
    %6 = vector.broadcast %cst_5 : f32 to vector<400x32xf32>
    %7 = arith.maximumf %5, %6 : vector<400x32xf32>
    %8 = arith.truncf %7 : vector<400x32xf32> to vector<400x32xbf16>
    %c0_6 = arith.constant 0 : index
    %c0_7 = arith.constant 0 : index
    %9 = vector.load %arg4[%c0_6, %c0_7] : memref<400x32xbf16, #tpu.memory_space<vmem>>, vector<400x32xbf16>
    tpu.vector_store %arg4[%c0_6, %c0_7], %8 {strides = array<i32>} : memref<400x32xbf16, #tpu.memory_space<vmem>>, vector<400x32xbf16>,
    return
  }
  func.func @transform_0(%arg0: i32) -> (i32, i32) {
    %c0_i32 = arith.constant 0 : i32
    %c0_i32_0 = arith.constant 0 : i32
    return %arg0, %c0_i32 : i32, i32
  }
  func.func @transform_1(%arg0: i32) -> (i32, i32) {
    %c0_i32 = arith.constant 0 : i32
    %c0_i32_0 = arith.constant 0 : i32
    %c0_i32_1 = arith.constant 0 : i32
    return %c0_i32, %c0_i32_0 : i32, i32
  }
  func.func @transform_2(%arg0: i32) -> (i32, i32) {
    %c0_i32 = arith.constant 0 : i32
    %c0_i32_0 = arith.constant 0 : i32
    %c0_i32_1 = arith.constant 0 : i32
    return %c0_i32, %c0_i32_0 : i32, i32
  }
  func.func @transform_3(%arg0: i32) -> (i32, i32) {
    %c0_i32 = arith.constant 0 : i32
    %c0_i32_0 = arith.constant 0 : i32
    return %arg0, %c0_i32 : i32, i32
  }
}

module attributes {stable_mosaic.version = 11 : i64} {
  func.func @_matmul_bias_relu_kernel(%arg0: i32, %arg1: memref<96x512xbf16, #tpu.memory_space<vmem>>, %arg2: memref<512x64xbf16, #tpu.memory_space<vmem>>, %arg3: memref<1x64xf32, #tpu.memory_space<vmem>>, %arg4: memref<96x64xbf16, #tpu.memory_space<vmem>>) attributes {dimension_semantics = [#tpu.dimension_semantics<parallel>], iteration_bounds = array<i64: 2>, scalar_prefetch = 0 : i64, scratch_operands = 0 : i64, tpu.core_type = #tpu.core_type<tc>, window_params = [{transform_indices = @transform_0, window_bounds = array<i64: 96, 512>}, {pipeline_mode = #tpu.pipeline_mode<synchronous>, transform_indices = @transform_1, window_bounds = array<i64: 512, 64>}, {pipeline_mode = #tpu.pipeline_mode<synchronous>, transform_indices = @transform_2, window_bounds = array<i64: 1, 64>}, {transform_indices = @transform_3, window_bounds = array<i64: 96, 64>}]} {
    %c0 = arith.constant 0 : index
    %c0_0 = arith.constant 0 : index
    %0 = vector.load %arg1[%c0, %c0_0] : memref<96x512xbf16, #tpu.memory_space<vmem>>, vector<96x512xbf16>
    %c0_1 = arith.constant 0 : index
    %c0_2 = arith.constant 0 : index
    %1 = vector.load %arg2[%c0_1, %c0_2] : memref<512x64xbf16, #tpu.memory_space<vmem>>, vector<512x64xbf16>
    %cst = arith.constant dense<0.000000e+00> : vector<96x64xf32>
    %2 = tpu.matmul %0, %1, %cst {dimension_numbers = #tpu.dot_dimension_numbers<[1], [0], [0], [1], [0, 0, 1, 1], [], []>} : vector<96x512xbf16>, vector<512x64xbf16>, vector<96x64xf32> -> vector<96x64xf32>
    %c0_3 = arith.constant 0 : index
    %c0_4 = arith.constant 0 : index
    %3 = vector.load %arg3[%c0_3, %c0_4] : memref<1x64xf32, #tpu.memory_space<vmem>>, vector<1x64xf32>
    %4 = vector.broadcast %3 : vector<1x64xf32> to vector<96x64xf32>
    %5 = arith.addf %2, %4 : vector<96x64xf32>
    %cst_5 = arith.constant 0.000000e+00 : f32
    %6 = vector.broadcast %cst_5 : f32 to vector<96x64xf32>
    %7 = arith.maximumf %5, %6 : vector<96x64xf32>
    %8 = arith.truncf %7 : vector<96x64xf32> to vector<96x64xbf16>
    %c0_6 = arith.constant 0 : index
    %c0_7 = arith.constant 0 : index
    %9 = vector.load %arg4[%c0_6, %c0_7] : memref<96x64xbf16, #tpu.memory_space<vmem>>, vector<96x64xbf16>
    tpu.vector_store %arg4[%c0_6, %c0_7], %8 {strides = array<i32>} : memref<96x64xbf16, #tpu.memory_space<vmem>>, vector<96x64xbf16>,
    return
  }
  func.func @transform_0(%arg0: i32) -> (i32, i32) {
    %c0_i32 = arith.constant 0 : i32
    %c0_i32_0 = arith.constant 0 : i32
    return %arg0, %c0_i32 : i32, i32
  }
  func.func @transform_1(%arg0: i32) -> (i32, i32) {
    %c0_i32 = arith.constant 0 : i32
    %c0_i32_0 = arith.constant 0 : i32
    %c0_i32_1 = arith.constant 0 : i32
    return %c0_i32, %c0_i32_0 : i32, i32
  }
  func.func @transform_2(%arg0: i32) -> (i32, i32) {
    %c0_i32 = arith.constant 0 : i32
    %c0_i32_0 = arith.constant 0 : i32
    %c0_i32_1 = arith.constant 0 : i32
    return %c0_i32, %c0_i32_0 : i32, i32
  }
  func.func @transform_3(%arg0: i32) -> (i32, i32) {
    %c0_i32 = arith.constant 0 : i32
    %c0_i32_0 = arith.constant 0 : i32
    return %arg0, %c0_i32 : i32, i32
  }
}

module attributes {stable_mosaic.version = 11 : i64} {
  func.func @_matmul_bias_relu_kernel(%arg0: i32, %arg1: memref<64x576xbf16, #tpu.memory_space<vmem>>, %arg2: memref<576x64xbf16, #tpu.memory_space<vmem>>, %arg3: memref<1x64xf32, #tpu.memory_space<vmem>>, %arg4: memref<64x64xbf16, #tpu.memory_space<vmem>>) attributes {dimension_semantics = [#tpu.dimension_semantics<parallel>], iteration_bounds = array<i64: 2>, scalar_prefetch = 0 : i64, scratch_operands = 0 : i64, tpu.core_type = #tpu.core_type<tc>, window_params = [{transform_indices = @transform_0, window_bounds = array<i64: 64, 576>}, {pipeline_mode = #tpu.pipeline_mode<synchronous>, transform_indices = @transform_1, window_bounds = array<i64: 576, 64>}, {pipeline_mode = #tpu.pipeline_mode<synchronous>, transform_indices = @transform_2, window_bounds = array<i64: 1, 64>}, {transform_indices = @transform_3, window_bounds = array<i64: 64, 64>}]} {
    %c0 = arith.constant 0 : index
    %c0_0 = arith.constant 0 : index
    %0 = vector.load %arg1[%c0, %c0_0] : memref<64x576xbf16, #tpu.memory_space<vmem>>, vector<64x576xbf16>
    %c0_1 = arith.constant 0 : index
    %c0_2 = arith.constant 0 : index
    %1 = vector.load %arg2[%c0_1, %c0_2] : memref<576x64xbf16, #tpu.memory_space<vmem>>, vector<576x64xbf16>
    %cst = arith.constant dense<0.000000e+00> : vector<64x64xf32>
    %2 = tpu.matmul %0, %1, %cst {dimension_numbers = #tpu.dot_dimension_numbers<[1], [0], [0], [1], [0, 0, 1, 1], [], []>} : vector<64x576xbf16>, vector<576x64xbf16>, vector<64x64xf32> -> vector<64x64xf32>
    %c0_3 = arith.constant 0 : index
    %c0_4 = arith.constant 0 : index
    %3 = vector.load %arg3[%c0_3, %c0_4] : memref<1x64xf32, #tpu.memory_space<vmem>>, vector<1x64xf32>
    %4 = vector.broadcast %3 : vector<1x64xf32> to vector<64x64xf32>
    %5 = arith.addf %2, %4 : vector<64x64xf32>
    %cst_5 = arith.constant 0.000000e+00 : f32
    %6 = vector.broadcast %cst_5 : f32 to vector<64x64xf32>
    %7 = arith.maximumf %5, %6 : vector<64x64xf32>
    %8 = arith.truncf %7 : vector<64x64xf32> to vector<64x64xbf16>
    %c0_6 = arith.constant 0 : index
    %c0_7 = arith.constant 0 : index
    %9 = vector.load %arg4[%c0_6, %c0_7] : memref<64x64xbf16, #tpu.memory_space<vmem>>, vector<64x64xbf16>
    tpu.vector_store %arg4[%c0_6, %c0_7], %8 {strides = array<i32>} : memref<64x64xbf16, #tpu.memory_space<vmem>>, vector<64x64xbf16>,
    return
  }
  func.func @transform_0(%arg0: i32) -> (i32, i32) {
    %c0_i32 = arith.constant 0 : i32
    %c0_i32_0 = arith.constant 0 : i32
    return %arg0, %c0_i32 : i32, i32
  }
  func.func @transform_1(%arg0: i32) -> (i32, i32) {
    %c0_i32 = arith.constant 0 : i32
    %c0_i32_0 = arith.constant 0 : i32
    %c0_i32_1 = arith.constant 0 : i32
    return %c0_i32, %c0_i32_0 : i32, i32
  }
  func.func @transform_2(%arg0: i32) -> (i32, i32) {
    %c0_i32 = arith.constant 0 : i32
    %c0_i32_0 = arith.constant 0 : i32
    %c0_i32_1 = arith.constant 0 : i32
    return %c0_i32, %c0_i32_0 : i32, i32
  }
  func.func @transform_3(%arg0: i32) -> (i32, i32) {
    %c0_i32 = arith.constant 0 : i32
    %c0_i32_0 = arith.constant 0 : i32
    return %arg0, %c0_i32 : i32, i32
  }
}

module attributes {stable_mosaic.version = 11 : i64} {
  func.func @_fc_stack_kernel(%arg0: i32, %arg1: memref<2x3136xbf16, #tpu.memory_space<vmem>>, %arg2: memref<3136x512xbf16, #tpu.memory_space<vmem>>, %arg3: memref<1x512xf32, #tpu.memory_space<vmem>>, %arg4: memref<512x64xbf16, #tpu.memory_space<vmem>>, %arg5: memref<1x64xf32, #tpu.memory_space<vmem>>, %arg6: memref<64x6xbf16, #tpu.memory_space<vmem>>, %arg7: memref<1x6xf32, #tpu.memory_space<vmem>>, %arg8: memref<2x6xf32, #tpu.memory_space<vmem>>) attributes {dimension_semantics = [#tpu.dimension_semantics<parallel>], iteration_bounds = array<i64: 1>, scalar_prefetch = 0 : i64, scratch_operands = 0 : i64, tpu.core_type = #tpu.core_type<tc>, window_params = [{transform_indices = @transform_0, window_bounds = array<i64: 2, 3136>}, {pipeline_mode = #tpu.pipeline_mode<synchronous>, transform_indices = @transform_1, window_bounds = array<i64: 3136, 512>}, {pipeline_mode = #tpu.pipeline_mode<synchronous>, transform_indices = @transform_2, window_bounds = array<i64: 1, 512>}, {pipeline_mode = #tpu.pipeline_mode<synchronous>, transform_indices = @transform_3, window_bounds = array<i64: 512, 64>}, {pipeline_mode = #tpu.pipeline_mode<synchronous>, transform_indices = @transform_4, window_bounds = array<i64: 1, 64>}, {pipeline_mode = #tpu.pipeline_mode<synchronous>, transform_indices = @transform_5, window_bounds = array<i64: 64, 6>}, {pipeline_mode = #tpu.pipeline_mode<synchronous>, transform_indices = @transform_6, window_bounds = array<i64: 1, 6>}, {transform_indices = @transform_7, window_bounds = array<i64: 2, 6>}]} {
    %c0 = arith.constant 0 : index
    %c0_0 = arith.constant 0 : index
    %0 = vector.load %arg1[%c0, %c0_0] : memref<2x3136xbf16, #tpu.memory_space<vmem>>, vector<2x3136xbf16>
    %c0_1 = arith.constant 0 : index
    %c0_2 = arith.constant 0 : index
    %1 = vector.load %arg2[%c0_1, %c0_2] : memref<3136x512xbf16, #tpu.memory_space<vmem>>, vector<3136x512xbf16>
    %cst = arith.constant dense<0.000000e+00> : vector<2x512xf32>
    %2 = tpu.matmul %0, %1, %cst {dimension_numbers = #tpu.dot_dimension_numbers<[1], [0], [0], [1], [0, 0, 1, 1], [], []>} : vector<2x3136xbf16>, vector<3136x512xbf16>, vector<2x512xf32> -> vector<2x512xf32>
    %c0_3 = arith.constant 0 : index
    %c0_4 = arith.constant 0 : index
    %3 = vector.load %arg3[%c0_3, %c0_4] : memref<1x512xf32, #tpu.memory_space<vmem>>, vector<1x512xf32>
    %4 = vector.broadcast %3 : vector<1x512xf32> to vector<2x512xf32>
    %5 = arith.addf %2, %4 : vector<2x512xf32>
    %cst_5 = arith.constant 0.000000e+00 : f32
    %6 = vector.broadcast %cst_5 : f32 to vector<2x512xf32>
    %7 = arith.maximumf %5, %6 : vector<2x512xf32>
    %8 = arith.truncf %7 : vector<2x512xf32> to vector<2x512xbf16>
    %c0_6 = arith.constant 0 : index
    %c0_7 = arith.constant 0 : index
    %9 = vector.load %arg4[%c0_6, %c0_7] : memref<512x64xbf16, #tpu.memory_space<vmem>>, vector<512x64xbf16>
    %cst_8 = arith.constant dense<0.000000e+00> : vector<2x64xf32>
    %10 = tpu.matmul %8, %9, %cst_8 {dimension_numbers = #tpu.dot_dimension_numbers<[1], [0], [0], [1], [0, 0, 1, 1], [], []>} : vector<2x512xbf16>, vector<512x64xbf16>, vector<2x64xf32> -> vector<2x64xf32>
    %c0_9 = arith.constant 0 : index
    %c0_10 = arith.constant 0 : index
    %11 = vector.load %arg5[%c0_9, %c0_10] : memref<1x64xf32, #tpu.memory_space<vmem>>, vector<1x64xf32>
    %12 = vector.broadcast %11 : vector<1x64xf32> to vector<2x64xf32>
    %13 = arith.addf %10, %12 : vector<2x64xf32>
    %cst_11 = arith.constant 0.000000e+00 : f32
    %14 = vector.broadcast %cst_11 : f32 to vector<2x64xf32>
    %15 = arith.maximumf %13, %14 : vector<2x64xf32>
    %16 = arith.truncf %15 : vector<2x64xf32> to vector<2x64xbf16>
    %c0_12 = arith.constant 0 : index
    %c0_13 = arith.constant 0 : index
    %17 = vector.load %arg6[%c0_12, %c0_13] : memref<64x6xbf16, #tpu.memory_space<vmem>>, vector<64x6xbf16>
    %cst_14 = arith.constant dense<0.000000e+00> : vector<2x6xf32>
    %18 = tpu.matmul %16, %17, %cst_14 {dimension_numbers = #tpu.dot_dimension_numbers<[1], [0], [0], [1], [0, 0, 1, 1], [], []>} : vector<2x64xbf16>, vector<64x6xbf16>, vector<2x6xf32> -> vector<2x6xf32>
    %c0_15 = arith.constant 0 : index
    %c0_16 = arith.constant 0 : index
    %19 = vector.load %arg7[%c0_15, %c0_16] : memref<1x6xf32, #tpu.memory_space<vmem>>, vector<1x6xf32>
    %20 = vector.broadcast %19 : vector<1x6xf32> to vector<2x6xf32>
    %21 = arith.addf %18, %20 : vector<2x6xf32>
    %c0_17 = arith.constant 0 : index
    %c0_18 = arith.constant 0 : index
    %22 = vector.load %arg8[%c0_17, %c0_18] : memref<2x6xf32, #tpu.memory_space<vmem>>, vector<2x6xf32>
    tpu.vector_store %arg8[%c0_17, %c0_18], %21 {strides = array<i32>} : memref<2x6xf32, #tpu.memory_space<vmem>>, vector<2x6xf32>,
    return
  }
  func.func @transform_0(%arg0: i32) -> (i32, i32) {
    %c0_i32 = arith.constant 0 : i32
    %c0_i32_0 = arith.constant 0 : i32
    return %arg0, %c0_i32 : i32, i32
  }
  func.func @transform_1(%arg0: i32) -> (i32, i32) {
    %c0_i32 = arith.constant 0 : i32
    %c0_i32_0 = arith.constant 0 : i32
    %c0_i32_1 = arith.constant 0 : i32
    return %c0_i32, %c0_i32_0 : i32, i32
  }
  func.func @transform_2(%arg0: i32) -> (i32, i32) {
    %c0_i32 = arith.constant 0 : i32
    %c0_i32_0 = arith.constant 0 : i32
    %c0_i32_1 = arith.constant 0 : i32
    return %c0_i32, %c0_i32_0 : i32, i32
  }
  func.func @transform_3(%arg0: i32) -> (i32, i32) {
    %c0_i32 = arith.constant 0 : i32
    %c0_i32_0 = arith.constant 0 : i32
    %c0_i32_1 = arith.constant 0 : i32
    return %c0_i32, %c0_i32_0 : i32, i32
  }
  func.func @transform_4(%arg0: i32) -> (i32, i32) {
    %c0_i32 = arith.constant 0 : i32
    %c0_i32_0 = arith.constant 0 : i32
    %c0_i32_1 = arith.constant 0 : i32
    return %c0_i32, %c0_i32_0 : i32, i32
  }
  func.func @transform_5(%arg0: i32) -> (i32, i32) {
    %c0_i32 = arith.constant 0 : i32
    %c0_i32_0 = arith.constant 0 : i32
    %c0_i32_1 = arith.constant 0 : i32
    return %c0_i32, %c0_i32_0 : i32, i32
  }
  func.func @transform_6(%arg0: i32) -> (i32, i32) {
    %c0_i32 = arith.constant 0 : i32
    %c0_i32_0 = arith.constant 0 : i32
    %c0_i32_1 = arith.constant 0 : i32
    return %c0_i32, %c0_i32_0 : i32, i32
  }
  func.func @transform_7(%arg0: i32) -> (i32, i32) {
    %c0_i32 = arith.constant 0 : i32
    %c0_i32_0 = arith.constant 0 : i32
    return %arg0, %c0_i32 : i32, i32
  }
}

</mosaic_0001>

<bundles_post_ra>
// kernel: dqn_forward.4
= control target key start
LH: loop header
LB: loop body
LE: loop exit
PB: predicated region body
PF: predicated region fallthrough
CT: control target
= control target key end

     0   :  { %s1542_s12 = smov 0   ;;  %s1852_s0 = inlined_call_operand.vmem [shape: bf16[800,256], index: 0, kind: input, shape index: {}]   ;;  %s1853_s1 = inlined_call_operand.vmem [shape: bf16[256,32], index: 1, kind: input, shape index: {}]   ;;  %s1854_s2 = inlined_call_operand.vmem [shape: f32[1,32], index: 2, kind: input, shape index: {}]   ;;  %s1855_s3 = inlined_call_operand.vmem [shape: bf16[800,32], index: 3, kind: output, shape index: {}]  }
   0x1 LB: > { %s1203_s13 = sadd.s32 4294967295, %s1519_s12   ;;  %p1207_p0 = scmp.ge.s32.totalorder %s1519_s12, 1  ;;  %s1519_s12 = sphi %s1542_s12, %s13_s12  }
   0x2   : > { %p139_p1 = scmp.lt.s32.totalorder %s1519_s12, 3 }
   0x4   : > { %p140_p2 = pnand %p1207_p0, %p139_p1 }
   0x5   : > { %v1422_v0 = vld [vmem:[%s1853_s1] sm:$0xff] (!%p140_p2)   ;;  %v1521_v1 = vmov (!%p140_p2), 0   ;;  %s164_s16 = smul.u32 (!%p140_p2), 50, %s1203_s13  ;;  %v1423_v2 = vld [vmem:[%s1853_s1 + $0x8] sm:$0xff] (!%p140_p2)   ;;  %v1424_v3 = vld [vmem:[%s1853_s1 + $0x10] sm:$0xff] (!%p140_p2)   ;;  %vm1096_vm0 = vcmask (!%p140_p2), 257024  }
   0x6   : > { %143 = sbr.rel (%p140_p2) target bundleno = 387 (0x183), region = 32  ;;  %613 = vmatprep.subr.bf16.mxu0 (!%p140_p2), %v1521_v1  ;;  %1381 = vmatprep.subr.bf16.mxu1 (!%p140_p2), %v1521_v1  ;;  %v1425_v4 = vld [vmem:[%s1853_s1 + $0x18] sm:$0xff] (!%p140_p2)   ;;  %v1426_v5 = vld [vmem:[%s1853_s1 + $0x20] sm:$0xff] (!%p140_p2)   ;;  %v1427_v7 = vld [vmem:[%s1853_s1 + $0x28] sm:$0xff] (!%p140_p2)  }
   0x7   : > { %614 = vmatpush1.bf16.msra.mxu0 (!%p140_p2), %v1422_v0  ;;  %1397 = vmatpush1.bf16.msra.mxu1 (!%p140_p2), %v1422_v0  ;;  %p165_p3 = scmp.lt.s32.totalorder (!%p140_p2), %s164_s16, 99  ;;  %v1428_v9 = vld [vmem:[%s1853_s1 + $0x30] sm:$0xff] (!%p140_p2)   ;;  %v1429_v10 = vld [vmem:[%s1853_s1 + $0x38] sm:$0xff] (!%p140_p2)   ;;  %v1430_v11 = vld [vmem:[%s1853_s1 + $0x40] sm:$0xff] (!%p140_p2)  }
   0x8   : > { %615 = vmatprep.subr.bf16.mxu0 (!%p140_p2), %v1521_v1  ;;  %1382 = vmatprep.subr.bf16.mxu1 (!%p140_p2), %v1521_v1  ;;  %v1431_v12 = vld [vmem:[%s1853_s1 + $0x48] sm:$0xff] (!%p140_p2)   ;;  %v1432_v13 = vld [vmem:[%s1853_s1 + $0x50] sm:$0xff] (!%p140_p2)   ;;  %v1433_v14 = vld [vmem:[%s1853_s1 + $0x58] sm:$0xff] (!%p140_p2)  }
   0x9   : > { %v1434_v15 = vld [vmem:[%s1853_s1 + $0x60] sm:$0xff] (!%p140_p2)   ;;  %v1435_v16 = vld [vmem:[%s1853_s1 + $0x68] sm:$0xff] (!%p140_p2)   ;;  %v1436_v17 = vld [vmem:[%s1853_s1 + $0x70] sm:$0xff] (!%p140_p2)  }
   0xa   : > { %v1437_v18 = vld [vmem:[%s1853_s1 + $0x78] sm:$0xff] (!%p140_p2)  }
   0xb   : > { %616 = vmatpush1.bf16.msra.mxu0 (!%p140_p2), %v1423_v2  ;;  %1398 = vmatpush1.bf16.msra.mxu1 (!%p140_p2), %v1423_v2 }
   0xc   : > { %617 = vmatprep.subr.bf16.mxu0 (!%p140_p2), %v1521_v1  ;;  %1383 = vmatprep.subr.bf16.mxu1 (!%p140_p2), %v1521_v1 }
   0xd   : > { %s1857_s16 = smov (!%p165_p3, %s164_s16), 99 }
   0xe   : > { %s1330_s23 = sshll.u32 %s1857_s16, 3  ;;  %s1210_s29 = sshll.u32 %s1857_s16, 2 }
   0xf   : > { %618 = vmatpush1.bf16.msra.mxu0 %v1424_v3  ;;  %1399 = vmatpush1.bf16.msra.mxu1 %v1424_v3  ;;  %s1579_s28 = scalar_lea.vmem %s1852_s0, %s1330_s23  ;;  %v1691_v3 = vld [vmem:[%s1854_s2] ss:$0 sm:$0xff]  ;;  %s1701_s16 = scalar_lea.vmem %s1855_s3, %s1210_s29 }
  0x10   : > { %619 = vmatprep.subr.bf16.mxu0 %v1521_v1  ;;  %1384 = vmatprep.subr.bf16.mxu1 %v1521_v1  ;;  %v1440_v6 = vld [vmem:[%s1579_s28 + $0x4] ss:$8 sps:$4 sm:$0xff]   ;;  %v1443_v8 = vld [vmem:[%s1579_s28 + $0xd4] ss:$8 sps:$4 sm:$0xff]   ;;  %v1438_v19 = vld [vmem:[%s1579_s28] ss:$8 sps:$4 sm:$0xff]  }
  0x11   : > { %645 = vmatprep.mubr.bf16.mxu0 %v1440_v6  ;;  %749 = vmatprep.mubr.bf16.mxu1 %v1443_v8  ;;  %v1441_v20 = vld [vmem:[%s1579_s28 + $0xd0] ss:$8 sps:$4 sm:$0xff]   ;;  %v1444_v21 = vld [vmem:[%s1579_s28 + $0x14] ss:$8 sps:$4 sm:$0xff]   ;;  %v1447_v22 = vld [vmem:[%s1579_s28 + $0xe4] ss:$8 sps:$4 sm:$0xff]  }
  0x12   : > { %v1446_v23 = vld [vmem:[%s1579_s28 + $0x10] ss:$8 sps:$4 sm:$0xff]   ;;  %v1449_v24 = vld [vmem:[%s1579_s28 + $0xe0] ss:$8 sps:$4 sm:$0xff]   ;;  %v1450_v25 = vld [vmem:[%s1579_s28 + $0x24] ss:$8 sps:$4 sm:$0xff]  }
  0x13   : > { %620 = vmatpush1.bf16.msra.mxu0 %v1425_v4  ;;  %1400 = vmatpush1.bf16.msra.mxu1 %v1425_v4  ;;  %v1453_v26 = vld [vmem:[%s1579_s28 + $0xf4] ss:$8 sps:$4 sm:$0xff]   ;;  %v1452_v27 = vld [vmem:[%s1579_s28 + $0x20] ss:$8 sps:$4 sm:$0xff]   ;;  %v1455_v28 = vld [vmem:[%s1579_s28 + $0xf0] ss:$8 sps:$4 sm:$0xff]  }
  0x14   : > { %621 = vmatprep.subr.bf16.mxu0 %v1521_v1  ;;  %1385 = vmatprep.subr.bf16.mxu1 %v1521_v1  ;;  %v1456_v29 = vld [vmem:[%s1579_s28 + $0x34] ss:$8 sps:$4 sm:$0xff]   ;;  %v1459_v30 = vld [vmem:[%s1579_s28 + $0x104] ss:$8 sps:$4 sm:$0xff]   ;;  %v1458_v31 = vld [vmem:[%s1579_s28 + $0x30] ss:$8 sps:$4 sm:$0xff]  }
  0x15   : > { %v1461_v32 = vld [vmem:[%s1579_s28 + $0x100] ss:$8 sps:$4 sm:$0xff]   ;;  %v1462_v33 = vld [vmem:[%s1579_s28 + $0x44] ss:$8 sps:$4 sm:$0xff]   ;;  %v1465_v34 = vld [vmem:[%s1579_s28 + $0x114] ss:$8 sps:$4 sm:$0xff]  }
  0x16   : > { %v1464_v35 = vld [vmem:[%s1579_s28 + $0x40] ss:$8 sps:$4 sm:$0xff]   ;;  %v1467_v36 = vld [vmem:[%s1579_s28 + $0x110] ss:$8 sps:$4 sm:$0xff]   ;;  %v1468_v37 = vld [vmem:[%s1579_s28 + $0x54] ss:$8 sps:$4 sm:$0xff]  }
  0x17   : > { %622 = vmatpush1.bf16.msra.mxu0 %v1426_v5  ;;  %1401 = vmatpush1.bf16.msra.mxu1 %v1426_v5  ;;  %v1471_v38 = vld [vmem:[%s1579_s28 + $0x124] ss:$8 sps:$4 sm:$0xff]   ;;  %v1470_v39 = vld [vmem:[%s1579_s28 + $0x50] ss:$8 sps:$4 sm:$0xff]   ;;  %v1473_v40 = vld [vmem:[%s1579_s28 + $0x120] ss:$8 sps:$4 sm:$0xff]  }
  0x18   : > { %623 = vmatprep.subr.bf16.mxu0 %v1521_v1  ;;  %1386 = vmatprep.subr.bf16.mxu1 %v1521_v1  ;;  %v1474_v41 = vld [vmem:[%s1579_s28 + $0x64] ss:$8 sps:$4 sm:$0xff]   ;;  %v1477_v42 = vld [vmem:[%s1579_s28 + $0x134] ss:$8 sps:$4 sm:$0xff]   ;;  %v1476_v43 = vld [vmem:[%s1579_s28 + $0x60] ss:$8 sps:$4 sm:$0xff]  }
  0x19   : > { %v1479_v44 = vld [vmem:[%s1579_s28 + $0x130] ss:$8 sps:$4 sm:$0xff]   ;;  %v1480_v45 = vld [vmem:[%s1579_s28 + $0x74] ss:$8 sps:$4 sm:$0xff]   ;;  %v1483_v46 = vld [vmem:[%s1579_s28 + $0x144] ss:$8 sps:$4 sm:$0xff]  }
  0x1a   : > { %v1482_v47 = vld [vmem:[%s1579_s28 + $0x70] ss:$8 sps:$4 sm:$0xff]   ;;  %v1485_v48 = vld [vmem:[%s1579_s28 + $0x140] ss:$8 sps:$4 sm:$0xff]   ;;  %v1486_v49 = vld [vmem:[%s1579_s28 + $0x84] ss:$8 sps:$4 sm:$0xff]  }
  0x1b   : > { %624 = vmatpush1.bf16.msra.mxu0 %v1427_v7  ;;  %1402 = vmatpush1.bf16.msra.mxu1 %v1427_v7  ;;  %v1489_v50 = vld [vmem:[%s1579_s28 + $0x154] ss:$8 sps:$4 sm:$0xff]   ;;  %v1488_v51 = vld [vmem:[%s1579_s28 + $0x80] ss:$8 sps:$4 sm:$0xff]   ;;  %v1491_v52 = vld [vmem:[%s1579_s28 + $0x150] ss:$8 sps:$4 sm:$0xff]  }
  0x1c   : > { %625 = vmatprep.subr.bf16.mxu0 %v1521_v1  ;;  %1387 = vmatprep.subr.bf16.mxu1 %v1521_v1  ;;  %v1492_v53 = vld [vmem:[%s1579_s28 + $0x94] ss:$8 sps:$4 sm:$0xff]   ;;  %v1495_v54 = vld [vmem:[%s1579_s28 + $0x164] ss:$8 sps:$4 sm:$0xff]   ;;  %v1494_v55 = vld [vmem:[%s1579_s28 + $0x90] ss:$8 sps:$4 sm:$0xff]  }
  0x1d   : > { %v1497_v56 = vld [vmem:[%s1579_s28 + $0x160] ss:$8 sps:$4 sm:$0xff]   ;;  %v1498_v57 = vld [vmem:[%s1579_s28 + $0xa4] ss:$8 sps:$4 sm:$0xff]   ;;  %v1501_v58 = vld [vmem:[%s1579_s28 + $0x174] ss:$8 sps:$4 sm:$0xff]  }
  0x1e   : > { %v1500_v59 = vld [vmem:[%s1579_s28 + $0xa0] ss:$8 sps:$4 sm:$0xff]   ;;  %v1503_v60 = vld [vmem:[%s1579_s28 + $0x170] ss:$8 sps:$4 sm:$0xff]   ;;  %v1504_v61 = vld [vmem:[%s1579_s28 + $0xb4] ss:$8 sps:$4 sm:$0xff]  }
  0x1f   : > { %626 = vmatpush1.bf16.msra.mxu0 %v1428_v9  ;;  %1403 = vmatpush1.bf16.msra.mxu1 %v1428_v9  ;;  %v1507_v62 = vld [vmem:[%s1579_s28 + $0x184] ss:$8 sps:$4 sm:$0xff]   ;;  %v1506_v63 = vld [vmem:[%s1579_s28 + $0xb0] ss:$8 sps:$4 sm:$0xff]   ;;  %v1509_v0 = vld [vmem:[%s1579_s28 + $0x180] ss:$8 sps:$4 sm:$0xff]  }
  0x20   : > { %627 = vmatprep.subr.bf16.mxu0 %v1521_v1  ;;  %1388 = vmatprep.subr.bf16.mxu1 %v1521_v1  ;;  %v1512_v2 = vld [vmem:[%s1579_s28 + $0xc0] ss:$8 sps:$4 sm:$0xff]  }
  0x23   : > { %628 = vmatpush1.bf16.msra.mxu0 %v1429_v10  ;;  %1404 = vmatpush1.bf16.msra.mxu1 %v1429_v10 }
  0x24   : > { %629 = vmatprep.subr.bf16.mxu0 %v1521_v1  ;;  %1389 = vmatprep.subr.bf16.mxu1 %v1521_v1 }
  0x27   : > { %630 = vmatpush1.bf16.msra.mxu0 %v1430_v11  ;;  %1405 = vmatpush1.bf16.msra.mxu1 %v1430_v11 }
  0x28   : > { %631 = vmatprep.subr.bf16.mxu0 %v1521_v1  ;;  %1390 = vmatprep.subr.bf16.mxu1 %v1521_v1 }
  0x2b   : > { %632 = vmatpush1.bf16.msra.mxu0 %v1431_v12  ;;  %1406 = vmatpush1.bf16.msra.mxu1 %v1431_v12 }
  0x2c   : > { %633 = vmatprep.subr.bf16.mxu0 %v1521_v1  ;;  %1391 = vmatprep.subr.bf16.mxu1 %v1521_v1 }
  0x2f   : > { %634 = vmatpush1.bf16.msra.mxu0 %v1432_v13  ;;  %1407 = vmatpush1.bf16.msra.mxu1 %v1432_v13 }
  0x30   : > { %635 = vmatprep.subr.bf16.mxu0 %v1521_v1  ;;  %1392 = vmatprep.subr.bf16.mxu1 %v1521_v1 }
  0x33   : > { %636 = vmatpush1.bf16.msra.mxu0 %v1433_v14  ;;  %1408 = vmatpush1.bf16.msra.mxu1 %v1433_v14 }
  0x34   : > { %637 = vmatprep.subr.bf16.mxu0 %v1521_v1  ;;  %1393 = vmatprep.subr.bf16.mxu1 %v1521_v1 }
  0x37   : > { %638 = vmatpush1.bf16.msra.mxu0 %v1434_v15  ;;  %1409 = vmatpush1.bf16.msra.mxu1 %v1434_v15 }
  0x38   : > { %639 = vmatprep.subr.bf16.mxu0 %v1521_v1  ;;  %1394 = vmatprep.subr.bf16.mxu1 %v1521_v1 }
  0x3b   : > { %640 = vmatpush1.bf16.msra.mxu0 %v1435_v16  ;;  %1410 = vmatpush1.bf16.msra.mxu1 %v1435_v16 }
  0x3c   : > { %641 = vmatprep.subr.bf16.mxu0 %v1521_v1  ;;  %1395 = vmatprep.subr.bf16.mxu1 %v1521_v1 }
  0x3f   : > { %642 = vmatpush1.bf16.msra.mxu0 %v1436_v17  ;;  %1411 = vmatpush1.bf16.msra.mxu1 %v1436_v17 }
  0x40   : > { %643 = vmatprep.subr.bf16.mxu0 %v1521_v1  ;;  %1396 = vmatprep.subr.bf16.mxu1 %v1521_v1  ;;  %v1510_v1 = vld [vmem:[%s1579_s28 + $0xc4] ss:$8 sps:$4 sm:$0xff]  }
  0x43   : > { %644 = vmatpush1.bf16.msra.mxu0 %v1437_v18  ;;  %1412 = vmatpush1.bf16.msra.mxu1 %v1437_v18 }
  0x46   : > { %646 = vmatmul.mubr.bf16.vlgmr.msra.gmra.mrb[0].mxu0 %v1438_v19  ;;  %750 = vmatmul.mubr.bf16.vlgmr.msra.gmra.mrb[0].mxu1 %v1441_v20 }
  0x47   : > { %653 = vmatprep.mubr.bf16.mxu0 %v1444_v21  ;;  %757 = vmatprep.mubr.bf16.mxu1 %v1447_v22 }
  0x4e   : > { %654 = vmatmul.mubr.bf16.gmra.mrb[4].mxu0 %v1446_v23  ;;  %758 = vmatmul.mubr.bf16.gmra.mrb[4].mxu1 %v1449_v24 }
  0x4f   : > { %661 = vmatprep.mubr.bf16.mxu0 %v1450_v25  ;;  %765 = vmatprep.mubr.bf16.mxu1 %v1453_v26 }
  0x56   : > { %662 = vmatmul.mubr.bf16.gmra.mrb[8].mxu0 %v1452_v27  ;;  %766 = vmatmul.mubr.bf16.gmra.mrb[8].mxu1 %v1455_v28 }
  0x57   : > { %669 = vmatprep.mubr.bf16.mxu0 %v1456_v29  ;;  %773 = vmatprep.mubr.bf16.mxu1 %v1459_v30 }
  0x5e   : > { %670 = vmatmul.mubr.bf16.gmra.mrb[12].mxu0 %v1458_v31  ;;  %774 = vmatmul.mubr.bf16.gmra.mrb[12].mxu1 %v1461_v32 }
  0x5f   : > { %677 = vmatprep.mubr.bf16.mxu0 %v1462_v33  ;;  %781 = vmatprep.mubr.bf16.mxu1 %v1465_v34 }
  0x66   : > { %678 = vmatmul.mubr.bf16.gmra.mrb[16].mxu0 %v1464_v35  ;;  %782 = vmatmul.mubr.bf16.gmra.mrb[16].mxu1 %v1467_v36 }
  0x67   : > { %685 = vmatprep.mubr.bf16.mxu0 %v1468_v37  ;;  %789 = vmatprep.mubr.bf16.mxu1 %v1471_v38 }
  0x6e   : > { %686 = vmatmul.mubr.bf16.gmra.mrb[20].mxu0 %v1470_v39  ;;  %790 = vmatmul.mubr.bf16.gmra.mrb[20].mxu1 %v1473_v40 }
  0x6f   : > { %693 = vmatprep.mubr.bf16.mxu0 %v1474_v41  ;;  %797 = vmatprep.mubr.bf16.mxu1 %v1477_v42 }
  0x76   : > { %694 = vmatmul.mubr.bf16.gmra.mrb[24].mxu0 %v1476_v43  ;;  %798 = vmatmul.mubr.bf16.gmra.mrb[24].mxu1 %v1479_v44 }
  0x77   : > { %701 = vmatprep.mubr.bf16.mxu0 %v1480_v45  ;;  %805 = vmatprep.mubr.bf16.mxu1 %v1483_v46 }
  0x7e   : > { %702 = vmatmul.mubr.bf16.gmra.mrb[28].mxu0 %v1482_v47  ;;  %806 = vmatmul.mubr.bf16.gmra.mrb[28].mxu1 %v1485_v48 }
  0x7f   : > { %709 = vmatprep.mubr.bf16.mxu0 %v1486_v49  ;;  %813 = vmatprep.mubr.bf16.mxu1 %v1489_v50 }
  0x86   : > { %710 = vmatmul.mubr.bf16.gmra.mrb[32].mxu0 %v1488_v51  ;;  %814 = vmatmul.mubr.bf16.gmra.mrb[32].mxu1 %v1491_v52 }
  0x87   : > { %717 = vmatprep.mubr.bf16.mxu0 %v1492_v53  ;;  %821 = vmatprep.mubr.bf16.mxu1 %v1495_v54 }
  0x8e   : > { %718 = vmatmul.mubr.bf16.gmra.mrb[36].mxu0 %v1494_v55  ;;  %822 = vmatmul.mubr.bf16.gmra.mrb[36].mxu1 %v1497_v56 }
  0x8f   : > { %725 = vmatprep.mubr.bf16.mxu0 %v1498_v57  ;;  %829 = vmatprep.mubr.bf16.mxu1 %v1501_v58 }
  0x96   : > { %726 = vmatmul.mubr.bf16.gmra.mrb[40].mxu0 %v1500_v59  ;;  %830 = vmatmul.mubr.bf16.gmra.mrb[40].mxu1 %v1503_v60 }
  0x97   : > { %733 = vmatprep.mubr.bf16.mxu0 %v1504_v61  ;;  %837 = vmatprep.mubr.bf16.mxu1 %v1507_v62 }
  0x9e   : > { %734 = vmatmul.mubr.bf16.gmra.mrb[44].mxu0 %v1506_v63  ;;  %838 = vmatmul.mubr.bf16.gmra.mrb[44].mxu1 %v1509_v0 }
  0x9f   : > { %741 = vmatprep.mubr.bf16.mxu0 %v1510_v1 }
  0xa6   : > { %742 = vmatmul.mubr.bf16.gmra.mrb[48].mxu0 %v1512_v2 }
 0x119   : > { %v647_v4 = vpop.f32.mrb[0].mxu0  ;;  %v751_v5 = vpop.f32.mrb[0].mxu1 }
 0x11a   : > { %v648_v6 = vadd.f32 %v1691_v3, %v647_v4  ;;  %v649_v7 = vpop.f32.mrb[1].mxu0  ;;  %v752_v8 = vadd.f32 %v1691_v3, %v751_v5  ;;  %v753_v9 = vpop.f32.mrb[1].mxu1 }
 0x11b   : > { %v650_v10 = vpop.f32.mrb[2].mxu0  ;;  %v754_v11 = vpop.f32.mrb[2].mxu1 }
 0x11c   : > { %v846_v12 = vmax.f32 %v648_v6, 0.0  ;;  %v651_v13 = vadd.f32 %v1691_v3, %v650_v10  ;;  %v652_v14 = vpop.f32.mrb[3].mxu0  ;;  %v872_v15 = vmax.f32 %v752_v8, 0.0  ;;  %v755_v16 = vadd.f32 %v1691_v3, %v754_v11  ;;  %v756_v17 = vpop.f32.mrb[3].mxu1 }
 0x11e   : > { %v1331_v18 = vpack.c.bf16 %v846_v12, %v846_v12  ;;  %v847_v19 = vmax.f32 %v651_v13, 0.0  ;;  %v1357_v20 = vpack.c.bf16 %v872_v15, %v872_v15  ;;  %v873_v21 = vmax.f32 %v755_v16, 0.0 }
 0x120   : > { %1097 = vst.msk [vmem:[%s1701_s16] sm:$0xf] %vm1096_vm0, %v1331_v18  ;;  %v1332_v22 = vpack.c.bf16 %v847_v19, %v847_v19  ;;  %1123 = vst.msk [vmem:[%s1701_s16 + $0x68] sm:$0xf] %vm1096_vm0, %v1357_v20  ;;  %v1358_v23 = vpack.c.bf16 %v873_v21, %v873_v21 }
 0x121   : > { %v655_v24 = vpop.f32.mrb[4].mxu0  ;;  %v759_v25 = vpop.f32.mrb[4].mxu1 }
 0x122   : > { %1098 = vst.msk [vmem:[%s1701_s16 + $0x4] sm:$0xf] %vm1096_vm0, %v1332_v22  ;;  %1124 = vst.msk [vmem:[%s1701_s16 + $0x6c] sm:$0xf] %vm1096_vm0, %v1358_v23  ;;  %v656_v26 = vadd.f32 %v1691_v3, %v655_v24  ;;  %v657_v27 = vpop.f32.mrb[5].mxu0  ;;  %v760_v28 = vadd.f32 %v1691_v3, %v759_v25  ;;  %v761_v29 = vpop.f32.mrb[5].mxu1 }
 0x123   : > { %v658_v30 = vpop.f32.mrb[6].mxu0  ;;  %v762_v31 = vpop.f32.mrb[6].mxu1 }
 0x124   : > { %v848_v32 = vmax.f32 %v656_v26, 0.0  ;;  %v659_v33 = vadd.f32 %v1691_v3, %v658_v30  ;;  %v660_v34 = vpop.f32.mrb[7].mxu0  ;;  %v874_v35 = vmax.f32 %v760_v28, 0.0  ;;  %v763_v36 = vadd.f32 %v1691_v3, %v762_v31  ;;  %v764_v37 = vpop.f32.mrb[7].mxu1 }
 0x126   : > { %v1333_v38 = vpack.c.bf16 %v848_v32, %v848_v32  ;;  %v849_v39 = vmax.f32 %v659_v33, 0.0  ;;  %v1359_v40 = vpack.c.bf16 %v874_v35, %v874_v35  ;;  %v875_v41 = vmax.f32 %v763_v36, 0.0 }
 0x128   : > { %1099 = vst.msk [vmem:[%s1701_s16 + $0x8] sm:$0xf] %vm1096_vm0, %v1333_v38  ;;  %v1334_v42 = vpack.c.bf16 %v849_v39, %v849_v39  ;;  %1125 = vst.msk [vmem:[%s1701_s16 + $0x70] sm:$0xf] %vm1096_vm0, %v1359_v40  ;;  %v1360_v43 = vpack.c.bf16 %v875_v41, %v875_v41 }
 0x129   : > { %v663_v44 = vpop.f32.mrb[8].mxu0  ;;  %v767_v45 = vpop.f32.mrb[8].mxu1 }
 0x12a   : > { %1100 = vst.msk [vmem:[%s1701_s16 + $0xc] sm:$0xf] %vm1096_vm0, %v1334_v42  ;;  %1126 = vst.msk [vmem:[%s1701_s16 + $0x74] sm:$0xf] %vm1096_vm0, %v1360_v43  ;;  %v664_v46 = vadd.f32 %v1691_v3, %v663_v44  ;;  %v665_v47 = vpop.f32.mrb[9].mxu0  ;;  %v768_v48 = vadd.f32 %v1691_v3, %v767_v45  ;;  %v769_v49 = vpop.f32.mrb[9].mxu1 }
 0x12b   : > { %v666_v50 = vpop.f32.mrb[10].mxu0  ;;  %v770_v51 = vpop.f32.mrb[10].mxu1 }
 0x12c   : > { %v850_v52 = vmax.f32 %v664_v46, 0.0  ;;  %v667_v53 = vadd.f32 %v1691_v3, %v666_v50  ;;  %v668_v54 = vpop.f32.mrb[11].mxu0  ;;  %v876_v55 = vmax.f32 %v768_v48, 0.0  ;;  %v771_v56 = vadd.f32 %v1691_v3, %v770_v51  ;;  %v772_v57 = vpop.f32.mrb[11].mxu1 }
 0x12e   : > { %v1335_v58 = vpack.c.bf16 %v850_v52, %v850_v52  ;;  %v851_v59 = vmax.f32 %v667_v53, 0.0  ;;  %v1361_v60 = vpack.c.bf16 %v876_v55, %v876_v55  ;;  %v877_v61 = vmax.f32 %v771_v56, 0.0 }
 0x130   : > { %1101 = vst.msk [vmem:[%s1701_s16 + $0x10] sm:$0xf] %vm1096_vm0, %v1335_v58  ;;  %v1336_v62 = vpack.c.bf16 %v851_v59, %v851_v59  ;;  %1127 = vst.msk [vmem:[%s1701_s16 + $0x78] sm:$0xf] %vm1096_vm0, %v1361_v60  ;;  %v1362_v63 = vpack.c.bf16 %v877_v61, %v877_v61 }
 0x131   : > { %v671_v0 = vpop.f32.mrb[12].mxu0  ;;  %v775_v1 = vpop.f32.mrb[12].mxu1 }
 0x132   : > { %1102 = vst.msk [vmem:[%s1701_s16 + $0x14] sm:$0xf] %vm1096_vm0, %v1336_v62  ;;  %1128 = vst.msk [vmem:[%s1701_s16 + $0x7c] sm:$0xf] %vm1096_vm0, %v1362_v63  ;;  %v672_v2 = vadd.f32 %v1691_v3, %v671_v0  ;;  %v673_v4 = vpop.f32.mrb[13].mxu0  ;;  %v776_v5 = vadd.f32 %v1691_v3, %v775_v1  ;;  %v777_v6 = vpop.f32.mrb[13].mxu1 }
 0x133   : > { %v674_v7 = vpop.f32.mrb[14].mxu0  ;;  %v778_v8 = vpop.f32.mrb[14].mxu1 }
 0x134   : > { %v852_v9 = vmax.f32 %v672_v2, 0.0  ;;  %v675_v10 = vadd.f32 %v1691_v3, %v674_v7  ;;  %v676_v11 = vpop.f32.mrb[15].mxu0  ;;  %v878_v12 = vmax.f32 %v776_v5, 0.0  ;;  %v779_v13 = vadd.f32 %v1691_v3, %v778_v8  ;;  %v780_v14 = vpop.f32.mrb[15].mxu1 }
 0x136   : > { %v1337_v15 = vpack.c.bf16 %v852_v9, %v852_v9  ;;  %v853_v16 = vmax.f32 %v675_v10, 0.0  ;;  %v1363_v17 = vpack.c.bf16 %v878_v12, %v878_v12  ;;  %v879_v18 = vmax.f32 %v779_v13, 0.0 }
 0x138   : > { %1103 = vst.msk [vmem:[%s1701_s16 + $0x18] sm:$0xf] %vm1096_vm0, %v1337_v15  ;;  %v1338_v19 = vpack.c.bf16 %v853_v16, %v853_v16  ;;  %1129 = vst.msk [vmem:[%s1701_s16 + $0x80] sm:$0xf] %vm1096_vm0, %v1363_v17  ;;  %v1364_v20 = vpack.c.bf16 %v879_v18, %v879_v18 }
 0x139   : > { %v679_v21 = vpop.f32.mrb[16].mxu0  ;;  %v783_v22 = vpop.f32.mrb[16].mxu1 }
 0x13a   : > { %1104 = vst.msk [vmem:[%s1701_s16 + $0x1c] sm:$0xf] %vm1096_vm0, %v1338_v19  ;;  %1130 = vst.msk [vmem:[%s1701_s16 + $0x84] sm:$0xf] %vm1096_vm0, %v1364_v20  ;;  %v680_v23 = vadd.f32 %v1691_v3, %v679_v21  ;;  %v681_v24 = vpop.f32.mrb[17].mxu0  ;;  %v784_v25 = vadd.f32 %v1691_v3, %v783_v22  ;;  %v785_v26 = vpop.f32.mrb[17].mxu1 }
 0x13b   : > { %v682_v27 = vpop.f32.mrb[18].mxu0  ;;  %v786_v28 = vpop.f32.mrb[18].mxu1 }
 0x13c   : > { %v854_v29 = vmax.f32 %v680_v23, 0.0  ;;  %v683_v30 = vadd.f32 %v1691_v3, %v682_v27  ;;  %v684_v31 = vpop.f32.mrb[19].mxu0  ;;  %v880_v32 = vmax.f32 %v784_v25, 0.0  ;;  %v787_v33 = vadd.f32 %v1691_v3, %v786_v28  ;;  %v788_v34 = vpop.f32.mrb[19].mxu1 }
 0x13e   : > { %v1339_v35 = vpack.c.bf16 %v854_v29, %v854_v29  ;;  %v855_v36 = vmax.f32 %v683_v30, 0.0  ;;  %v1365_v37 = vpack.c.bf16 %v880_v32, %v880_v32  ;;  %v881_v38 = vmax.f32 %v787_v33, 0.0 }
 0x140   : > { %1105 = vst.msk [vmem:[%s1701_s16 + $0x20] sm:$0xf] %vm1096_vm0, %v1339_v35  ;;  %v1340_v39 = vpack.c.bf16 %v855_v36, %v855_v36  ;;  %1131 = vst.msk [vmem:[%s1701_s16 + $0x88] sm:$0xf] %vm1096_vm0, %v1365_v37  ;;  %v1366_v40 = vpack.c.bf16 %v881_v38, %v881_v38 }
 0x141   : > { %v687_v41 = vpop.f32.mrb[20].mxu0  ;;  %v791_v42 = vpop.f32.mrb[20].mxu1 }
 0x142   : > { %1106 = vst.msk [vmem:[%s1701_s16 + $0x24] sm:$0xf] %vm1096_vm0, %v1340_v39  ;;  %1132 = vst.msk [vmem:[%s1701_s16 + $0x8c] sm:$0xf] %vm1096_vm0, %v1366_v40  ;;  %v688_v43 = vadd.f32 %v1691_v3, %v687_v41  ;;  %v689_v44 = vpop.f32.mrb[21].mxu0  ;;  %v792_v45 = vadd.f32 %v1691_v3, %v791_v42  ;;  %v793_v46 = vpop.f32.mrb[21].mxu1 }
 0x143   : > { %v690_v47 = vpop.f32.mrb[22].mxu0  ;;  %v794_v48 = vpop.f32.mrb[22].mxu1 }
 0x144   : > { %v856_v49 = vmax.f32 %v688_v43, 0.0  ;;  %v691_v50 = vadd.f32 %v1691_v3, %v690_v47  ;;  %v692_v51 = vpop.f32.mrb[23].mxu0  ;;  %v882_v52 = vmax.f32 %v792_v45, 0.0  ;;  %v795_v53 = vadd.f32 %v1691_v3, %v794_v48  ;;  %v796_v54 = vpop.f32.mrb[23].mxu1 }
 0x146   : > { %v1341_v55 = vpack.c.bf16 %v856_v49, %v856_v49  ;;  %v857_v56 = vmax.f32 %v691_v50, 0.0  ;;  %v1367_v57 = vpack.c.bf16 %v882_v52, %v882_v52  ;;  %v883_v58 = vmax.f32 %v795_v53, 0.0 }
 0x148   : > { %1107 = vst.msk [vmem:[%s1701_s16 + $0x28] sm:$0xf] %vm1096_vm0, %v1341_v55  ;;  %v1342_v59 = vpack.c.bf16 %v857_v56, %v857_v56  ;;  %1133 = vst.msk [vmem:[%s1701_s16 + $0x90] sm:$0xf] %vm1096_vm0, %v1367_v57  ;;  %v1368_v60 = vpack.c.bf16 %v883_v58, %v883_v58 }
 0x149   : > { %v695_v61 = vpop.f32.mrb[24].mxu0  ;;  %v799_v62 = vpop.f32.mrb[24].mxu1 }
 0x14a   : > { %1108 = vst.msk [vmem:[%s1701_s16 + $0x2c] sm:$0xf] %vm1096_vm0, %v1342_v59  ;;  %1134 = vst.msk [vmem:[%s1701_s16 + $0x94] sm:$0xf] %vm1096_vm0, %v1368_v60  ;;  %v696_v63 = vadd.f32 %v1691_v3, %v695_v61  ;;  %v697_v0 = vpop.f32.mrb[25].mxu0  ;;  %v800_v1 = vadd.f32 %v1691_v3, %v799_v62  ;;  %v801_v2 = vpop.f32.mrb[25].mxu1 }
 0x14b   : > { %v698_v4 = vpop.f32.mrb[26].mxu0  ;;  %v802_v5 = vpop.f32.mrb[26].mxu1 }
 0x14c   : > { %v858_v6 = vmax.f32 %v696_v63, 0.0  ;;  %v699_v7 = vadd.f32 %v1691_v3, %v698_v4  ;;  %v700_v8 = vpop.f32.mrb[27].mxu0  ;;  %v884_v9 = vmax.f32 %v800_v1, 0.0  ;;  %v803_v10 = vadd.f32 %v1691_v3, %v802_v5  ;;  %v804_v11 = vpop.f32.mrb[27].mxu1 }
 0x14e   : > { %v1343_v12 = vpack.c.bf16 %v858_v6, %v858_v6  ;;  %v859_v13 = vmax.f32 %v699_v7, 0.0  ;;  %v1369_v14 = vpack.c.bf16 %v884_v9, %v884_v9  ;;  %v885_v15 = vmax.f32 %v803_v10, 0.0 }
 0x150   : > { %1109 = vst.msk [vmem:[%s1701_s16 + $0x30] sm:$0xf] %vm1096_vm0, %v1343_v12  ;;  %v1344_v16 = vpack.c.bf16 %v859_v13, %v859_v13  ;;  %1135 = vst.msk [vmem:[%s1701_s16 + $0x98] sm:$0xf] %vm1096_vm0, %v1369_v14  ;;  %v1370_v17 = vpack.c.bf16 %v885_v15, %v885_v15 }
 0x151   : > { %v703_v18 = vpop.f32.mrb[28].mxu0  ;;  %v807_v19 = vpop.f32.mrb[28].mxu1 }
 0x152   : > { %1110 = vst.msk [vmem:[%s1701_s16 + $0x34] sm:$0xf] %vm1096_vm0, %v1344_v16  ;;  %1136 = vst.msk [vmem:[%s1701_s16 + $0x9c] sm:$0xf] %vm1096_vm0, %v1370_v17  ;;  %v704_v20 = vadd.f32 %v1691_v3, %v703_v18  ;;  %v705_v21 = vpop.f32.mrb[29].mxu0  ;;  %v808_v22 = vadd.f32 %v1691_v3, %v807_v19  ;;  %v809_v23 = vpop.f32.mrb[29].mxu1 }
 0x153   : > { %v706_v24 = vpop.f32.mrb[30].mxu0  ;;  %v810_v25 = vpop.f32.mrb[30].mxu1 }
 0x154   : > { %v860_v26 = vmax.f32 %v704_v20, 0.0  ;;  %v707_v27 = vadd.f32 %v1691_v3, %v706_v24  ;;  %v708_v28 = vpop.f32.mrb[31].mxu0  ;;  %v886_v29 = vmax.f32 %v808_v22, 0.0  ;;  %v811_v30 = vadd.f32 %v1691_v3, %v810_v25  ;;  %v812_v31 = vpop.f32.mrb[31].mxu1 }
 0x156   : > { %v1345_v32 = vpack.c.bf16 %v860_v26, %v860_v26  ;;  %v861_v33 = vmax.f32 %v707_v27, 0.0  ;;  %v1371_v34 = vpack.c.bf16 %v886_v29, %v886_v29  ;;  %v887_v35 = vmax.f32 %v811_v30, 0.0 }
 0x158   : > { %1111 = vst.msk [vmem:[%s1701_s16 + $0x38] sm:$0xf] %vm1096_vm0, %v1345_v32  ;;  %v1346_v36 = vpack.c.bf16 %v861_v33, %v861_v33  ;;  %1137 = vst.msk [vmem:[%s1701_s16 + $0xa0] sm:$0xf] %vm1096_vm0, %v1371_v34  ;;  %v1372_v37 = vpack.c.bf16 %v887_v35, %v887_v35 }
 0x159   : > { %v711_v38 = vpop.f32.mrb[32].mxu0  ;;  %v815_v39 = vpop.f32.mrb[32].mxu1 }
 0x15a   : > { %1112 = vst.msk [vmem:[%s1701_s16 + $0x3c] sm:$0xf] %vm1096_vm0, %v1346_v36  ;;  %1138 = vst.msk [vmem:[%s1701_s16 + $0xa4] sm:$0xf] %vm1096_vm0, %v1372_v37  ;;  %v712_v40 = vadd.f32 %v1691_v3, %v711_v38  ;;  %v713_v41 = vpop.f32.mrb[33].mxu0  ;;  %v816_v42 = vadd.f32 %v1691_v3, %v815_v39  ;;  %v817_v43 = vpop.f32.mrb[33].mxu1 }
 0x15b   : > { %v714_v44 = vpop.f32.mrb[34].mxu0  ;;  %v818_v45 = vpop.f32.mrb[34].mxu1 }
 0x15c   : > { %v862_v46 = vmax.f32 %v712_v40, 0.0  ;;  %v715_v47 = vadd.f32 %v1691_v3, %v714_v44  ;;  %v716_v48 = vpop.f32.mrb[35].mxu0  ;;  %v888_v49 = vmax.f32 %v816_v42, 0.0  ;;  %v819_v50 = vadd.f32 %v1691_v3, %v818_v45  ;;  %v820_v51 = vpop.f32.mrb[35].mxu1 }
 0x15e   : > { %v1347_v52 = vpack.c.bf16 %v862_v46, %v862_v46  ;;  %v863_v53 = vmax.f32 %v715_v47, 0.0  ;;  %v1373_v54 = vpack.c.bf16 %v888_v49, %v888_v49  ;;  %v889_v55 = vmax.f32 %v819_v50, 0.0 }
 0x160   : > { %1113 = vst.msk [vmem:[%s1701_s16 + $0x40] sm:$0xf] %vm1096_vm0, %v1347_v52  ;;  %v1348_v56 = vpack.c.bf16 %v863_v53, %v863_v53  ;;  %1139 = vst.msk [vmem:[%s1701_s16 + $0xa8] sm:$0xf] %vm1096_vm0, %v1373_v54  ;;  %v1374_v57 = vpack.c.bf16 %v889_v55, %v889_v55 }
 0x161   : > { %v719_v58 = vpop.f32.mrb[36].mxu0  ;;  %v823_v59 = vpop.f32.mrb[36].mxu1 }
 0x162   : > { %1114 = vst.msk [vmem:[%s1701_s16 + $0x44] sm:$0xf] %vm1096_vm0, %v1348_v56  ;;  %1140 = vst.msk [vmem:[%s1701_s16 + $0xac] sm:$0xf] %vm1096_vm0, %v1374_v57  ;;  %v720_v60 = vadd.f32 %v1691_v3, %v719_v58  ;;  %v721_v61 = vpop.f32.mrb[37].mxu0  ;;  %v824_v62 = vadd.f32 %v1691_v3, %v823_v59  ;;  %v825_v63 = vpop.f32.mrb[37].mxu1 }
 0x163   : > { %v722_v0 = vpop.f32.mrb[38].mxu0  ;;  %v826_v1 = vpop.f32.mrb[38].mxu1 }
 0x164   : > { %v864_v2 = vmax.f32 %v720_v60, 0.0  ;;  %v723_v4 = vadd.f32 %v1691_v3, %v722_v0  ;;  %v724_v5 = vpop.f32.mrb[39].mxu0  ;;  %v890_v6 = vmax.f32 %v824_v62, 0.0  ;;  %v827_v7 = vadd.f32 %v1691_v3, %v826_v1  ;;  %v828_v8 = vpop.f32.mrb[39].mxu1 }
 0x166   : > { %v1349_v9 = vpack.c.bf16 %v864_v2, %v864_v2  ;;  %v865_v10 = vmax.f32 %v723_v4, 0.0  ;;  %v1375_v11 = vpack.c.bf16 %v890_v6, %v890_v6  ;;  %v891_v12 = vmax.f32 %v827_v7, 0.0 }
 0x168   : > { %1115 = vst.msk [vmem:[%s1701_s16 + $0x48] sm:$0xf] %vm1096_vm0, %v1349_v9  ;;  %v1350_v13 = vpack.c.bf16 %v865_v10, %v865_v10  ;;  %1141 = vst.msk [vmem:[%s1701_s16 + $0xb0] sm:$0xf] %vm1096_vm0, %v1375_v11  ;;  %v1376_v14 = vpack.c.bf16 %v891_v12, %v891_v12 }
 0x169   : > { %v727_v15 = vpop.f32.mrb[40].mxu0  ;;  %v831_v16 = vpop.f32.mrb[40].mxu1 }
 0x16a   : > { %1116 = vst.msk [vmem:[%s1701_s16 + $0x4c] sm:$0xf] %vm1096_vm0, %v1350_v13  ;;  %1142 = vst.msk [vmem:[%s1701_s16 + $0xb4] sm:$0xf] %vm1096_vm0, %v1376_v14  ;;  %v728_v17 = vadd.f32 %v1691_v3, %v727_v15  ;;  %v729_v18 = vpop.f32.mrb[41].mxu0  ;;  %v832_v19 = vadd.f32 %v1691_v3, %v831_v16  ;;  %v833_v20 = vpop.f32.mrb[41].mxu1 }
 0x16b   : > { %v730_v21 = vpop.f32.mrb[42].mxu0  ;;  %v834_v22 = vpop.f32.mrb[42].mxu1 }
 0x16c   : > { %v866_v23 = vmax.f32 %v728_v17, 0.0  ;;  %v731_v24 = vadd.f32 %v1691_v3, %v730_v21  ;;  %v732_v25 = vpop.f32.mrb[43].mxu0  ;;  %v892_v26 = vmax.f32 %v832_v19, 0.0  ;;  %v835_v27 = vadd.f32 %v1691_v3, %v834_v22  ;;  %v836_v28 = vpop.f32.mrb[43].mxu1 }
 0x16e   : > { %v1351_v29 = vpack.c.bf16 %v866_v23, %v866_v23  ;;  %v867_v30 = vmax.f32 %v731_v24, 0.0  ;;  %v1377_v31 = vpack.c.bf16 %v892_v26, %v892_v26  ;;  %v893_v32 = vmax.f32 %v835_v27, 0.0 }
 0x170   : > { %1117 = vst.msk [vmem:[%s1701_s16 + $0x50] sm:$0xf] %vm1096_vm0, %v1351_v29  ;;  %v1352_v33 = vpack.c.bf16 %v867_v30, %v867_v30  ;;  %1143 = vst.msk [vmem:[%s1701_s16 + $0xb8] sm:$0xf] %vm1096_vm0, %v1377_v31  ;;  %v1378_v34 = vpack.c.bf16 %v893_v32, %v893_v32 }
 0x171   : > { %v735_v35 = vpop.f32.mrb[44].mxu0  ;;  %v839_v36 = vpop.f32.mrb[44].mxu1 }
 0x172   : > { %1118 = vst.msk [vmem:[%s1701_s16 + $0x54] sm:$0xf] %vm1096_vm0, %v1352_v33  ;;  %1144 = vst.msk [vmem:[%s1701_s16 + $0xbc] sm:$0xf] %vm1096_vm0, %v1378_v34  ;;  %v736_v37 = vadd.f32 %v1691_v3, %v735_v35  ;;  %v737_v38 = vpop.f32.mrb[45].mxu0  ;;  %v840_v39 = vadd.f32 %v1691_v3, %v839_v36  ;;  %v841_v40 = vpop.f32.mrb[45].mxu1 }
 0x173   : > { %v738_v41 = vpop.f32.mrb[46].mxu0  ;;  %v842_v42 = vpop.f32.mrb[46].mxu1 }
 0x174   : > { %v868_v43 = vmax.f32 %v736_v37, 0.0  ;;  %v739_v44 = vadd.f32 %v1691_v3, %v738_v41  ;;  %v740_v45 = vpop.f32.mrb[47].mxu0  ;;  %v894_v46 = vmax.f32 %v840_v39, 0.0  ;;  %v843_v47 = vadd.f32 %v1691_v3, %v842_v42  ;;  %v844_v48 = vpop.f32.mrb[47].mxu1 }
 0x176   : > { %v1353_v49 = vpack.c.bf16 %v868_v43, %v868_v43  ;;  %v869_v50 = vmax.f32 %v739_v44, 0.0  ;;  %v1379_v51 = vpack.c.bf16 %v894_v46, %v894_v46  ;;  %v895_v52 = vmax.f32 %v843_v47, 0.0 }
 0x178   : > { %1119 = vst.msk [vmem:[%s1701_s16 + $0x58] sm:$0xf] %vm1096_vm0, %v1353_v49  ;;  %v1354_v53 = vpack.c.bf16 %v869_v50, %v869_v50  ;;  %1145 = vst.msk [vmem:[%s1701_s16 + $0xc0] sm:$0xf] %vm1096_vm0, %v1379_v51  ;;  %v1380_v54 = vpack.c.bf16 %v895_v52, %v895_v52 }
 0x179   : > { %v743_v55 = vpop.f32.mrb[48].mxu0 }
 0x17a   : > { %1120 = vst.msk [vmem:[%s1701_s16 + $0x5c] sm:$0xf] %vm1096_vm0, %v1354_v53  ;;  %1146 = vst.msk [vmem:[%s1701_s16 + $0xc4] sm:$0xf] %vm1096_vm0, %v1380_v54  ;;  %v744_v56 = vadd.f32 %v1691_v3, %v743_v55  ;;  %v745_v57 = vpop.f32.mrb[49].mxu0 }
 0x17b   : > { %v746_v58 = vpop.f32.mrb[50].mxu0 }
 0x17c   : > { %v870_v59 = vmax.f32 %v744_v56, 0.0  ;;  %v747_v60 = vadd.f32 %v1691_v3, %v746_v58  ;;  %v748_v61 = vpop.f32.mrb[51].mxu0 }
 0x17e   : > { %v1355_v62 = vpack.c.bf16 %v870_v59, %v870_v59  ;;  %v871_v63 = vmax.f32 %v747_v60, 0.0 }
 0x180   : > { %1121 = vst.msk [vmem:[%s1701_s16 + $0x60] sm:$0xf] %vm1096_vm0, %v1355_v62  ;;  %v1356_v0 = vpack.c.bf16 %v871_v63, %v871_v63 }
 0x182   : > { %1122 = vst.msk [vmem:[%s1701_s16 + $0x64] sm:$0xf] %vm1096_vm0, %v1356_v0 }
 0x183 PF: > { %s13_s12 = sadd.s32 1, %s1519_s12  }
 0x184   : > { %p10_p4 = scmp.ge.s32.totalorder %s13_s12, 4  }
 0x186   :  { %12 = sbr.rel (!%p10_p4) target bundleno = 1 (0x1), region = 62 }

// kernel: dqn_forward.5
= control target key start
LH: loop header
LB: loop body
LE: loop exit
PB: predicated region body
PF: predicated region fallthrough
CT: control target
= control target key end

     0   :  { %s1578_s12 = smov 0   ;;  %s1580_s13 = smov 0   ;;  %s1840_s0 = inlined_call_operand.vmem [shape: bf16[162,512], index: 0, kind: input, shape index: {}]   ;;  %s1841_s1 = inlined_call_operand.vmem [shape: bf16[512,64], index: 1, kind: input, shape index: {}]   ;;  %s1842_s2 = inlined_call_operand.vmem [shape: f32[1,64], index: 2, kind: input, shape index: {}]   ;;  %s1843_s3 = inlined_call_operand.vmem [shape: bf16[162,64], index: 3, kind: output, shape index: {}]  }
   0x1   :  { %s1582_s14 = smov 0  }
   0x2 LB: > { %s1591_s15 = sadd.s32 4294967295, %s1524_s14   ;;  %s1593_s16 = sadd.s32 1, %s1524_s14   ;;  %s1524_s14 = sphi %s1582_s14, %s1850_s14   ;;  %s1520_s13 = sphi %s1580_s13, %s1849_s13   ;;  %s1516_s12 = sphi %s1578_s12, %s1848_s12  }
   0x3   : > { %s85_s17 = ssub.s32 %s1524_s14, %s1593_s16  ;;  %s88_s18 = sadd.s32 1, %s1520_s13 }
   0x4   : > { %p86_p0 = scmp.eq.s32.totalorder %s85_s17, 0  ;;  %p98_p1 = scmp.ne.s32.totalorder %s1520_s13, %s1516_s12 }
   0x5   : > { %p99_p2 = scmp.eq.s32.totalorder %s1591_s15, 1  ;;  %p1106_p3 = scmp.ge.s32.totalorder %s1524_s14, 1 }
   0x6   : > { %s1601_s19 = scalar_select %p86_p0, %s1520_s13, %s88_s18  }
   0x7   : > { %p1603_p4 = por %p99_p2, %p98_p1  ;;  %p149_p5 = scmp.lt.s32.totalorder %s1524_s14, 3 }
   0x9   : > { %p150_p6 = pnand %p1106_p3, %p149_p5 }
   0xa   : > { %v1398_v0 = vld [vmem:[%s1841_s1 + $0x40] sm:$0xff] (!%p150_p6)   ;;  %v1402_v4 = vld [vmem:[%s1841_s1 + $0x48] sm:$0xff] (!%p150_p6)   ;;  %v1406_v8 = vld [vmem:[%s1841_s1 + $0x50] sm:$0xff] (!%p150_p6)   ;;  %s1653_s30 = smul.u32 (!%p150_p6), 12, %s1591_s15  ;;  %s175_s5 = sand.u32 (!%p150_p6), 1, %s1516_s12   ;;  %vm830_vm0 = vcmask (!%p150_p6), 519168  }
   0xb   : > { %153 = sbr.rel (%p150_p6) target bundleno = 379 (0x17b), region = 32  ;;  %v1399_v1 = vld [vmem:[%s1841_s1 + $0xc0] sm:$0xff] (!%p150_p6)   ;;  %1204 = vmatprep.subr.bf16.mxu0 (!%p150_p6), %v1398_v0  ;;  %v1403_v5 = vld [vmem:[%s1841_s1 + $0xc8] sm:$0xff] (!%p150_p6)   ;;  %v1407_v9 = vld [vmem:[%s1841_s1 + $0xd0] sm:$0xff] (!%p150_p6)  }
   0xc   : > { %v1400_v2 = vld [vmem:[%s1841_s1] sm:$0xff] (!%p150_p6)   ;;  %1256 = vmatprep.subr.bf16.mxu1 (!%p150_p6), %v1399_v1  ;;  %v1404_v6 = vld [vmem:[%s1841_s1 + $0x8] sm:$0xff] (!%p150_p6)   ;;  %v1408_v10 = vld [vmem:[%s1841_s1 + $0x10] sm:$0xff] (!%p150_p6)   ;;  %p184_p7 = scmp.lt.s32.totalorder (!%p150_p6), %s1653_s30, 20  ;;  %s1308_s6 = smul.u32 (!%p150_p6), 48, %s175_s5 }
   0xd   : > { %v1401_v3 = vld [vmem:[%s1841_s1 + $0x80] sm:$0xff] (!%p150_p6)   ;;  %1205 = vmatpush3.bf16.msra.mxu0 (!%p150_p6), %v1400_v2  ;;  %v1405_v7 = vld [vmem:[%s1841_s1 + $0x88] sm:$0xff] (!%p150_p6)   ;;  %v1409_v11 = vld [vmem:[%s1841_s1 + $0x90] sm:$0xff] (!%p150_p6)  }
   0xe   : > { %1257 = vmatpush3.bf16.msra.mxu1 (!%p150_p6), %v1401_v3  ;;  %1206 = vmatprep.subr.bf16.mxu0 (!%p150_p6), %v1402_v4  ;;  %v1410_v12 = vld [vmem:[%s1841_s1 + $0x58] sm:$0xff] (!%p150_p6)   ;;  %v1414_v16 = vld [vmem:[%s1841_s1 + $0x60] sm:$0xff] (!%p150_p6)   ;;  %v1418_v20 = vld [vmem:[%s1841_s1 + $0x68] sm:$0xff] (!%p150_p6)   ;;  %s1745_s12 = scalar_lea.vmem (!%p150_p6), [#allocation2], %s1308_s6  }
   0xf   : > { %1258 = vmatprep.subr.bf16.mxu1 (!%p150_p6), %v1403_v5  ;;  %v1411_v13 = vld [vmem:[%s1841_s1 + $0xd8] sm:$0xff] (!%p150_p6)   ;;  %v1415_v17 = vld [vmem:[%s1841_s1 + $0xe0] sm:$0xff] (!%p150_p6)   ;;  %v1419_v21 = vld [vmem:[%s1841_s1 + $0xe8] sm:$0xff] (!%p150_p6)  }
  0x10   : > { %v1412_v14 = vld [vmem:[%s1841_s1 + $0x18] sm:$0xff] (!%p150_p6)   ;;  %v1416_v18 = vld [vmem:[%s1841_s1 + $0x20] sm:$0xff] (!%p150_p6)   ;;  %v1420_v22 = vld [vmem:[%s1841_s1 + $0x28] sm:$0xff] (!%p150_p6)  }
  0x11   : > { %1207 = vmatpush3.bf16.msra.mxu0 (!%p150_p6), %v1404_v6  ;;  %v1413_v15 = vld [vmem:[%s1841_s1 + $0x98] sm:$0xff] (!%p150_p6)   ;;  %v1417_v19 = vld [vmem:[%s1841_s1 + $0xa0] sm:$0xff] (!%p150_p6)   ;;  %v1421_v23 = vld [vmem:[%s1841_s1 + $0xa8] sm:$0xff] (!%p150_p6)  }
  0x12   : > { %1259 = vmatpush3.bf16.msra.mxu1 %v1405_v7  ;;  %1208 = vmatprep.subr.bf16.mxu0 %v1406_v8  ;;  %s185_s26 = scalar_select %p184_p7, %s1653_s30, 20  ;;  %v1422_v24 = vld [vmem:[%s1841_s1 + $0x70] sm:$0xff]   ;;  %v1426_v28 = vld [vmem:[%s1841_s1 + $0x78] sm:$0xff]   ;;  %v1740_v58 = vld [vmem:[%s1842_s2] ss:$0 sm:$0xff] }
  0x13   : > { %1260 = vmatprep.subr.bf16.mxu1 %v1407_v9  ;;  %v1423_v25 = vld [vmem:[%s1841_s1 + $0xf0] sm:$0xff]   ;;  %v1427_v29 = vld [vmem:[%s1841_s1 + $0xf8] sm:$0xff]   ;;  %s851_s7 = ssub.s32 (%p1603_p4), 21, %s1653_s30  ;;  %s1203_s8 = smul.u32 (%p1603_p4), 48, %s1591_s15 }
  0x14   : > { %v1424_v26 = vld [vmem:[%s1841_s1 + $0x30] sm:$0xff]   ;;  %s1190_s9 = sshll.u32 %s185_s26, 4  ;;  %v1428_v30 = vld [vmem:[%s1841_s1 + $0x38] sm:$0xff]   ;;  %p852_p8 = scmp.lt.s32.totalorder (%p1603_p4), %s851_s7, 12 }
  0x15   : > { %1209 = vmatpush3.bf16.msra.mxu0 %v1408_v10  ;;  %v1425_v27 = vld [vmem:[%s1841_s1 + $0xb0] sm:$0xff]   ;;  %s1705_s24 = scalar_lea.vmem %s1840_s0, %s1190_s9  ;;  %v1429_v31 = vld [vmem:[%s1841_s1 + $0xb8] sm:$0xff]   ;;  %s1788_s11 = scalar_lea.vmem (%p1603_p4), %s1843_s3, %s1203_s8  }
  0x16   : > { %1261 = vmatpush3.bf16.msra.mxu1 %v1409_v11  ;;  %1210 = vmatprep.subr.bf16.mxu0 %v1410_v12  ;;  %v1430_v32 = vld [vmem:[%s1705_s24] ss:$16 sps:$4 sm:$0xff]   ;;  %v1432_v33 = vld [vmem:[%s1705_s24 + $0x4] ss:$16 sps:$4 sm:$0xff]   ;;  %v1433_v34 = vld [vmem:[%s1705_s24 + $0x8] ss:$16 sps:$4 sm:$0xff]  }
  0x17   : > { %1262 = vmatprep.subr.bf16.mxu1 %v1411_v13  ;;  %v1435_v35 = vld [vmem:[%s1705_s24 + $0xc] ss:$16 sps:$4 sm:$0xff]   ;;  %640 = vmatprep.mubr.bf16.mxu0 %v1432_v33  ;;  %v1436_v36 = vld [vmem:[%s1705_s24 + $0x24] ss:$16 sps:$4 sm:$0xff]   ;;  %v1440_v38 = vld [vmem:[%s1705_s24 + $0x20] ss:$16 sps:$4 sm:$0xff]  }
  0x18   : > { %721 = vmatprep.mubr.bf16.mxu1 %v1435_v35  ;;  %v1438_v37 = vld [vmem:[%s1705_s24 + $0x2c] ss:$16 sps:$4 sm:$0xff]   ;;  %v1441_v39 = vld [vmem:[%s1705_s24 + $0x28] ss:$16 sps:$4 sm:$0xff]   ;;  %v1442_v40 = vld [vmem:[%s1705_s24 + $0x44] ss:$16 sps:$4 sm:$0xff]  }
  0x19   : > { %1211 = vmatpush3.bf16.msra.mxu0 %v1412_v14  ;;  %v1444_v41 = vld [vmem:[%s1705_s24 + $0x4c] ss:$16 sps:$4 sm:$0xff]   ;;  %v1446_v42 = vld [vmem:[%s1705_s24 + $0x40] ss:$16 sps:$4 sm:$0xff]   ;;  %v1447_v43 = vld [vmem:[%s1705_s24 + $0x48] ss:$16 sps:$4 sm:$0xff]  }
  0x1a   : > { %1263 = vmatpush3.bf16.msra.mxu1 %v1413_v15  ;;  %1212 = vmatprep.subr.bf16.mxu0 %v1414_v16  ;;  %v1448_v44 = vld [vmem:[%s1705_s24 + $0x64] ss:$16 sps:$4 sm:$0xff]   ;;  %v1450_v45 = vld [vmem:[%s1705_s24 + $0x6c] ss:$16 sps:$4 sm:$0xff]   ;;  %v1452_v46 = vld [vmem:[%s1705_s24 + $0x60] ss:$16 sps:$4 sm:$0xff]  }
  0x1b   : > { %1264 = vmatprep.subr.bf16.mxu1 %v1415_v17  ;;  %v1453_v47 = vld [vmem:[%s1705_s24 + $0x68] ss:$16 sps:$4 sm:$0xff]   ;;  %v1454_v48 = vld [vmem:[%s1705_s24 + $0x84] ss:$16 sps:$4 sm:$0xff]   ;;  %v1456_v49 = vld [vmem:[%s1705_s24 + $0x8c] ss:$16 sps:$4 sm:$0xff]  }
  0x1c   : > { %v1458_v50 = vld [vmem:[%s1705_s24 + $0x80] ss:$16 sps:$4 sm:$0xff]   ;;  %v1459_v51 = vld [vmem:[%s1705_s24 + $0x88] ss:$16 sps:$4 sm:$0xff]   ;;  %v1460_v52 = vld [vmem:[%s1705_s24 + $0xa4] ss:$16 sps:$4 sm:$0xff]  }
  0x1d   : > { %1213 = vmatpush3.bf16.msra.mxu0 %v1416_v18  ;;  %v1462_v53 = vld [vmem:[%s1705_s24 + $0xac] ss:$16 sps:$4 sm:$0xff]   ;;  %v1464_v54 = vld [vmem:[%s1705_s24 + $0xa0] ss:$16 sps:$4 sm:$0xff]   ;;  %v1465_v55 = vld [vmem:[%s1705_s24 + $0xa8] ss:$16 sps:$4 sm:$0xff]  }
  0x1e   : > { %1265 = vmatpush3.bf16.msra.mxu1 %v1417_v19  ;;  %1214 = vmatprep.subr.bf16.mxu0 %v1418_v20 }
  0x1f   : > { %1266 = vmatprep.subr.bf16.mxu1 %v1419_v21 }
  0x21   : > { %1215 = vmatpush3.bf16.msra.mxu0 %v1420_v22 }
  0x22   : > { %1267 = vmatpush3.bf16.msra.mxu1 %v1421_v23  ;;  %1216 = vmatprep.subr.bf16.mxu0 %v1422_v24 }
  0x23   : > { %1268 = vmatprep.subr.bf16.mxu1 %v1423_v25 }
  0x25   : > { %1217 = vmatpush3.bf16.msra.mxu0 %v1424_v26 }
  0x26   : > { %1269 = vmatpush3.bf16.msra.mxu1 %v1425_v27  ;;  %1218 = vmatprep.subr.bf16.mxu0 %v1426_v28 }
  0x27   : > { %1270 = vmatprep.subr.bf16.mxu1 %v1427_v29 }
  0x29   : > { %1219 = vmatpush3.bf16.msra.mxu0 %v1428_v30 }
  0x2a   : > { %1271 = vmatpush3.bf16.msra.mxu1 %v1429_v31 }
  0x2c   : > { %641 = vmatmul.mubr.bf16.vlgmr.msra.gmra.mrb[0].mxu0 %v1430_v32 }
  0x2d   : > { %722 = vmatmul.mubr.bf16.vlgmr.msra.gmra.mrb[0].mxu1 %v1433_v34  ;;  %648 = vmatprep.mubr.bf16.mxu0 %v1436_v36 }
  0x2e   : > { %729 = vmatprep.mubr.bf16.mxu1 %v1438_v37 }
  0x34   : > { %649 = vmatmul.mubr.bf16.gmra.mrb[4].mxu0 %v1440_v38 }
  0x35   : > { %730 = vmatmul.mubr.bf16.gmra.mrb[4].mxu1 %v1441_v39  ;;  %656 = vmatprep.mubr.bf16.mxu0 %v1442_v40 }
  0x36   : > { %737 = vmatprep.mubr.bf16.mxu1 %v1444_v41 }
  0x3c   : > { %657 = vmatmul.mubr.bf16.gmra.mrb[8].mxu0 %v1446_v42 }
  0x3d   : > { %738 = vmatmul.mubr.bf16.gmra.mrb[8].mxu1 %v1447_v43  ;;  %664 = vmatprep.mubr.bf16.mxu0 %v1448_v44 }
  0x3e   : > { %745 = vmatprep.mubr.bf16.mxu1 %v1450_v45 }
  0x44   : > { %665 = vmatmul.mubr.bf16.gmra.mrb[12].mxu0 %v1452_v46 }
  0x45   : > { %746 = vmatmul.mubr.bf16.gmra.mrb[12].mxu1 %v1453_v47  ;;  %672 = vmatprep.mubr.bf16.mxu0 %v1454_v48 }
  0x46   : > { %753 = vmatprep.mubr.bf16.mxu1 %v1456_v49 }
  0x4c   : > { %673 = vmatmul.mubr.bf16.gmra.mrb[16].mxu0 %v1458_v50 }
  0x4d   : > { %754 = vmatmul.mubr.bf16.gmra.mrb[16].mxu1 %v1459_v51  ;;  %680 = vmatprep.mubr.bf16.mxu0 %v1460_v52 }
  0x4e   : > { %761 = vmatprep.mubr.bf16.mxu1 %v1462_v53 }
  0x54   : > { %681 = vmatmul.mubr.bf16.gmra.mrb[20].mxu0 %v1464_v54 }
  0x55   : > { %762 = vmatmul.mubr.bf16.gmra.mrb[20].mxu1 %v1465_v55 }
  0xff   : > { %v1220_v56 = vpop.f32.mrb[0].mxu0 }
 0x100   : > { %v1272_v57 = vpop.f32.mrb[0].mxu1  ;;  %v1221_v59 = vpop.f32.mrb[1].mxu0 }
 0x101   : > { %v1222_v60 = vadd.f32 %v1221_v59, %v1220_v56  ;;  %v1273_v61 = vpop.f32.mrb[1].mxu1  ;;  %v1223_v62 = vpop.f32.mrb[2].mxu0 }
 0x102   : > { %v1274_v63 = vadd.f32 %v1273_v61, %v1272_v57  ;;  %v1275_v0 = vpop.f32.mrb[2].mxu1  ;;  %v1224_v1 = vpop.f32.mrb[3].mxu0 }
 0x103   : > { %v643_v2 = vadd.f32 %v1222_v60, %v1740_v58  ;;  %v1225_v3 = vadd.f32 %v1224_v1, %v1223_v62  ;;  %v1276_v4 = vpop.f32.mrb[3].mxu1 }
 0x104   : > { %v1277_v5 = vadd.f32 %v1276_v4, %v1275_v0 }
 0x105   : > { %v724_v6 = vadd.f32 %v1274_v63, %v643_v2  ;;  %v646_v7 = vadd.f32 %v1225_v3, %v1740_v58 }
 0x107   : > { %v770_v8 = vmax.f32 %v724_v6, 0.0  ;;  %v727_v9 = vadd.f32 %v1277_v5, %v646_v7  ;;  %v1226_v10 = vpop.f32.mrb[4].mxu0 }
 0x108   : > { %v1278_v11 = vpop.f32.mrb[4].mxu1  ;;  %v1227_v12 = vpop.f32.mrb[5].mxu0 }
 0x109   : > { %v1191_v13 = vpack.c.bf16 %v770_v8, %v770_v8  ;;  %v771_v14 = vmax.f32 %v727_v9, 0.0  ;;  %v1228_v15 = vadd.f32 %v1227_v12, %v1226_v10  ;;  %v1279_v16 = vpop.f32.mrb[5].mxu1  ;;  %v1229_v17 = vpop.f32.mrb[6].mxu0 }
 0x10a   : > { %v1280_v18 = vadd.f32 %v1279_v16, %v1278_v11  ;;  %v1281_v19 = vpop.f32.mrb[6].mxu1  ;;  %v1230_v20 = vpop.f32.mrb[7].mxu0 }
 0x10b   : > { %831 = vst.msk [vmem:[%s1745_s12] sm:$0xf] %vm830_vm0, %v1191_v13  ;;  %v1192_v21 = vpack.c.bf16 %v771_v14, %v771_v14  ;;  %v651_v22 = vadd.f32 %v1228_v15, %v1740_v58  ;;  %v1231_v23 = vadd.f32 %v1230_v20, %v1229_v17  ;;  %v1282_v24 = vpop.f32.mrb[7].mxu1 }
 0x10c   : > { %v1283_v25 = vadd.f32 %v1282_v24, %v1281_v19 }
 0x10d   : > { %832 = vst.msk [vmem:[%s1745_s12 + $0x4] sm:$0xf] %vm830_vm0, %v1192_v21  ;;  %v732_v26 = vadd.f32 %v1280_v18, %v651_v22  ;;  %v654_v27 = vadd.f32 %v1231_v23, %v1740_v58 }
 0x10f   : > { %v772_v28 = vmax.f32 %v732_v26, 0.0  ;;  %v735_v29 = vadd.f32 %v1283_v25, %v654_v27  ;;  %v1232_v30 = vpop.f32.mrb[8].mxu0 }
 0x110   : > { %v1284_v31 = vpop.f32.mrb[8].mxu1  ;;  %v1233_v32 = vpop.f32.mrb[9].mxu0 }
 0x111   : > { %v1193_v33 = vpack.c.bf16 %v772_v28, %v772_v28  ;;  %v773_v34 = vmax.f32 %v735_v29, 0.0  ;;  %v1234_v35 = vadd.f32 %v1233_v32, %v1232_v30  ;;  %v1285_v36 = vpop.f32.mrb[9].mxu1  ;;  %v1235_v37 = vpop.f32.mrb[10].mxu0 }
 0x112   : > { %v1286_v38 = vadd.f32 %v1285_v36, %v1284_v31  ;;  %v1287_v39 = vpop.f32.mrb[10].mxu1  ;;  %v1236_v40 = vpop.f32.mrb[11].mxu0 }
 0x113   : > { %833 = vst.msk [vmem:[%s1745_s12 + $0x8] sm:$0xf] %vm830_vm0, %v1193_v33  ;;  %v1194_v41 = vpack.c.bf16 %v773_v34, %v773_v34  ;;  %v659_v42 = vadd.f32 %v1234_v35, %v1740_v58  ;;  %v1237_v43 = vadd.f32 %v1236_v40, %v1235_v37  ;;  %v1288_v44 = vpop.f32.mrb[11].mxu1 }
 0x114   : > { %v1289_v45 = vadd.f32 %v1288_v44, %v1287_v39 }
 0x115   : > { %834 = vst.msk [vmem:[%s1745_s12 + $0xc] sm:$0xf] %vm830_vm0, %v1194_v41  ;;  %v740_v46 = vadd.f32 %v1286_v38, %v659_v42  ;;  %v662_v47 = vadd.f32 %v1237_v43, %v1740_v58 }
 0x117   : > { %v774_v48 = vmax.f32 %v740_v46, 0.0  ;;  %v743_v49 = vadd.f32 %v1289_v45, %v662_v47  ;;  %v1238_v50 = vpop.f32.mrb[12].mxu0 }
 0x118   : > { %v1290_v51 = vpop.f32.mrb[12].mxu1  ;;  %v1239_v52 = vpop.f32.mrb[13].mxu0 }
 0x119   : > { %v1195_v53 = vpack.c.bf16 %v774_v48, %v774_v48  ;;  %v775_v54 = vmax.f32 %v743_v49, 0.0  ;;  %v1240_v55 = vadd.f32 %v1239_v52, %v1238_v50  ;;  %v1291_v56 = vpop.f32.mrb[13].mxu1  ;;  %v1241_v57 = vpop.f32.mrb[14].mxu0 }
 0x11a   : > { %v1292_v59 = vadd.f32 %v1291_v56, %v1290_v51  ;;  %v1293_v60 = vpop.f32.mrb[14].mxu1  ;;  %v1242_v61 = vpop.f32.mrb[15].mxu0 }
 0x11b   : > { %835 = vst.msk [vmem:[%s1745_s12 + $0x10] sm:$0xf] %vm830_vm0, %v1195_v53  ;;  %v1196_v62 = vpack.c.bf16 %v775_v54, %v775_v54  ;;  %v667_v63 = vadd.f32 %v1240_v55, %v1740_v58  ;;  %v1243_v0 = vadd.f32 %v1242_v61, %v1241_v57  ;;  %v1294_v1 = vpop.f32.mrb[15].mxu1 }
 0x11c   : > { %v1295_v2 = vadd.f32 %v1294_v1, %v1293_v60 }
 0x11d   : > { %836 = vst.msk [vmem:[%s1745_s12 + $0x14] sm:$0xf] %vm830_vm0, %v1196_v62  ;;  %v748_v3 = vadd.f32 %v1292_v59, %v667_v63  ;;  %v670_v4 = vadd.f32 %v1243_v0, %v1740_v58 }
 0x11f   : > { %v776_v5 = vmax.f32 %v748_v3, 0.0  ;;  %v751_v6 = vadd.f32 %v1295_v2, %v670_v4  ;;  %v1244_v7 = vpop.f32.mrb[16].mxu0 }
 0x120   : > { %v1296_v8 = vpop.f32.mrb[16].mxu1  ;;  %v1245_v9 = vpop.f32.mrb[17].mxu0 }
 0x121   : > { %v1197_v10 = vpack.c.bf16 %v776_v5, %v776_v5  ;;  %v777_v11 = vmax.f32 %v751_v6, 0.0  ;;  %v1246_v12 = vadd.f32 %v1245_v9, %v1244_v7  ;;  %v1297_v13 = vpop.f32.mrb[17].mxu1  ;;  %v1247_v14 = vpop.f32.mrb[18].mxu0 }
 0x122   : > { %v1298_v15 = vadd.f32 %v1297_v13, %v1296_v8  ;;  %v1299_v16 = vpop.f32.mrb[18].mxu1  ;;  %v1248_v17 = vpop.f32.mrb[19].mxu0 }
 0x123   : > { %837 = vst.msk [vmem:[%s1745_s12 + $0x18] sm:$0xf] %vm830_vm0, %v1197_v10  ;;  %v1198_v18 = vpack.c.bf16 %v777_v11, %v777_v11  ;;  %v675_v19 = vadd.f32 %v1246_v12, %v1740_v58  ;;  %v1249_v20 = vadd.f32 %v1248_v17, %v1247_v14  ;;  %v1300_v21 = vpop.f32.mrb[19].mxu1 }
 0x124   : > { %v1301_v22 = vadd.f32 %v1300_v21, %v1299_v16 }
 0x125   : > { %838 = vst.msk [vmem:[%s1745_s12 + $0x1c] sm:$0xf] %vm830_vm0, %v1198_v18  ;;  %v756_v23 = vadd.f32 %v1298_v15, %v675_v19  ;;  %v678_v24 = vadd.f32 %v1249_v20, %v1740_v58 }
 0x127   : > { %v778_v25 = vmax.f32 %v756_v23, 0.0  ;;  %v759_v26 = vadd.f32 %v1301_v22, %v678_v24  ;;  %v1250_v27 = vpop.f32.mrb[20].mxu0 }
 0x128   : > { %v1302_v28 = vpop.f32.mrb[20].mxu1  ;;  %v1251_v29 = vpop.f32.mrb[21].mxu0 }
 0x129   : > { %v1199_v30 = vpack.c.bf16 %v778_v25, %v778_v25  ;;  %v779_v31 = vmax.f32 %v759_v26, 0.0  ;;  %v1252_v32 = vadd.f32 %v1251_v29, %v1250_v27  ;;  %v1303_v33 = vpop.f32.mrb[21].mxu1  ;;  %v1253_v34 = vpop.f32.mrb[22].mxu0 }
 0x12a   : > { %v1304_v35 = vadd.f32 %v1303_v33, %v1302_v28  ;;  %v1305_v36 = vpop.f32.mrb[22].mxu1  ;;  %v1254_v37 = vpop.f32.mrb[23].mxu0 }
 0x12b   : > { %839 = vst.msk [vmem:[%s1745_s12 + $0x20] sm:$0xf] %vm830_vm0, %v1199_v30  ;;  %v1200_v38 = vpack.c.bf16 %v779_v31, %v779_v31  ;;  %v683_v39 = vadd.f32 %v1252_v32, %v1740_v58  ;;  %v1255_v40 = vadd.f32 %v1254_v37, %v1253_v34  ;;  %v1306_v41 = vpop.f32.mrb[23].mxu1 }
 0x12c   : > { %v1307_v42 = vadd.f32 %v1306_v41, %v1305_v36 }
 0x12d   : > { %840 = vst.msk [vmem:[%s1745_s12 + $0x24] sm:$0xf] %vm830_vm0, %v1200_v38  ;;  %v764_v43 = vadd.f32 %v1304_v35, %v683_v39  ;;  %v686_v44 = vadd.f32 %v1255_v40, %v1740_v58 }
 0x12f   : > { %v780_v45 = vmax.f32 %v764_v43, 0.0  ;;  %v767_v46 = vadd.f32 %v1307_v42, %v686_v44  ;;  %849 = sbr.rel (!%p1603_p4) target bundleno = 379 (0x17b), region = 36 }
 0x131   : > { %v1201_v47 = vpack.c.bf16 %v780_v45, %v780_v45  ;;  %v781_v48 = vmax.f32 %v767_v46, 0.0 }
 0x133   : > { %841 = vst.msk [vmem:[%s1745_s12 + $0x28] sm:$0xf] %vm830_vm0, %v1201_v47  ;;  %v1202_v49 = vpack.c.bf16 %v781_v48, %v781_v48 }
 0x135   : > { %842 = vst.msk [vmem:[%s1745_s12 + $0x2c] sm:$0xf] %vm830_vm0, %v1202_v49 }
 0x136   : > { %s1852_s7 = smov (!%p852_p8, %s851_s7), 12 }
 0x137   : > { %s1178_s14 = sshll.u32 %s1852_s7, 6 }
 0x138   : > { %p1181_p9 = scmp.eq.s32.totalorder %s1178_s14, 0 }
 0x139   : > { %1466 = sdivrem.u32 (!%p1181_p9), %s1852_s7, 12 }
 0x13a   : > { %860 = sbr.rel (%p1181_p9) target bundleno = 379 (0x17b), region = 40 }
 0x142   : > { %s1794_s20 = spop.drf %1466 }
 0x143   : > { %p1182_p10 = scmp.le.s32.totalorder %s1794_s20, 0 }
 0x144   : > { %s1845_s15 = smov (!%p1182_p10), %s1788_s11  ;;  %s1846_s30 = smov (!%p1182_p10), %s1745_s12 }
 0x145   : > { %1059 = sbr.rel (%p1182_p10) target bundleno = 350 (0x15e), region = 112  ;;  %s1803_s17 = smov (!%p1182_p10), 0  }
 0x146   : > { %s1805_s18 = smov (!%p1182_p10), 0  }
 0x14c LB: >> { %v877_v58 = vld [vmem:[%s1532_s30] sm:$0xf]  ;;  %v879_v50 = vld [vmem:[%s1532_s30 + $0x4] sm:$0xf]  ;;  %v881_v51 = vld [vmem:[%s1532_s30 + $0x8] sm:$0xf]  ;;  %s1540_s18 = sphi %s1805_s18, %s871_s18   ;;  %s1536_s17 = sphi %s1803_s17, %s1847_s17   ;;  %s1532_s30 = sphi %s1846_s30, %s906_s30   ;;  %s1528_s15 = sphi %s1845_s15, %s907_s15  }
 0x14d   : >> { %878 = vst [vmem:[%s1528_s15] sm:$0xf] %v877_v58  ;;  %880 = vst [vmem:[%s1528_s15 + $0x4] sm:$0xf] %v879_v50  ;;  %v883_v52 = vld [vmem:[%s1532_s30 + $0xc] sm:$0xf]  ;;  %s901_s21 = sadd.s32 1, %s1536_s17 }
 0x14e   : >> { %882 = vst [vmem:[%s1528_s15 + $0x8] sm:$0xf] %v881_v51  ;;  %v885_v53 = vld [vmem:[%s1532_s30 + $0x10] sm:$0xf]  ;;  %v887_v54 = vld [vmem:[%s1532_s30 + $0x14] sm:$0xf]  ;;  %p902_p11 = scmp.ge.s32.totalorder %s901_s21, %s1794_s20 }
 0x14f   : >> { %884 = vst [vmem:[%s1528_s15 + $0xc] sm:$0xf] %v883_v52  ;;  %886 = vst [vmem:[%s1528_s15 + $0x10] sm:$0xf] %v885_v53  ;;  %v889_v55 = vld [vmem:[%s1532_s30 + $0x18] sm:$0xf] }
 0x150   : >> { %888 = vst [vmem:[%s1528_s15 + $0x14] sm:$0xf] %v887_v54  ;;  %v891_v56 = vld [vmem:[%s1532_s30 + $0x1c] sm:$0xf]  ;;  %v893_v57 = vld [vmem:[%s1532_s30 + $0x20] sm:$0xf] }
 0x151   : >> { %890 = vst [vmem:[%s1528_s15 + $0x18] sm:$0xf] %v889_v55  ;;  %892 = vst [vmem:[%s1528_s15 + $0x1c] sm:$0xf] %v891_v56  ;;  %v895_v59 = vld [vmem:[%s1532_s30 + $0x24] sm:$0xf] }
 0x152   : >> { %894 = vst [vmem:[%s1528_s15 + $0x20] sm:$0xf] %v893_v57  ;;  %v897_v60 = vld [vmem:[%s1532_s30 + $0x28] sm:$0xf]  ;;  %v899_v61 = vld [vmem:[%s1532_s30 + $0x2c] sm:$0xf] }
 0x153   : >> { %896 = vst [vmem:[%s1528_s15 + $0x24] sm:$0xf] %v895_v59  ;;  %898 = vst [vmem:[%s1528_s15 + $0x28] sm:$0xf] %v897_v60  ;;  %s1854_s21 = smov (%p902_p11, %s901_s21), 0  ;;  %s871_s18 = sadd.s32 1, %s1540_s18  }
 0x154   : >> { %900 = vst [vmem:[%s1528_s15 + $0x2c] sm:$0xf] %v899_v61  ;;  %s904_s22 = smul.u32 48, %s1854_s21  ;;  %p870_p12 = scmp.ge.s32.totalorder %s871_s18, %s1794_s20 }
 0x155   : >> { %s1847_s17 = smov %s1854_s21 }
 0x156   : >> { %s906_s30 = scalar_lea.vmem %s1745_s12, %s904_s22 [#allocation2]   ;;  %s907_s15 = scalar_lea.vmem %s1788_s11, %s904_s22  }
 0x157   : > { %873 = sbr.rel (!%p870_p12) target bundleno = 332 (0x14c), region = 118 }
 0x15e PF: > { %1468 = sdivrem.u32 %s1852_s7, 12 }
 0x15f   : > { %s1183_s23 = smul.u32 48, %s1794_s20 }
 0x161   : > { %s912_s24 = scalar_lea.vmem %s1745_s12, %s1183_s23 [#allocation2]   ;;  %s914_s25 = scalar_lea.vmem %s1788_s11, %s1183_s23  }
 0x167   : > { %s1469_s26 = spop.drf %1468 }
 0x168   : > { %p1185_p13 = scmp.le.s32.totalorder %s1469_s26, 0 }
 0x169   : > { %s1542_s27 = smov (!%p1185_p13), %s914_s25   ;;  %s1546_s28 = smov (!%p1185_p13), %s912_s24  }
 0x16a   : > { %1073 = sbr.rel (%p1185_p13) target bundleno = 379 (0x17b), region = 123  ;;  %s1550_s29 = smov (!%p1185_p13), 0  }
 0x16b   : > { %s1554_s4 = smov (!%p1185_p13), 0  }
 0x171 LB: >> { %v924_v62 = vld [vmem:[%s1548_s28] sm:$0xf]  ;;  %s926_s5 = sadd.s32 1, %s1552_s29  ;;  %s918_s4 = sadd.s32 1, %s1556_s4   ;;  %s1556_s4 = sphi %s1554_s4, %s918_s4   ;;  %s1552_s29 = sphi %s1550_s29, %s1551_s29   ;;  %s1548_s28 = sphi %s1546_s28, %s931_s28   ;;  %s1544_s27 = sphi %s1542_s27, %s932_s27  }
 0x172   : >> { %925 = vst [vmem:[%s1544_s27] sm:$0xf] %v924_v62  ;;  %p927_p0 = scmp.ge.s32.totalorder %s926_s5, %s1469_s26  ;;  %p917_p1 = scmp.ge.s32.totalorder %s918_s4, %s1469_s26 }
 0x174   : >> { %s1856_s5 = smov (%p927_p0, %s926_s5), 0  ;;  %920 = sbr.rel (!%p917_p1) target bundleno = 369 (0x171), region = 129 }
 0x175   : >> { %s1186_s6 = sshll.u32 %s1856_s5, 2  ;;  %s1551_s29 = smov %s1856_s5  }
 0x176   : >> { %s931_s28 = scalar_lea.vmem %s912_s24, %s1186_s6 [#allocation2]   ;;  %s932_s27 = scalar_lea.vmem %s914_s25, %s1186_s6  }
 0x17b PF: > { %p10_p2 = scmp.ge.s32.totalorder %s1593_s16, 4   ;;  %s1848_s12 = smov %s1520_s13 }
 0x17c   : > { %s1849_s13 = smov %s1601_s19  ;;  %s1850_s14 = smov %s1593_s16 }
 0x17d   :  { %12 = sbr.rel (!%p10_p2) target bundleno = 2 (0x2), region = 140 }

// kernel: dqn_forward.6
= control target key start
LH: loop header
LB: loop body
LE: loop exit
PB: predicated region body
PF: predicated region fallthrough
CT: control target
= control target key end

     0   :  { %s1596_s12 = smov 0   ;;  %s1598_s13 = smov 0   ;;  %s1849_s0 = inlined_call_operand.vmem [shape: bf16[98,576], index: 0, kind: input, shape index: {}]   ;;  %s1850_s1 = inlined_call_operand.vmem [shape: bf16[576,64], index: 1, kind: input, shape index: {}]   ;;  %s1851_s2 = inlined_call_operand.vmem [shape: f32[1,64], index: 2, kind: input, shape index: {}]   ;;  %s1852_s3 = inlined_call_operand.vmem [shape: bf16[98,64], index: 3, kind: output, shape index: {}]  }
   0x1   :  { %s1600_s14 = smov 0  }
   0x2 LB: > { %s1609_s15 = sadd.s32 4294967295, %s1542_s14   ;;  %s1611_s16 = sadd.s32 1, %s1542_s14   ;;  %s1542_s14 = sphi %s1600_s14, %s1859_s14   ;;  %s1538_s13 = sphi %s1598_s13, %s1858_s13   ;;  %s1534_s12 = sphi %s1596_s12, %s1857_s12  }
   0x3   : > { %s85_s17 = ssub.s32 %s1542_s14, %s1611_s16  ;;  %s88_s18 = sadd.s32 1, %s1538_s13 }
   0x4   : > { %p86_p0 = scmp.eq.s32.totalorder %s85_s17, 0  ;;  %p98_p1 = scmp.ne.s32.totalorder %s1538_s13, %s1534_s12 }
   0x5   : > { %p99_p2 = scmp.eq.s32.totalorder %s1609_s15, 1  ;;  %p1122_p3 = scmp.ge.s32.totalorder %s1542_s14, 1 }
   0x6   : > { %s1619_s19 = scalar_select %p86_p0, %s1538_s13, %s88_s18  }
   0x7   : > { %p1621_p4 = por %p99_p2, %p98_p1  ;;  %p149_p5 = scmp.lt.s32.totalorder %s1542_s14, 3 }
   0x9   : > { %p150_p6 = pnand %p1122_p3, %p149_p5 }
   0xa   : > { %v1424_v0 = vld [vmem:[%s1850_s1 + $0x40] sm:$0xff] (!%p150_p6)   ;;  %v1428_v4 = vld [vmem:[%s1850_s1 + $0x48] sm:$0xff] (!%p150_p6)   ;;  %v1432_v8 = vld [vmem:[%s1850_s1 + $0x50] sm:$0xff] (!%p150_p6)   ;;  %s1671_s30 = sshll.u32 (!%p150_p6), %s1609_s15, 3  ;;  %vm620_vm0 = vcmask (!%p150_p6), 523264   ;;  %s175_s17 = sand.u32 (!%p150_p6), 1, %s1534_s12  }
   0xb   : > { %153 = sbr.rel (%p150_p6) target bundleno = 353 (0x161), region = 32  ;;  %v1425_v1 = vld [vmem:[%s1850_s1 + $0xc0] sm:$0xff] (!%p150_p6)   ;;  %1223 = vmatprep.subr.bf16.mxu0 (!%p150_p6), %v1424_v0  ;;  %v1429_v5 = vld [vmem:[%s1850_s1 + $0xc8] sm:$0xff] (!%p150_p6)   ;;  %v1433_v9 = vld [vmem:[%s1850_s1 + $0xd0] sm:$0xff] (!%p150_p6)   ;;  %p184_p7 = scmp.lt.s32.totalorder (!%p150_p6), %s1671_s30, 12  ;;  %vm868_vm1 = vcmask (!%p150_p6), 519168  }
   0xc   : > { %v1426_v2 = vld [vmem:[%s1850_s1] sm:$0xff] (!%p150_p6)   ;;  %1263 = vmatprep.subr.bf16.mxu1 (!%p150_p6), %v1425_v1  ;;  %v1430_v6 = vld [vmem:[%s1850_s1 + $0x8] sm:$0xff] (!%p150_p6)   ;;  %v1434_v10 = vld [vmem:[%s1850_s1 + $0x10] sm:$0xff] (!%p150_p6)   ;;  %s1123_s18 = sshll.u32 (!%p150_p6), %s175_s17, 5 }
   0xd   : > { %v1427_v3 = vld [vmem:[%s1850_s1 + $0x80] sm:$0xff] (!%p150_p6)   ;;  %1224 = vmatpush3.bf16.msra.mxu0 (!%p150_p6), %v1426_v2  ;;  %v1431_v7 = vld [vmem:[%s1850_s1 + $0x88] sm:$0xff] (!%p150_p6)   ;;  %v1435_v11 = vld [vmem:[%s1850_s1 + $0x90] sm:$0xff] (!%p150_p6)   ;;  %s1770_s12 = scalar_lea.vmem (!%p150_p6), [#allocation2], %s1123_s18  }
   0xe   : > { %1264 = vmatpush3.bf16.msra.mxu1 (!%p150_p6), %v1427_v3  ;;  %1225 = vmatprep.subr.bf16.mxu0 (!%p150_p6), %v1428_v4  ;;  %v1436_v12 = vld [vmem:[%s1850_s1 + $0x58] sm:$0xff] (!%p150_p6)   ;;  %v1440_v16 = vld [vmem:[%s1850_s1 + $0x60] sm:$0xff] (!%p150_p6)   ;;  %v1444_v20 = vld [vmem:[%s1850_s1 + $0x68] sm:$0xff] (!%p150_p6)  }
   0xf   : > { %1265 = vmatprep.subr.bf16.mxu1 (!%p150_p6), %v1429_v5  ;;  %v1437_v13 = vld [vmem:[%s1850_s1 + $0xd8] sm:$0xff] (!%p150_p6)   ;;  %v1441_v17 = vld [vmem:[%s1850_s1 + $0xe0] sm:$0xff] (!%p150_p6)   ;;  %v1445_v21 = vld [vmem:[%s1850_s1 + $0xe8] sm:$0xff] (!%p150_p6)  }
  0x10   : > { %v1438_v14 = vld [vmem:[%s1850_s1 + $0x18] sm:$0xff] (!%p150_p6)   ;;  %v1442_v18 = vld [vmem:[%s1850_s1 + $0x20] sm:$0xff] (!%p150_p6)   ;;  %v1446_v22 = vld [vmem:[%s1850_s1 + $0x28] sm:$0xff] (!%p150_p6)  }
  0x11   : > { %1226 = vmatpush3.bf16.msra.mxu0 (!%p150_p6), %v1430_v6  ;;  %v1439_v15 = vld [vmem:[%s1850_s1 + $0x98] sm:$0xff] (!%p150_p6)   ;;  %v1443_v19 = vld [vmem:[%s1850_s1 + $0xa0] sm:$0xff] (!%p150_p6)   ;;  %v1447_v23 = vld [vmem:[%s1850_s1 + $0xa8] sm:$0xff] (!%p150_p6)  }
  0x12   : > { %1266 = vmatpush3.bf16.msra.mxu1 %v1431_v7  ;;  %1227 = vmatprep.subr.bf16.mxu0 %v1432_v8  ;;  %s185_s24 = scalar_select %p184_p7, %s1671_s30, 12  ;;  %v1448_v24 = vld [vmem:[%s1850_s1 + $0x70] sm:$0xff]   ;;  %v1452_v28 = vld [vmem:[%s1850_s1 + $0x78] sm:$0xff]   ;;  %v1462_v36 = vld [vmem:[%s1850_s1 + $0x100] sm:$0xff]  }
  0x13   : > { %1267 = vmatprep.subr.bf16.mxu1 %v1433_v9  ;;  %v1449_v25 = vld [vmem:[%s1850_s1 + $0xf0] sm:$0xff]   ;;  %v1453_v29 = vld [vmem:[%s1850_s1 + $0xf8] sm:$0xff]   ;;  %v1469_v39 = vld [vmem:[%s1850_s1 + $0x108] sm:$0xff]   ;;  %s885_s21 = ssub.s32 (%p1621_p4), 13, %s1671_s30  ;;  %s1220_s22 = sshll.u32 (%p1621_p4), %s1609_s15, 5 }
  0x14   : > { %s1335_s7 = smul.u32 20, %s185_s24  ;;  %v1450_v26 = vld [vmem:[%s1850_s1 + $0x30] sm:$0xff]   ;;  %v1454_v30 = vld [vmem:[%s1850_s1 + $0x38] sm:$0xff]   ;;  %v1126_v58 = vld [vmem:[%s1851_s2] ss:$0 sm:$0xff]  ;;  %p886_p8 = scmp.lt.s32.totalorder (%p1621_p4), %s885_s21, 8 }
  0x15   : > { %1228 = vmatpush3.bf16.msra.mxu0 %v1434_v10  ;;  %v1451_v27 = vld [vmem:[%s1850_s1 + $0xb0] sm:$0xff]   ;;  %v1455_v31 = vld [vmem:[%s1850_s1 + $0xb8] sm:$0xff]   ;;  %s1795_s25 = scalar_lea.vmem (%p1621_p4), %s1852_s3, %s1220_s22  }
  0x16   : > { %1268 = vmatpush3.bf16.msra.mxu1 %v1435_v11  ;;  %1229 = vmatprep.subr.bf16.mxu0 %v1436_v12  ;;  %s1723_s24 = scalar_lea.vmem %s1849_s0, %s1335_s7  ;;  %v1476_v44 = vld [vmem:[%s1850_s1 + $0x110] sm:$0xff]   ;;  %v1483_v45 = vld [vmem:[%s1850_s1 + $0x118] sm:$0xff]  }
  0x17   : > { %1269 = vmatprep.subr.bf16.mxu1 %v1437_v13  ;;  %v1456_v32 = vld [vmem:[%s1723_s24] ss:$20 sps:$4 sm:$0xff]   ;;  %v1458_v33 = vld [vmem:[%s1723_s24 + $0x4] ss:$20 sps:$4 sm:$0xff]   ;;  %v1459_v34 = vld [vmem:[%s1723_s24 + $0x8] ss:$20 sps:$4 sm:$0xff]  }
  0x18   : > { %v1461_v35 = vld [vmem:[%s1723_s24 + $0xc] ss:$20 sps:$4 sm:$0xff]   ;;  %665 = vmatprep.mubr.bf16.mxu0 %v1458_v33  ;;  %v1465_v38 = vld [vmem:[%s1723_s24 + $0x34] ss:$20 sps:$4 sm:$0xff]   ;;  %v1468_v41 = vld [vmem:[%s1723_s24 + $0x30] ss:$20 sps:$4 sm:$0xff]  }
  0x19   : > { %1230 = vmatpush3.bf16.msra.mxu0 %v1438_v14  ;;  %730 = vmatprep.mubr.bf16.mxu1 %v1461_v35  ;;  %v1463_v37 = vld [vmem:[%s1723_s24 + $0x2c] ss:$20 sps:$4 sm:$0xff]   ;;  %v1467_v40 = vld [vmem:[%s1723_s24 + $0x28] ss:$20 sps:$4 sm:$0xff]   ;;  %v1474_v46 = vld [vmem:[%s1723_s24 + $0x50] ss:$20 sps:$4 sm:$0xff]  }
  0x1a   : > { %1270 = vmatpush3.bf16.msra.mxu1 %v1439_v15  ;;  %1231 = vmatprep.subr.bf16.mxu0 %v1440_v16  ;;  %v1470_v42 = vld [vmem:[%s1723_s24 + $0x54] ss:$20 sps:$4 sm:$0xff]   ;;  %v1472_v43 = vld [vmem:[%s1723_s24 + $0x5c] ss:$20 sps:$4 sm:$0xff]   ;;  %v1475_v47 = vld [vmem:[%s1723_s24 + $0x58] ss:$20 sps:$4 sm:$0xff]  }
  0x1b   : > { %1271 = vmatprep.subr.bf16.mxu1 %v1441_v17  ;;  %v1477_v48 = vld [vmem:[%s1723_s24 + $0x7c] ss:$20 sps:$4 sm:$0xff]   ;;  %v1479_v49 = vld [vmem:[%s1723_s24 + $0x84] ss:$20 sps:$4 sm:$0xff]   ;;  %v1482_v51 = vld [vmem:[%s1723_s24 + $0x80] ss:$20 sps:$4 sm:$0xff]  }
  0x1c   : > { %v1481_v50 = vld [vmem:[%s1723_s24 + $0x78] ss:$20 sps:$4 sm:$0xff]   ;;  %v1484_v52 = vld [vmem:[%s1723_s24 + $0x10] ss:$20 sps:$4 sm:$0xff]   ;;  %v1485_v53 = vld [vmem:[%s1723_s24 + $0x60] ss:$20 sps:$4 sm:$0xff]  }
  0x1d   : > { %1232 = vmatpush3.bf16.msra.mxu0 %v1442_v18  ;;  %v1486_v54 = vld [vmem:[%s1723_s24 + $0x38] ss:$20 sps:$4 sm:$0xff]   ;;  %v1487_v55 = vld [vmem:[%s1723_s24 + $0x88] ss:$20 sps:$4 sm:$0xff]  }
  0x1e   : > { %1272 = vmatpush3.bf16.msra.mxu1 %v1443_v19  ;;  %1233 = vmatprep.subr.bf16.mxu0 %v1444_v20 }
  0x1f   : > { %1273 = vmatprep.subr.bf16.mxu1 %v1445_v21 }
  0x21   : > { %1234 = vmatpush3.bf16.msra.mxu0 %v1446_v22 }
  0x22   : > { %1274 = vmatpush3.bf16.msra.mxu1 %v1447_v23  ;;  %1235 = vmatprep.subr.bf16.mxu0 %v1448_v24 }
  0x23   : > { %1275 = vmatprep.subr.bf16.mxu1 %v1449_v25 }
  0x25   : > { %1236 = vmatpush3.bf16.msra.mxu0 %v1450_v26 }
  0x26   : > { %1276 = vmatpush3.bf16.msra.mxu1 %v1451_v27  ;;  %1237 = vmatprep.subr.bf16.mxu0 %v1452_v28 }
  0x27   : > { %1277 = vmatprep.subr.bf16.mxu1 %v1453_v29 }
  0x29   : > { %1238 = vmatpush3.bf16.msra.mxu0 %v1454_v30 }
  0x2a   : > { %1278 = vmatpush3.bf16.msra.mxu1 %v1455_v31  ;;  %1311 = vmatprep.subr.bf16.mxu0 %v1462_v36 }
  0x2b   : > { %1327 = vmatprep.subr.bf16.mxu1 %v1462_v36 }
  0x2c   : > { %666 = vmatmul.mubr.bf16.vlgmr.msra.gmra.mrb[0].mxu0 %v1456_v32 }
  0x2d   : > { %731 = vmatmul.mubr.bf16.vlgmr.msra.gmra.mrb[0].mxu1 %v1459_v34  ;;  %1312 = vmatpush3.bf16.msra.mxu0 %v1462_v36 }
  0x2e   : > { %1331 = vmatpush3.bf16.msra.mxu1 %v1462_v36  ;;  %673 = vmatprep.mubr.bf16.mxu0 %v1463_v37 }
  0x2f   : > { %738 = vmatprep.mubr.bf16.mxu1 %v1465_v38  ;;  %1313 = vmatprep.subr.bf16.mxu0 %v1469_v39 }
  0x30   : > { %1328 = vmatprep.subr.bf16.mxu1 %v1469_v39 }
  0x31   : > { %1314 = vmatpush3.bf16.msra.mxu0 %v1469_v39 }
  0x32   : > { %1332 = vmatpush3.bf16.msra.mxu1 %v1469_v39  ;;  %1315 = vmatprep.subr.bf16.mxu0 %v1476_v44 }
  0x33   : > { %1329 = vmatprep.subr.bf16.mxu1 %v1476_v44 }
  0x34   : > { %674 = vmatmul.mubr.bf16.gmra.mrb[4].mxu0 %v1467_v40 }
  0x35   : > { %739 = vmatmul.mubr.bf16.gmra.mrb[4].mxu1 %v1468_v41  ;;  %681 = vmatprep.mubr.bf16.mxu0 %v1470_v42 }
  0x36   : > { %746 = vmatprep.mubr.bf16.mxu1 %v1472_v43  ;;  %1316 = vmatpush3.bf16.msra.mxu0 %v1476_v44 }
  0x37   : > { %1333 = vmatpush3.bf16.msra.mxu1 %v1476_v44  ;;  %1317 = vmatprep.subr.bf16.mxu0 %v1483_v45 }
  0x38   : > { %1330 = vmatprep.subr.bf16.mxu1 %v1483_v45 }
  0x3a   : > { %1318 = vmatpush3.bf16.msra.mxu0 %v1483_v45 }
  0x3b   : > { %1334 = vmatpush3.bf16.msra.mxu1 %v1483_v45 }
  0x3c   : > { %682 = vmatmul.mubr.bf16.gmra.mrb[8].mxu0 %v1474_v46 }
  0x3d   : > { %747 = vmatmul.mubr.bf16.gmra.mrb[8].mxu1 %v1475_v47  ;;  %689 = vmatprep.mubr.bf16.mxu0 %v1477_v48 }
  0x3e   : > { %754 = vmatprep.mubr.bf16.mxu1 %v1479_v49 }
  0x44   : > { %690 = vmatmul.mubr.bf16.gmra.mrb[12].mxu0 %v1481_v50 }
  0x45   : > { %755 = vmatmul.mubr.bf16.gmra.mrb[12].mxu1 %v1482_v51  ;;  %1319 = vmatprep.mubr.msk.bf16.mxu0 %vm620_vm0, %v1484_v52 }
  0x46   : > { %1323 = vmatprep.mubr.msk.bf16.mxu1 %vm620_vm0, %v1485_v53 }
  0x4c   : > { %1320 = vmatmul.mubr.msk.bf16.vlgmr.msra.gmra.mrb[16].mxu0 %vm620_vm0, %v1486_v54 }
  0x4d   : > { %1324 = vmatmul.mubr.msk.bf16.vlgmr.msra.gmra.mrb[16].mxu1 %vm620_vm0, %v1487_v55 }
  0xff   : > { %v1239_v56 = vpop.f32.mrb[0].mxu0 }
 0x100   : > { %v1279_v57 = vpop.f32.mrb[0].mxu1  ;;  %v1240_v59 = vpop.f32.mrb[1].mxu0 }
 0x101   : > { %v1241_v60 = vadd.f32 %v1240_v59, %v1239_v56  ;;  %v1280_v61 = vpop.f32.mrb[1].mxu1  ;;  %v1242_v62 = vpop.f32.mrb[2].mxu0 }
 0x102   : > { %v1281_v63 = vadd.f32 %v1280_v61, %v1279_v57  ;;  %v1282_v0 = vpop.f32.mrb[2].mxu1  ;;  %v1243_v1 = vpop.f32.mrb[3].mxu0 }
 0x103   : > { %v668_v2 = vadd.f32 %v1241_v60, %v1126_v58  ;;  %v1244_v3 = vadd.f32 %v1243_v1, %v1242_v62  ;;  %v1283_v4 = vpop.f32.mrb[3].mxu1 }
 0x104   : > { %v1284_v5 = vadd.f32 %v1283_v4, %v1282_v0 }
 0x105   : > { %v671_v6 = vadd.f32 %v1244_v3, %v1126_v58  ;;  %v733_v7 = vadd.f32 %v1281_v63, %v668_v2 }
 0x107   : > { %v1245_v8 = vpop.f32.mrb[4].mxu0  ;;  %v1766_v9 = vadd.f32 %v1284_v5, %v671_v6 }
 0x108   : > { %v1285_v10 = vpop.f32.mrb[4].mxu1  ;;  %v1246_v11 = vpop.f32.mrb[5].mxu0 }
 0x109   : > { %v1247_v12 = vadd.f32 %v1246_v11, %v1245_v8  ;;  %v1286_v13 = vpop.f32.mrb[5].mxu1  ;;  %v1248_v14 = vpop.f32.mrb[6].mxu0 }
 0x10a   : > { %v1287_v15 = vadd.f32 %v1286_v13, %v1285_v10  ;;  %v1288_v16 = vpop.f32.mrb[6].mxu1  ;;  %v1249_v17 = vpop.f32.mrb[7].mxu0 }
 0x10b   : > { %v676_v18 = vadd.f32 %v1247_v12, %v1126_v58  ;;  %v1250_v19 = vadd.f32 %v1249_v17, %v1248_v14  ;;  %v1289_v20 = vpop.f32.mrb[7].mxu1 }
 0x10c   : > { %v1290_v21 = vadd.f32 %v1289_v20, %v1288_v16 }
 0x10d   : > { %v679_v22 = vadd.f32 %v1250_v19, %v1126_v58  ;;  %v741_v23 = vadd.f32 %v1287_v15, %v676_v18 }
 0x10f   : > { %v1251_v24 = vpop.f32.mrb[8].mxu0  ;;  %v744_v25 = vadd.f32 %v1290_v21, %v679_v22 }
 0x110   : > { %v1291_v26 = vpop.f32.mrb[8].mxu1  ;;  %v1252_v27 = vpop.f32.mrb[9].mxu0 }
 0x111   : > { %v1253_v28 = vadd.f32 %v1252_v27, %v1251_v24  ;;  %v1292_v29 = vpop.f32.mrb[9].mxu1  ;;  %v1254_v30 = vpop.f32.mrb[10].mxu0 }
 0x112   : > { %v1293_v31 = vadd.f32 %v1292_v29, %v1291_v26  ;;  %v1294_v32 = vpop.f32.mrb[10].mxu1  ;;  %v1255_v33 = vpop.f32.mrb[11].mxu0 }
 0x113   : > { %v684_v34 = vadd.f32 %v1253_v28, %v1126_v58  ;;  %v1256_v35 = vadd.f32 %v1255_v33, %v1254_v30  ;;  %v1295_v36 = vpop.f32.mrb[11].mxu1 }
 0x114   : > { %v1296_v37 = vadd.f32 %v1295_v36, %v1294_v32 }
 0x115   : > { %v687_v38 = vadd.f32 %v1256_v35, %v1126_v58  ;;  %v749_v39 = vadd.f32 %v1293_v31, %v684_v34 }
 0x117   : > { %v1257_v40 = vpop.f32.mrb[12].mxu0  ;;  %v752_v41 = vadd.f32 %v1296_v37, %v687_v38 }
 0x118   : > { %v1297_v42 = vpop.f32.mrb[12].mxu1  ;;  %v1258_v43 = vpop.f32.mrb[13].mxu0 }
 0x119   : > { %v1259_v44 = vadd.f32 %v1258_v43, %v1257_v40  ;;  %v1298_v45 = vpop.f32.mrb[13].mxu1  ;;  %v1260_v46 = vpop.f32.mrb[14].mxu0 }
 0x11a   : > { %v1299_v47 = vadd.f32 %v1298_v45, %v1297_v42  ;;  %v1300_v48 = vpop.f32.mrb[14].mxu1  ;;  %v1261_v49 = vpop.f32.mrb[15].mxu0 }
 0x11b   : > { %v692_v50 = vadd.f32 %v1259_v44, %v1126_v58  ;;  %v1262_v51 = vadd.f32 %v1261_v49, %v1260_v46  ;;  %v1301_v52 = vpop.f32.mrb[15].mxu1 }
 0x11c   : > { %v1302_v53 = vadd.f32 %v1301_v52, %v1300_v48 }
 0x11d   : > { %v695_v54 = vadd.f32 %v1262_v51, %v1126_v58  ;;  %v757_v55 = vadd.f32 %v1299_v47, %v692_v50 }
 0x11f   : > { %v1321_v56 = vpop.f32.mrb[16].mxu0  ;;  %v760_v57 = vadd.f32 %v1302_v53, %v695_v54 }
 0x120   : > { %v806_v59 = vadd.f32 %v1321_v56, %v741_v23  ;;  %v1325_v60 = vpop.f32.mrb[16].mxu1  ;;  %v797_v61 = vpop.f32.mrb[17].mxu0 }
 0x121   : > { %v822_v62 = vadd.f32 %v1325_v60, %v757_v55  ;;  %v798_v63 = vadd.f32 %v797_v61, %v733_v7  ;;  %v813_v0 = vpop.f32.mrb[17].mxu1  ;;  %v1322_v1 = vpop.f32.mrb[18].mxu0 }
 0x122   : > { %v830_v2 = vmax.f32 %v806_v59, 0.0  ;;  %v814_v3 = vadd.f32 %v813_v0, %v749_v39  ;;  %v809_v4 = vadd.f32 %v1322_v1, %v744_v25  ;;  %v1326_v5 = vpop.f32.mrb[18].mxu1  ;;  %v800_v6 = vpop.f32.mrb[19].mxu0 }
 0x123   : > { %v834_v8 = vmax.f32 %v822_v62, 0.0  ;;  %v828_v58 = vmax.f32 %v798_v63, 0.0  ;;  %v825_v10 = vadd.f32 %v1326_v5, %v760_v57  ;;  %v801_v11 = vadd.f32 %v800_v6, %v1766_v9  ;;  %v816_v12 = vpop.f32.mrb[19].mxu1 }
 0x124   : > { %v1214_v13 = vpack.c.bf16 %v830_v2, %v830_v2  ;;  %v832_v14 = vmax.f32 %v814_v3, 0.0  ;;  %v831_v15 = vmax.f32 %v809_v4, 0.0  ;;  %v817_v16 = vadd.f32 %v816_v12, %v752_v41  ;;  %883 = sbr.rel (!%p1621_p4) target bundleno = 353 (0x161), region = 36 }
 0x125   : > { %v1218_v17 = vpack.c.bf16 %v834_v8, %v834_v8  ;;  %v1212_v7 = vpack.c.bf16 %v828_v58, %v828_v58  ;;  %v835_v18 = vmax.f32 %v825_v10, 0.0  ;;  %v829_v19 = vmax.f32 %v801_v11, 0.0 }
 0x126   : > { %871 = vst.msk [vmem:[%s1770_s12 + $0x8] sm:$0xf] %vm868_vm1, %v1214_v13  ;;  %v1216_v9 = vpack.c.bf16 %v832_v14, %v832_v14  ;;  %v1215_v20 = vpack.c.bf16 %v831_v15, %v831_v15  ;;  %v833_v21 = vmax.f32 %v817_v16, 0.0 }
 0x127   : > { %875 = vst.msk [vmem:[%s1770_s12 + $0x18] sm:$0xf] %vm868_vm1, %v1218_v17  ;;  %869 = vst.msk [vmem:[%s1770_s12] sm:$0xf] %vm868_vm1, %v1212_v7  ;;  %v1219_v22 = vpack.c.bf16 %v835_v18, %v835_v18  ;;  %v1213_v23 = vpack.c.bf16 %v829_v19, %v829_v19 }
 0x128   : > { %873 = vst.msk [vmem:[%s1770_s12 + $0x10] sm:$0xf] %vm868_vm1, %v1216_v9  ;;  %872 = vst.msk [vmem:[%s1770_s12 + $0xc] sm:$0xf] %vm868_vm1, %v1215_v20  ;;  %v1217_v24 = vpack.c.bf16 %v833_v21, %v833_v21 }
 0x129   : > { %876 = vst.msk [vmem:[%s1770_s12 + $0x1c] sm:$0xf] %vm868_vm1, %v1219_v22  ;;  %870 = vst.msk [vmem:[%s1770_s12 + $0x4] sm:$0xf] %vm868_vm1, %v1213_v23 }
 0x12a   : > { %874 = vst.msk [vmem:[%s1770_s12 + $0x14] sm:$0xf] %vm868_vm1, %v1217_v24 }
 0x12b   : > { %s1861_s21 = smov (!%p886_p8, %s885_s21), 8 }
 0x12c   : > { %s1197_s26 = sshll.u32 %s1861_s21, 6 }
 0x12d   : > { %p1200_p9 = scmp.eq.s32.totalorder %s1197_s26, 0 }
 0x12e   : > { %s1801_s27 = sshrl.u32 (!%p1200_p9), %s1861_s21, 3 }
 0x12f   : > { %894 = sbr.rel (%p1200_p9) target bundleno = 353 (0x161), region = 40  ;;  %p1201_p10 = scmp.le.s32.totalorder (!%p1200_p9), %s1801_s27, 0 }
 0x136   : > { %1075 = sbr.rel (%p1201_p10) target bundleno = 332 (0x14c), region = 112  ;;  %s1854_s15 = smov (!%p1201_p10), %s1795_s25 }
 0x137   : > { %s1855_s20 = smov (!%p1201_p10), %s1770_s12  ;;  %s1810_s30 = smov (!%p1201_p10), 0  }
 0x138   : > { %s1812_s28 = smov (!%p1201_p10), 0  }
 0x13d LB: >> { %v910_v25 = vld [vmem:[%s1550_s20] sm:$0xf]  ;;  %v912_v26 = vld [vmem:[%s1550_s20 + $0x4] sm:$0xf]  ;;  %v914_v27 = vld [vmem:[%s1550_s20 + $0x8] sm:$0xf]  ;;  %s1558_s28 = sphi %s1812_s28, %s904_s28   ;;  %s1554_s30 = sphi %s1810_s30, %s1856_s30   ;;  %s1550_s20 = sphi %s1855_s20, %s931_s20   ;;  %s1546_s15 = sphi %s1854_s15, %s932_s15  }
 0x13e   : >> { %911 = vst [vmem:[%s1546_s15] sm:$0xf] %v910_v25  ;;  %913 = vst [vmem:[%s1546_s15 + $0x4] sm:$0xf] %v912_v26  ;;  %v916_v28 = vld [vmem:[%s1550_s20 + $0xc] sm:$0xf]  ;;  %s926_s29 = sadd.s32 1, %s1554_s30 }
 0x13f   : >> { %915 = vst [vmem:[%s1546_s15 + $0x8] sm:$0xf] %v914_v27  ;;  %v918_v29 = vld [vmem:[%s1550_s20 + $0x10] sm:$0xf]  ;;  %v920_v30 = vld [vmem:[%s1550_s20 + $0x14] sm:$0xf]  ;;  %p927_p11 = scmp.ge.s32.totalorder %s926_s29, %s1801_s27 }
 0x140   : >> { %917 = vst [vmem:[%s1546_s15 + $0xc] sm:$0xf] %v916_v28  ;;  %919 = vst [vmem:[%s1546_s15 + $0x10] sm:$0xf] %v918_v29  ;;  %v922_v31 = vld [vmem:[%s1550_s20 + $0x18] sm:$0xf] }
 0x141   : >> { %921 = vst [vmem:[%s1546_s15 + $0x14] sm:$0xf] %v920_v30  ;;  %v924_v32 = vld [vmem:[%s1550_s20 + $0x1c] sm:$0xf]  ;;  %923 = vst [vmem:[%s1546_s15 + $0x18] sm:$0xf] %v922_v31 }
 0x142   : >> { %925 = vst [vmem:[%s1546_s15 + $0x1c] sm:$0xf] %v924_v32  ;;  %s1863_s29 = smov (%p927_p11, %s926_s29), 0  ;;  %s904_s28 = sadd.s32 1, %s1558_s28  }
 0x143   : >> { %s1202_s4 = sshll.u32 %s1863_s29, 5  ;;  %p903_p12 = scmp.ge.s32.totalorder %s904_s28, %s1801_s27 }
 0x144   : >> { %s931_s20 = scalar_lea.vmem %s1770_s12, %s1202_s4 [#allocation2]   ;;  %s932_s15 = scalar_lea.vmem %s1795_s25, %s1202_s4  }
 0x145   : >> { %s1856_s30 = smov %s1863_s29  ;;  %906 = sbr.rel (!%p903_p12) target bundleno = 317 (0x13d), region = 118 }
 0x14c PF: > { %s1831_s5 = sand.u32 7, %s1861_s21   ;;  %s1221_s6 = sshll.u32 %s1801_s27, 5 }
 0x14d   : > { %s937_s7 = scalar_lea.vmem %s1770_s12, %s1221_s6 [#allocation2]   ;;  %s939_s8 = scalar_lea.vmem %s1795_s25, %s1221_s6  }
 0x14e   : > { %p1207_p13 = scmp.le.s32.totalorder %s1831_s5, 0 }
 0x14f   : > { %s1560_s9 = smov (!%p1207_p13), %s939_s8   ;;  %s1564_s10 = smov (!%p1207_p13), %s937_s7  }
 0x150   : > { %1089 = sbr.rel (%p1207_p13) target bundleno = 353 (0x161), region = 123  ;;  %s1568_s11 = smov (!%p1207_p13), 0  }
 0x151   : > { %s1572_s14 = smov (!%p1207_p13), 0  }
 0x157 LB: >> { %v949_v33 = vld [vmem:[%s1566_s10] sm:$0xf]  ;;  %s951_s17 = sadd.s32 1, %s1570_s11  ;;  %s943_s14 = sadd.s32 1, %s1574_s14   ;;  %s1574_s14 = sphi %s1572_s14, %s943_s14   ;;  %s1570_s11 = sphi %s1568_s11, %s1569_s11   ;;  %s1566_s10 = sphi %s1564_s10, %s956_s10   ;;  %s1562_s9 = sphi %s1560_s9, %s957_s9  }
 0x158   : >> { %950 = vst [vmem:[%s1562_s9] sm:$0xf] %v949_v33  ;;  %p952_p0 = scmp.ge.s32.totalorder %s951_s17, %s1831_s5  ;;  %p942_p1 = scmp.ge.s32.totalorder %s943_s14, %s1831_s5 }
 0x15a   : >> { %s1865_s17 = smov (%p952_p0, %s951_s17), 0  ;;  %945 = sbr.rel (!%p942_p1) target bundleno = 343 (0x157), region = 129 }
 0x15b   : >> { %s1208_s18 = sshll.u32 %s1865_s17, 2  ;;  %s1569_s11 = smov %s1865_s17  }
 0x15c   : >> { %s956_s10 = scalar_lea.vmem %s937_s7, %s1208_s18 [#allocation2]   ;;  %s957_s9 = scalar_lea.vmem %s939_s8, %s1208_s18  }
 0x161 PF: > { %p10_p2 = scmp.ge.s32.totalorder %s1611_s16, 4   ;;  %s1857_s12 = smov %s1538_s13 }
 0x162   : > { %s1858_s13 = smov %s1619_s19  ;;  %s1859_s14 = smov %s1611_s16 }
 0x163   :  { %12 = sbr.rel (!%p10_p2) target bundleno = 2 (0x2), region = 140 }

// kernel: dqn_forward.7
= control target key start
LH: loop header
LB: loop body
LE: loop exit
PB: predicated region body
PF: predicated region fallthrough
CT: control target
= control target key end

     0   :  { %v818_v36 = vlaneseq  ;;  %v8701_v37 = vmov 1966171168   ;;  %s11373_s0 = inlined_call_operand.vmem [shape: bf16[2,3136], index: 0, kind: input, shape index: {}]   ;;  %s11374_s1 = inlined_call_operand.vmem [shape: bf16[3136,512], index: 1, kind: input, shape index: {}]   ;;  %s11375_s2 = inlined_call_operand.vmem [shape: f32[1,512], index: 2, kind: input, shape index: {}]   ;;  %s11376_s3 = inlined_call_operand.vmem [shape: bf16[512,64], index: 3, kind: input, shape index: {}]   ;;  %s11377_s4 = inlined_call_operand.vmem [shape: f32[1,64], index: 4, kind: input, shape index: {}]   ;;  %s11378_s5 = inlined_call_operand.vmem [shape: bf16[64,6], index: 5, kind: input, shape index: {}]   ;;  %s11379_s6 = inlined_call_operand.vmem [shape: f32[1,6], index: 6, kind: input, shape index: {}]   ;;  %s11380_s7 = inlined_call_operand.hbm [shape: f32[2,6], index: 7, kind: output, shape index: {}]  }
   0x1   :  { %v7460_v0 = vld [vmem:[%s11374_s1 + $0x4] ss:$16 sps:$4 sm:$0xff]   ;;  %v7462_v1 = vld [vmem:[%s11374_s1 + $0xc] ss:$16 sps:$4 sm:$0xff]   ;;  %v7464_v2 = vld [vmem:[%s11374_s1] ss:$16 sps:$4 sm:$0xff]   ;;  %v844_v38 = vunpack.c.l.s4 %v8701_v37 }
   0x2   :  { %4951 = vmatprep.subr.bf16.mxu0 %v7460_v0  ;;  %v7465_v3 = vld [vmem:[%s11374_s1 + $0x8] ss:$16 sps:$4 sm:$0xff]   ;;  %5484 = vmatprep.subr.bf16.mxu1 %v7462_v1  ;;  %v7466_v4 = vld [vmem:[%s11374_s1 + $0x24] ss:$16 sps:$4 sm:$0xff]   ;;  %v7468_v5 = vld [vmem:[%s11374_s1 + $0x2c] ss:$16 sps:$4 sm:$0xff]  }
   0x3   :  { %4952 = vmatpush1.bf16.msra.mxu0 %v7464_v2  ;;  %5485 = vmatpush1.bf16.msra.mxu1 %v7465_v3  ;;  %v7470_v6 = vld [vmem:[%s11374_s1 + $0x20] ss:$16 sps:$4 sm:$0xff]   ;;  %v7471_v7 = vld [vmem:[%s11374_s1 + $0x28] ss:$16 sps:$4 sm:$0xff]   ;;  %v7472_v8 = vld [vmem:[%s11374_s1 + $0x44] ss:$16 sps:$4 sm:$0xff]   ;;  %v845_v43 = vunpack.c.0.s8 %v844_v38 }
   0x4   :  { %4953 = vmatprep.subr.bf16.mxu0 %v7466_v4  ;;  %5486 = vmatprep.subr.bf16.mxu1 %v7468_v5  ;;  %v7474_v9 = vld [vmem:[%s11374_s1 + $0x4c] ss:$16 sps:$4 sm:$0xff]   ;;  %v7476_v10 = vld [vmem:[%s11374_s1 + $0x40] ss:$16 sps:$4 sm:$0xff]   ;;  %v7477_v11 = vld [vmem:[%s11374_s1 + $0x48] ss:$16 sps:$4 sm:$0xff]  }
   0x5   :  { %v7478_v12 = vld [vmem:[%s11374_s1 + $0x64] ss:$16 sps:$4 sm:$0xff]   ;;  %v7480_v13 = vld [vmem:[%s11374_s1 + $0x6c] ss:$16 sps:$4 sm:$0xff]   ;;  %v7482_v14 = vld [vmem:[%s11374_s1 + $0x60] ss:$16 sps:$4 sm:$0xff]  }
   0x6   :  { %v7483_v15 = vld [vmem:[%s11374_s1 + $0x68] ss:$16 sps:$4 sm:$0xff]   ;;  %v7484_v16 = vld [vmem:[%s11374_s1 + $0x84] ss:$16 sps:$4 sm:$0xff]   ;;  %v7486_v17 = vld [vmem:[%s11374_s1 + $0x8c] ss:$16 sps:$4 sm:$0xff]  }
   0x7   :  { %4954 = vmatpush1.bf16.msra.mxu0 %v7470_v6  ;;  %5487 = vmatpush1.bf16.msra.mxu1 %v7471_v7  ;;  %v7488_v18 = vld [vmem:[%s11374_s1 + $0x80] ss:$16 sps:$4 sm:$0xff]   ;;  %v7489_v19 = vld [vmem:[%s11374_s1 + $0x88] ss:$16 sps:$4 sm:$0xff]   ;;  %v7490_v20 = vld [vmem:[%s11374_s1 + $0xa4] ss:$16 sps:$4 sm:$0xff]  }
   0x8   :  { %4955 = vmatprep.subr.bf16.mxu0 %v7472_v8  ;;  %5488 = vmatprep.subr.bf16.mxu1 %v7474_v9  ;;  %v7492_v21 = vld [vmem:[%s11374_s1 + $0xac] ss:$16 sps:$4 sm:$0xff]   ;;  %v7494_v22 = vld [vmem:[%s11374_s1 + $0xa0] ss:$16 sps:$4 sm:$0xff]   ;;  %v7495_v23 = vld [vmem:[%s11374_s1 + $0xa8] ss:$16 sps:$4 sm:$0xff]  }
   0x9   :  { %v7496_v24 = vld [vmem:[%s11374_s1 + $0xc4] ss:$16 sps:$4 sm:$0xff]   ;;  %v7498_v25 = vld [vmem:[%s11374_s1 + $0xcc] ss:$16 sps:$4 sm:$0xff]   ;;  %v7500_v26 = vld [vmem:[%s11374_s1 + $0xc0] ss:$16 sps:$4 sm:$0xff]  }
   0xa   :  { %v7501_v27 = vld [vmem:[%s11374_s1 + $0xc8] ss:$16 sps:$4 sm:$0xff]   ;;  %v7502_v28 = vld [vmem:[%s11374_s1 + $0xe4] ss:$16 sps:$4 sm:$0xff]   ;;  %v7504_v29 = vld [vmem:[%s11374_s1 + $0xec] ss:$16 sps:$4 sm:$0xff]  }
   0xb   :  { %4956 = vmatpush1.bf16.msra.mxu0 %v7476_v10  ;;  %5489 = vmatpush1.bf16.msra.mxu1 %v7477_v11  ;;  %v7506_v30 = vld [vmem:[%s11374_s1 + $0xe0] ss:$16 sps:$4 sm:$0xff]   ;;  %v7507_v31 = vld [vmem:[%s11374_s1 + $0xe8] ss:$16 sps:$4 sm:$0xff]   ;;  %v7508_v32 = vld [vmem:[%s11374_s1 + $0x104] ss:$16 sps:$4 sm:$0xff]  }
   0xc   :  { %4957 = vmatprep.subr.bf16.mxu0 %v7478_v12  ;;  %5490 = vmatprep.subr.bf16.mxu1 %v7480_v13  ;;  %v7510_v33 = vld [vmem:[%s11374_s1 + $0x10c] ss:$16 sps:$4 sm:$0xff]   ;;  %v7512_v34 = vld [vmem:[%s11374_s1 + $0x100] ss:$16 sps:$4 sm:$0xff]   ;;  %v7513_v35 = vld [vmem:[%s11374_s1 + $0x108] ss:$16 sps:$4 sm:$0xff]  }
   0xd   :  { %v7514_v39 = vld [vmem:[%s11374_s1 + $0x124] ss:$16 sps:$4 sm:$0xff]   ;;  %v7516_v40 = vld [vmem:[%s11374_s1 + $0x12c] ss:$16 sps:$4 sm:$0xff]   ;;  %v7518_v41 = vld [vmem:[%s11374_s1 + $0x120] ss:$16 sps:$4 sm:$0xff]  }
   0xe   :  { %v8863_v42 = vshrl.u32 %v818_v36, 7  ;;  %v7519_v44 = vld [vmem:[%s11374_s1 + $0x128] ss:$16 sps:$4 sm:$0xff]   ;;  %v7520_v45 = vld [vmem:[%s11374_s1 + $0x144] ss:$16 sps:$4 sm:$0xff]  }
   0xf   :  { %4958 = vmatpush1.bf16.msra.mxu0 %v7482_v14  ;;  %5491 = vmatpush1.bf16.msra.mxu1 %v7483_v15  ;;  %v7522_v46 = vld [vmem:[%s11374_s1 + $0x14c] ss:$16 sps:$4 sm:$0xff]   ;;  %v7524_v47 = vld [vmem:[%s11374_s1 + $0x140] ss:$16 sps:$4 sm:$0xff]   ;;  %v7525_v48 = vld [vmem:[%s11374_s1 + $0x148] ss:$16 sps:$4 sm:$0xff]  }
  0x10   :  { %4959 = vmatprep.subr.bf16.mxu0 %v7484_v16  ;;  %5492 = vmatprep.subr.bf16.mxu1 %v7486_v17  ;;  %v8881_v49 = vsub.s32 %v845_v43, %v8863_v42  ;;  %v7526_v50 = vld [vmem:[%s11374_s1 + $0x164] ss:$16 sps:$4 sm:$0xff]   ;;  %v7528_v51 = vld [vmem:[%s11374_s1 + $0x16c] ss:$16 sps:$4 sm:$0xff]   ;;  %v7530_v53 = vld [vmem:[%s11374_s1 + $0x160] ss:$16 sps:$4 sm:$0xff]  }
  0x11   :  { %v8892_v52 = vld [vmem:[%s11373_s0] sm:$0xff]  ;;  %v7531_v55 = vld [vmem:[%s11374_s1 + $0x168] ss:$16 sps:$4 sm:$0xff]   ;;  %v7534_v57 = vld [vmem:[%s11374_s1 + $0x18c] ss:$16 sps:$4 sm:$0xff]  }
  0x12   :  { %v849_v54 = vrot.slane %v8892_v52, %v8881_v49  ;;  %v7532_v56 = vld [vmem:[%s11374_s1 + $0x184] ss:$16 sps:$4 sm:$0xff]   ;;  %v7536_v59 = vld [vmem:[%s11374_s1 + $0x180] ss:$16 sps:$4 sm:$0xff]   ;;  %v7537_v61 = vld [vmem:[%s11374_s1 + $0x188] ss:$16 sps:$4 sm:$0xff]  }
  0x13   :  { %4960 = vmatpush1.bf16.msra.mxu0 %v7488_v18  ;;  %5493 = vmatpush1.bf16.msra.mxu1 %v7489_v19  ;;  %v7538_v62 = vld [vmem:[%s11374_s1 + $0x1a4] ss:$16 sps:$4 sm:$0xff]   ;;  %v7540_v63 = vld [vmem:[%s11374_s1 + $0x1ac] ss:$16 sps:$4 sm:$0xff]   ;;  %v7542_v0 = vld [vmem:[%s11374_s1 + $0x1a0] ss:$16 sps:$4 sm:$0xff]  }
  0x14   :  { %4961 = vmatprep.subr.bf16.mxu0 %v7490_v20  ;;  %5494 = vmatprep.subr.bf16.mxu1 %v7492_v21  ;;  %v857_v58 = vcombine.high %v849_v54, %v849_v54  ;;  %v7543_v1 = vld [vmem:[%s11374_s1 + $0x1a8] ss:$16 sps:$4 sm:$0xff]   ;;  %v7544_v2 = vld [vmem:[%s11374_s1 + $0x1c4] ss:$16 sps:$4 sm:$0xff]   ;;  %v7546_v3 = vld [vmem:[%s11374_s1 + $0x1cc] ss:$16 sps:$4 sm:$0xff]   ;;  %v8961_v13 = vrot.slane %v849_v54, %v8881_v49 }
  0x15   :  { %v7548_v4 = vld [vmem:[%s11374_s1 + $0x1c0] ss:$16 sps:$4 sm:$0xff]   ;;  %v7549_v5 = vld [vmem:[%s11374_s1 + $0x1c8] ss:$16 sps:$4 sm:$0xff]   ;;  %v7550_v6 = vld [vmem:[%s11374_s1 + $0x1e4] ss:$16 sps:$4 sm:$0xff]  }
  0x16   :  { %v879_v60 = vrot.slane %v857_v58, %v8881_v49  ;;  %v7552_v7 = vld [vmem:[%s11374_s1 + $0x1ec] ss:$16 sps:$4 sm:$0xff]   ;;  %v7554_v8 = vld [vmem:[%s11374_s1 + $0x1e0] ss:$16 sps:$4 sm:$0xff]   ;;  %v7555_v9 = vld [vmem:[%s11374_s1 + $0x1e8] ss:$16 sps:$4 sm:$0xff]  }
  0x17   :  { %4962 = vmatpush1.bf16.msra.mxu0 %v7494_v22  ;;  %5495 = vmatpush1.bf16.msra.mxu1 %v7495_v23  ;;  %v7558_v10 = vld [vmem:[%s11374_s1 + $0x204] ss:$16 sps:$4 sm:$0xff]   ;;  %v7561_v11 = vld [vmem:[%s11374_s1 + $0x20c] ss:$16 sps:$4 sm:$0xff]   ;;  %v7556_v12 = vld [vmem:[%s11374_s1 + $0x200] ss:$16 sps:$4 sm:$0xff]  }
  0x18   :  { %4963 = vmatprep.subr.bf16.mxu0 %v7496_v24  ;;  %5496 = vmatprep.subr.bf16.mxu1 %v7498_v25  ;;  %v7559_v14 = vld [vmem:[%s11374_s1 + $0x208] ss:$16 sps:$4 sm:$0xff]   ;;  %v7564_v15 = vld [vmem:[%s11374_s1 + $0x224] ss:$16 sps:$4 sm:$0xff]   ;;  %v7567_v16 = vld [vmem:[%s11374_s1 + $0x22c] ss:$16 sps:$4 sm:$0xff]   ;;  %v889_v17 = vcombine.high %v879_v60, %v879_v60 }
  0x19   :  { %4983 = vmatprep.mubr.bf16.mxu0 %v879_v60  ;;  %5516 = vmatprep.mubr.bf16.mxu1 %v879_v60  ;;  %v7562_v18 = vld [vmem:[%s11374_s1 + $0x220] ss:$16 sps:$4 sm:$0xff]   ;;  %v7565_v19 = vld [vmem:[%s11374_s1 + $0x228] ss:$16 sps:$4 sm:$0xff]   ;;  %v7570_v20 = vld [vmem:[%s11374_s1 + $0x244] ss:$16 sps:$4 sm:$0xff]  }
  0x1a   :  { %v7573_v21 = vld [vmem:[%s11374_s1 + $0x24c] ss:$16 sps:$4 sm:$0xff]   ;;  %v7568_v22 = vld [vmem:[%s11374_s1 + $0x240] ss:$16 sps:$4 sm:$0xff]   ;;  %v7571_v23 = vld [vmem:[%s11374_s1 + $0x248] ss:$16 sps:$4 sm:$0xff]  }
  0x1b   :  { %4964 = vmatpush1.bf16.msra.mxu0 %v7500_v26  ;;  %5497 = vmatpush1.bf16.msra.mxu1 %v7501_v27  ;;  %v7576_v24 = vld [vmem:[%s11374_s1 + $0x264] ss:$16 sps:$4 sm:$0xff]   ;;  %v7579_v25 = vld [vmem:[%s11374_s1 + $0x26c] ss:$16 sps:$4 sm:$0xff]   ;;  %v7574_v26 = vld [vmem:[%s11374_s1 + $0x260] ss:$16 sps:$4 sm:$0xff]  }
  0x1c   :  { %4965 = vmatprep.subr.bf16.mxu0 %v7502_v28  ;;  %5498 = vmatprep.subr.bf16.mxu1 %v7504_v29  ;;  %v7577_v27 = vld [vmem:[%s11374_s1 + $0x268] ss:$16 sps:$4 sm:$0xff]   ;;  %v7582_v28 = vld [vmem:[%s11374_s1 + $0x284] ss:$16 sps:$4 sm:$0xff]   ;;  %v7585_v29 = vld [vmem:[%s11374_s1 + $0x28c] ss:$16 sps:$4 sm:$0xff]  }
  0x1d   :  { %v7594_v36 = vld [vmem:[%s11374_s1 + $0x2c4] ss:$16 sps:$4 sm:$0xff]   ;;  %v7597_v37 = vld [vmem:[%s11374_s1 + $0x2cc] ss:$16 sps:$4 sm:$0xff]   ;;  %v7592_v38 = vld [vmem:[%s11374_s1 + $0x2c0] ss:$16 sps:$4 sm:$0xff]  }
  0x1e   :  { %v7598_v43 = vld [vmem:[%s11374_s1 + $0x2e0] ss:$16 sps:$4 sm:$0xff]   ;;  %v7613_v54 = vld [vmem:[%s11374_s1 + $0x328] ss:$16 sps:$4 sm:$0xff]   ;;  %v7627_v60 = vld [vmem:[%s11374_s1 + $0x36c] ss:$16 sps:$4 sm:$0xff]  }
  0x1f   :  { %4966 = vmatpush1.bf16.msra.mxu0 %v7506_v30  ;;  %5499 = vmatpush1.bf16.msra.mxu1 %v7507_v31  ;;  %v7580_v30 = vld [vmem:[%s11374_s1 + $0x280] ss:$16 sps:$4 sm:$0xff]   ;;  %v7583_v31 = vld [vmem:[%s11374_s1 + $0x288] ss:$16 sps:$4 sm:$0xff]  }
  0x20   :  { %4967 = vmatprep.subr.bf16.mxu0 %v7508_v32  ;;  %5500 = vmatprep.subr.bf16.mxu1 %v7510_v33  ;;  %v7588_v32 = vld [vmem:[%s11374_s1 + $0x2a4] ss:$16 sps:$4 sm:$0xff]   ;;  %v7591_v33 = vld [vmem:[%s11374_s1 + $0x2ac] ss:$16 sps:$4 sm:$0xff]   ;;  %v7619_v58 = vld [vmem:[%s11374_s1 + $0x348] ss:$16 sps:$4 sm:$0xff]  }
  0x23   :  { %4968 = vmatpush1.bf16.msra.mxu0 %v7512_v34  ;;  %5501 = vmatpush1.bf16.msra.mxu1 %v7513_v35  ;;  %v7586_v34 = vld [vmem:[%s11374_s1 + $0x2a0] ss:$16 sps:$4 sm:$0xff]   ;;  %v7589_v35 = vld [vmem:[%s11374_s1 + $0x2a8] ss:$16 sps:$4 sm:$0xff]  }
  0x24   :  { %4969 = vmatprep.subr.bf16.mxu0 %v7514_v39  ;;  %5502 = vmatprep.subr.bf16.mxu1 %v7516_v40  ;;  %v7595_v39 = vld [vmem:[%s11374_s1 + $0x2c8] ss:$16 sps:$4 sm:$0xff]   ;;  %v7600_v40 = vld [vmem:[%s11374_s1 + $0x2e4] ss:$16 sps:$4 sm:$0xff]  }
  0x27   :  { %4970 = vmatpush1.bf16.msra.mxu0 %v7518_v41  ;;  %5503 = vmatpush1.bf16.msra.mxu1 %v7519_v44  ;;  %v7603_v41 = vld [vmem:[%s11374_s1 + $0x2ec] ss:$16 sps:$4 sm:$0xff]   ;;  %v7601_v44 = vld [vmem:[%s11374_s1 + $0x2e8] ss:$16 sps:$4 sm:$0xff]  }
  0x28   :  { %4971 = vmatprep.subr.bf16.mxu0 %v7520_v45  ;;  %5504 = vmatprep.subr.bf16.mxu1 %v7522_v46  ;;  %v7606_v45 = vld [vmem:[%s11374_s1 + $0x304] ss:$16 sps:$4 sm:$0xff]   ;;  %v7609_v46 = vld [vmem:[%s11374_s1 + $0x30c] ss:$16 sps:$4 sm:$0xff]  }
  0x2b   :  { %4972 = vmatpush1.bf16.msra.mxu0 %v7524_v47  ;;  %5505 = vmatpush1.bf16.msra.mxu1 %v7525_v48  ;;  %v7604_v47 = vld [vmem:[%s11374_s1 + $0x300] ss:$16 sps:$4 sm:$0xff]   ;;  %v7607_v48 = vld [vmem:[%s11374_s1 + $0x308] ss:$16 sps:$4 sm:$0xff]  }
  0x2c   :  { %4973 = vmatprep.subr.bf16.mxu0 %v7526_v50  ;;  %5506 = vmatprep.subr.bf16.mxu1 %v7528_v51  ;;  %v7612_v50 = vld [vmem:[%s11374_s1 + $0x324] ss:$16 sps:$4 sm:$0xff]   ;;  %v7615_v51 = vld [vmem:[%s11374_s1 + $0x32c] ss:$16 sps:$4 sm:$0xff]  }
  0x2f   :  { %4974 = vmatpush1.bf16.msra.mxu0 %v7530_v53  ;;  %5507 = vmatpush1.bf16.msra.mxu1 %v7531_v55  ;;  %v7610_v53 = vld [vmem:[%s11374_s1 + $0x320] ss:$16 sps:$4 sm:$0xff]   ;;  %v7618_v55 = vld [vmem:[%s11374_s1 + $0x344] ss:$16 sps:$4 sm:$0xff]  }
  0x30   :  { %4975 = vmatprep.subr.bf16.mxu0 %v7532_v56  ;;  %5508 = vmatprep.subr.bf16.mxu1 %v7534_v57  ;;  %v7621_v56 = vld [vmem:[%s11374_s1 + $0x34c] ss:$16 sps:$4 sm:$0xff]   ;;  %v7616_v57 = vld [vmem:[%s11374_s1 + $0x340] ss:$16 sps:$4 sm:$0xff]  }
  0x33   :  { %4976 = vmatpush1.bf16.msra.mxu0 %v7536_v59  ;;  %5509 = vmatpush1.bf16.msra.mxu1 %v7537_v61  ;;  %v7624_v59 = vld [vmem:[%s11374_s1 + $0x364] ss:$16 sps:$4 sm:$0xff]   ;;  %v7622_v61 = vld [vmem:[%s11374_s1 + $0x360] ss:$16 sps:$4 sm:$0xff]  }
  0x34   :  { %4977 = vmatprep.subr.bf16.mxu0 %v7538_v62  ;;  %5510 = vmatprep.subr.bf16.mxu1 %v7540_v63  ;;  %v7625_v62 = vld [vmem:[%s11374_s1 + $0x368] ss:$16 sps:$4 sm:$0xff]   ;;  %v7630_v63 = vld [vmem:[%s11374_s1 + $0x384] ss:$16 sps:$4 sm:$0xff]  }
  0x37   :  { %4978 = vmatpush1.bf16.msra.mxu0 %v7542_v0  ;;  %5511 = vmatpush1.bf16.msra.mxu1 %v7543_v1  ;;  %v7633_v0 = vld [vmem:[%s11374_s1 + $0x38c] ss:$16 sps:$4 sm:$0xff]   ;;  %v7628_v1 = vld [vmem:[%s11374_s1 + $0x380] ss:$16 sps:$4 sm:$0xff]  }
  0x38   :  { %4979 = vmatprep.subr.bf16.mxu0 %v7544_v2  ;;  %5512 = vmatprep.subr.bf16.mxu1 %v7546_v3  ;;  %v7631_v2 = vld [vmem:[%s11374_s1 + $0x388] ss:$16 sps:$4 sm:$0xff]   ;;  %v7636_v3 = vld [vmem:[%s11374_s1 + $0x3a4] ss:$16 sps:$4 sm:$0xff]  }
  0x3b   :  { %4980 = vmatpush1.bf16.msra.mxu0 %v7548_v4  ;;  %5513 = vmatpush1.bf16.msra.mxu1 %v7549_v5  ;;  %v7639_v4 = vld [vmem:[%s11374_s1 + $0x3ac] ss:$16 sps:$4 sm:$0xff]   ;;  %v7634_v5 = vld [vmem:[%s11374_s1 + $0x3a0] ss:$16 sps:$4 sm:$0xff]  }
  0x3c   :  { %4981 = vmatprep.subr.bf16.mxu0 %v7550_v6  ;;  %5514 = vmatprep.subr.bf16.mxu1 %v7552_v7  ;;  %v7637_v6 = vld [vmem:[%s11374_s1 + $0x3a8] ss:$16 sps:$4 sm:$0xff]   ;;  %v7642_v7 = vld [vmem:[%s11374_s1 + $0x3c4] ss:$16 sps:$4 sm:$0xff]  }
  0x3f   :  { %4982 = vmatpush1.bf16.msra.mxu0 %v7554_v8  ;;  %5515 = vmatpush1.bf16.msra.mxu1 %v7555_v9  ;;  %v7645_v8 = vld [vmem:[%s11374_s1 + $0x3cc] ss:$16 sps:$4 sm:$0xff]   ;;  %v842_v9 = vcombine.high %v8892_v52, %v8892_v52 }
  0x40   :  { %4992 = vmatprep.subr.bf16.mxu0 %v7558_v10  ;;  %5525 = vmatprep.subr.bf16.mxu1 %v7561_v11  ;;  %v7640_v10 = vld [vmem:[%s11374_s1 + $0x3c0] ss:$16 sps:$4 sm:$0xff]   ;;  %v7643_v11 = vld [vmem:[%s11374_s1 + $0x3c8] ss:$16 sps:$4 sm:$0xff]   ;;  %v7651_v52 = vld [vmem:[%s11374_s1 + $0x3ec] ss:$16 sps:$4 sm:$0xff]  }
  0x42   :  { %4984 = vmatmul.mubr.bf16.vlgmr.msra.gmra.mrb[0].mxu0 %v8961_v13  ;;  %5517 = vmatmul.mubr.bf16.vlgmr.msra.gmra.mrb[0].mxu1 %v8961_v13 }
  0x43   :  { %4993 = vmatpush1.bf16.msra.mxu0 %v7556_v12  ;;  %5526 = vmatpush1.bf16.msra.mxu1 %v7559_v14  ;;  %v7648_v12 = vld [vmem:[%s11374_s1 + $0x3e4] ss:$16 sps:$4 sm:$0xff]   ;;  %v9145_v14 = vrot.slane %v842_v9, %v8881_v49  ;;  %v7727_v9 = vld [vmem:[%s11374_s1 + $0x588] ss:$16 sps:$4 sm:$0xff]  }
  0x44   :  { %4994 = vmatprep.subr.bf16.mxu0 %v7564_v15  ;;  %5527 = vmatprep.subr.bf16.mxu1 %v7567_v16  ;;  %v7646_v15 = vld [vmem:[%s11374_s1 + $0x3e0] ss:$16 sps:$4 sm:$0xff]   ;;  %v7649_v16 = vld [vmem:[%s11374_s1 + $0x3e8] ss:$16 sps:$4 sm:$0xff]  }
  0x45   :  { %5024 = vmatprep.mubr.bf16.mxu0 %v889_v17  ;;  %5557 = vmatprep.mubr.bf16.mxu1 %v889_v17  ;;  %v7654_v17 = vld [vmem:[%s11374_s1 + $0x404] ss:$16 sps:$4 sm:$0xff]  }
  0x47   :  { %4995 = vmatpush1.bf16.msra.mxu0 %v7562_v18  ;;  %5528 = vmatpush1.bf16.msra.mxu1 %v7565_v19  ;;  %v7657_v18 = vld [vmem:[%s11374_s1 + $0x40c] ss:$16 sps:$4 sm:$0xff]   ;;  %v858_v19 = vcombine.high %v9145_v14, %v9145_v14 }
  0x48   :  { %4996 = vmatprep.subr.bf16.mxu0 %v7570_v20  ;;  %5529 = vmatprep.subr.bf16.mxu1 %v7573_v21  ;;  %v7652_v20 = vld [vmem:[%s11374_s1 + $0x400] ss:$16 sps:$4 sm:$0xff]   ;;  %v887_v21 = vcombine.high %v8961_v13, %v8961_v13 }
  0x49   :  { %v7658_v13 = vld [vmem:[%s11374_s1 + $0x420] ss:$16 sps:$4 sm:$0xff]  }
  0x4b   :  { %4997 = vmatpush1.bf16.msra.mxu0 %v7568_v22  ;;  %5530 = vmatpush1.bf16.msra.mxu1 %v7571_v23  ;;  %v7655_v22 = vld [vmem:[%s11374_s1 + $0x408] ss:$16 sps:$4 sm:$0xff]   ;;  %v7660_v23 = vld [vmem:[%s11374_s1 + $0x424] ss:$16 sps:$4 sm:$0xff]  }
  0x4c   :  { %4998 = vmatprep.subr.bf16.mxu0 %v7576_v24  ;;  %5531 = vmatprep.subr.bf16.mxu1 %v7579_v25  ;;  %v7663_v24 = vld [vmem:[%s11374_s1 + $0x42c] ss:$16 sps:$4 sm:$0xff]   ;;  %v9176_v25 = vrot.slane %v858_v19, %v8881_v49  ;;  %v7744_v19 = vld [vmem:[%s11374_s1 + $0x5e4] ss:$16 sps:$4 sm:$0xff]  }
  0x4f   :  { %4999 = vmatpush1.bf16.msra.mxu0 %v7574_v26  ;;  %5532 = vmatpush1.bf16.msra.mxu1 %v7577_v27  ;;  %v7661_v26 = vld [vmem:[%s11374_s1 + $0x428] ss:$16 sps:$4 sm:$0xff]   ;;  %v7666_v27 = vld [vmem:[%s11374_s1 + $0x444] ss:$16 sps:$4 sm:$0xff]  }
  0x50   :  { %5000 = vmatprep.subr.bf16.mxu0 %v7582_v28  ;;  %5533 = vmatprep.subr.bf16.mxu1 %v7585_v29  ;;  %v7669_v28 = vld [vmem:[%s11374_s1 + $0x44c] ss:$16 sps:$4 sm:$0xff]   ;;  %v7664_v29 = vld [vmem:[%s11374_s1 + $0x440] ss:$16 sps:$4 sm:$0xff]  }
  0x53   :  { %5001 = vmatpush1.bf16.msra.mxu0 %v7580_v30  ;;  %5534 = vmatpush1.bf16.msra.mxu1 %v7583_v31  ;;  %v7667_v30 = vld [vmem:[%s11374_s1 + $0x448] ss:$16 sps:$4 sm:$0xff]   ;;  %v7672_v31 = vld [vmem:[%s11374_s1 + $0x464] ss:$16 sps:$4 sm:$0xff]  }
  0x54   :  { %5002 = vmatprep.subr.bf16.mxu0 %v7588_v32  ;;  %5535 = vmatprep.subr.bf16.mxu1 %v7591_v33  ;;  %v7675_v32 = vld [vmem:[%s11374_s1 + $0x46c] ss:$16 sps:$4 sm:$0xff]   ;;  %v7670_v33 = vld [vmem:[%s11374_s1 + $0x460] ss:$16 sps:$4 sm:$0xff]  }
  0x57   :  { %5003 = vmatpush1.bf16.msra.mxu0 %v7586_v34  ;;  %5536 = vmatpush1.bf16.msra.mxu1 %v7589_v35  ;;  %v7673_v34 = vld [vmem:[%s11374_s1 + $0x468] ss:$16 sps:$4 sm:$0xff]   ;;  %v7678_v35 = vld [vmem:[%s11374_s1 + $0x484] ss:$16 sps:$4 sm:$0xff]  }
  0x58   :  { %5004 = vmatprep.subr.bf16.mxu0 %v7594_v36  ;;  %5537 = vmatprep.subr.bf16.mxu1 %v7597_v37  ;;  %v7681_v36 = vld [vmem:[%s11374_s1 + $0x48c] ss:$16 sps:$4 sm:$0xff]   ;;  %v7676_v37 = vld [vmem:[%s11374_s1 + $0x480] ss:$16 sps:$4 sm:$0xff]  }
  0x5b   :  { %5005 = vmatpush1.bf16.msra.mxu0 %v7592_v38  ;;  %5538 = vmatpush1.bf16.msra.mxu1 %v7595_v39  ;;  %v7679_v38 = vld [vmem:[%s11374_s1 + $0x488] ss:$16 sps:$4 sm:$0xff]   ;;  %v7684_v39 = vld [vmem:[%s11374_s1 + $0x4a4] ss:$16 sps:$4 sm:$0xff]  }
  0x5c   :  { %5006 = vmatprep.subr.bf16.mxu0 %v7600_v40  ;;  %5539 = vmatprep.subr.bf16.mxu1 %v7603_v41  ;;  %v7687_v40 = vld [vmem:[%s11374_s1 + $0x4ac] ss:$16 sps:$4 sm:$0xff]   ;;  %v7682_v41 = vld [vmem:[%s11374_s1 + $0x4a0] ss:$16 sps:$4 sm:$0xff]  }
  0x5f   :  { %5007 = vmatpush1.bf16.msra.mxu0 %v7598_v43  ;;  %5540 = vmatpush1.bf16.msra.mxu1 %v7601_v44  ;;  %v7685_v43 = vld [vmem:[%s11374_s1 + $0x4a8] ss:$16 sps:$4 sm:$0xff]   ;;  %v7690_v44 = vld [vmem:[%s11374_s1 + $0x4c4] ss:$16 sps:$4 sm:$0xff]  }
  0x60   :  { %5008 = vmatprep.subr.bf16.mxu0 %v7606_v45  ;;  %5541 = vmatprep.subr.bf16.mxu1 %v7609_v46  ;;  %v7693_v45 = vld [vmem:[%s11374_s1 + $0x4cc] ss:$16 sps:$4 sm:$0xff]   ;;  %v7688_v46 = vld [vmem:[%s11374_s1 + $0x4c0] ss:$16 sps:$4 sm:$0xff]  }
  0x63   :  { %5009 = vmatpush1.bf16.msra.mxu0 %v7604_v47  ;;  %5542 = vmatpush1.bf16.msra.mxu1 %v7607_v48  ;;  %v7691_v47 = vld [vmem:[%s11374_s1 + $0x4c8] ss:$16 sps:$4 sm:$0xff]   ;;  %v7696_v48 = vld [vmem:[%s11374_s1 + $0x4e4] ss:$16 sps:$4 sm:$0xff]  }
  0x64   :  { %5010 = vmatprep.subr.bf16.mxu0 %v7612_v50  ;;  %5543 = vmatprep.subr.bf16.mxu1 %v7615_v51  ;;  %v7699_v50 = vld [vmem:[%s11374_s1 + $0x4ec] ss:$16 sps:$4 sm:$0xff]   ;;  %v7694_v51 = vld [vmem:[%s11374_s1 + $0x4e0] ss:$16 sps:$4 sm:$0xff]  }
  0x67   :  { %5011 = vmatpush1.bf16.msra.mxu0 %v7610_v53  ;;  %5544 = vmatpush1.bf16.msra.mxu1 %v7613_v54  ;;  %v7697_v53 = vld [vmem:[%s11374_s1 + $0x4e8] ss:$16 sps:$4 sm:$0xff]   ;;  %v7702_v54 = vld [vmem:[%s11374_s1 + $0x504] ss:$16 sps:$4 sm:$0xff]  }
  0x68   :  { %5012 = vmatprep.subr.bf16.mxu0 %v7618_v55  ;;  %5545 = vmatprep.subr.bf16.mxu1 %v7621_v56  ;;  %v7705_v55 = vld [vmem:[%s11374_s1 + $0x50c] ss:$16 sps:$4 sm:$0xff]   ;;  %v7700_v56 = vld [vmem:[%s11374_s1 + $0x500] ss:$16 sps:$4 sm:$0xff]  }
  0x6b   :  { %5013 = vmatpush1.bf16.msra.mxu0 %v7616_v57  ;;  %5546 = vmatpush1.bf16.msra.mxu1 %v7619_v58  ;;  %v7703_v57 = vld [vmem:[%s11374_s1 + $0x508] ss:$16 sps:$4 sm:$0xff]   ;;  %v7708_v58 = vld [vmem:[%s11374_s1 + $0x524] ss:$16 sps:$4 sm:$0xff]  }
  0x6c   :  { %5014 = vmatprep.subr.bf16.mxu0 %v7624_v59  ;;  %5547 = vmatprep.subr.bf16.mxu1 %v7627_v60  ;;  %v7711_v59 = vld [vmem:[%s11374_s1 + $0x52c] ss:$16 sps:$4 sm:$0xff]   ;;  %v7706_v60 = vld [vmem:[%s11374_s1 + $0x520] ss:$16 sps:$4 sm:$0xff]  }
  0x6f   :  { %5015 = vmatpush1.bf16.msra.mxu0 %v7622_v61  ;;  %5548 = vmatpush1.bf16.msra.mxu1 %v7625_v62  ;;  %v7709_v61 = vld [vmem:[%s11374_s1 + $0x528] ss:$16 sps:$4 sm:$0xff]   ;;  %v7714_v62 = vld [vmem:[%s11374_s1 + $0x544] ss:$16 sps:$4 sm:$0xff]  }
  0x70   :  { %5016 = vmatprep.subr.bf16.mxu0 %v7630_v63  ;;  %5549 = vmatprep.subr.bf16.mxu1 %v7633_v0  ;;  %v7717_v63 = vld [vmem:[%s11374_s1 + $0x54c] ss:$16 sps:$4 sm:$0xff]   ;;  %v7712_v0 = vld [vmem:[%s11374_s1 + $0x540] ss:$16 sps:$4 sm:$0xff]  }
  0x73   :  { %5017 = vmatpush1.bf16.msra.mxu0 %v7628_v1  ;;  %5550 = vmatpush1.bf16.msra.mxu1 %v7631_v2  ;;  %v7715_v1 = vld [vmem:[%s11374_s1 + $0x548] ss:$16 sps:$4 sm:$0xff]   ;;  %v7720_v2 = vld [vmem:[%s11374_s1 + $0x564] ss:$16 sps:$4 sm:$0xff]  }
  0x74   :  { %5018 = vmatprep.subr.bf16.mxu0 %v7636_v3  ;;  %5551 = vmatprep.subr.bf16.mxu1 %v7639_v4  ;;  %v7723_v3 = vld [vmem:[%s11374_s1 + $0x56c] ss:$16 sps:$4 sm:$0xff]   ;;  %v7718_v4 = vld [vmem:[%s11374_s1 + $0x560] ss:$16 sps:$4 sm:$0xff]  }
  0x77   :  { %5019 = vmatpush1.bf16.msra.mxu0 %v7634_v5  ;;  %5552 = vmatpush1.bf16.msra.mxu1 %v7637_v6  ;;  %v7721_v5 = vld [vmem:[%s11374_s1 + $0x568] ss:$16 sps:$4 sm:$0xff]   ;;  %v7726_v6 = vld [vmem:[%s11374_s1 + $0x584] ss:$16 sps:$4 sm:$0xff]  }
  0x78   :  { %5020 = vmatprep.subr.bf16.mxu0 %v7642_v7  ;;  %5553 = vmatprep.subr.bf16.mxu1 %v7645_v8  ;;  %v7729_v7 = vld [vmem:[%s11374_s1 + $0x58c] ss:$16 sps:$4 sm:$0xff]   ;;  %v7724_v8 = vld [vmem:[%s11374_s1 + $0x580] ss:$16 sps:$4 sm:$0xff]  }
  0x7b   :  { %5021 = vmatpush1.bf16.msra.mxu0 %v7640_v10  ;;  %5554 = vmatpush1.bf16.msra.mxu1 %v7643_v11  ;;  %v7732_v10 = vld [vmem:[%s11374_s1 + $0x5a4] ss:$16 sps:$4 sm:$0xff]   ;;  %v7735_v11 = vld [vmem:[%s11374_s1 + $0x5ac] ss:$16 sps:$4 sm:$0xff]  }
  0x7c   :  { %5022 = vmatprep.subr.bf16.mxu0 %v7648_v12  ;;  %5555 = vmatprep.subr.bf16.mxu1 %v7651_v52  ;;  %v7730_v12 = vld [vmem:[%s11374_s1 + $0x5a0] ss:$16 sps:$4 sm:$0xff]   ;;  %v7733_v52 = vld [vmem:[%s11374_s1 + $0x5a8] ss:$16 sps:$4 sm:$0xff]  }
  0x7f   :  { %5023 = vmatpush1.bf16.msra.mxu0 %v7646_v15  ;;  %5556 = vmatpush1.bf16.msra.mxu1 %v7649_v16  ;;  %v7738_v15 = vld [vmem:[%s11374_s1 + $0x5c4] ss:$16 sps:$4 sm:$0xff]   ;;  %v7741_v16 = vld [vmem:[%s11374_s1 + $0x5cc] ss:$16 sps:$4 sm:$0xff]  }
  0x80   :  { %5033 = vmatprep.subr.bf16.mxu0 %v7654_v17  ;;  %5566 = vmatprep.subr.bf16.mxu1 %v7657_v18  ;;  %v7736_v17 = vld [vmem:[%s11374_s1 + $0x5c0] ss:$16 sps:$4 sm:$0xff]   ;;  %v7739_v18 = vld [vmem:[%s11374_s1 + $0x5c8] ss:$16 sps:$4 sm:$0xff]  }
  0x82   :  { %5025 = vmatmul.mubr.bf16.vlgmr.msra.gmra.mrb[0].mxu0 %v887_v21  ;;  %5558 = vmatmul.mubr.bf16.vlgmr.msra.gmra.mrb[0].mxu1 %v887_v21  ;;  %v7742_v21 = vld [vmem:[%s11374_s1 + $0x5e0] ss:$16 sps:$4 sm:$0xff]  }
  0x83   :  { %5034 = vmatpush1.bf16.msra.mxu0 %v7652_v20  ;;  %5567 = vmatpush1.bf16.msra.mxu1 %v7655_v22  ;;  %v7747_v20 = vld [vmem:[%s11374_s1 + $0x5ec] ss:$16 sps:$4 sm:$0xff]   ;;  %v7745_v22 = vld [vmem:[%s11374_s1 + $0x5e8] ss:$16 sps:$4 sm:$0xff]  }
  0x84   :  { %5035 = vmatprep.subr.bf16.mxu0 %v7660_v23  ;;  %5568 = vmatprep.subr.bf16.mxu1 %v7663_v24  ;;  %v7751_v23 = vld [vmem:[%s11374_s1 + $0x604] ss:$16 sps:$4 sm:$0xff]   ;;  %v7754_v24 = vld [vmem:[%s11374_s1 + $0x60c] ss:$16 sps:$4 sm:$0xff]  }
  0x85   :  { %5065 = vmatprep.mubr.bf16.mxu0 %v9176_v25  ;;  %5598 = vmatprep.mubr.bf16.mxu1 %v9176_v25 }
  0x87   :  { %5036 = vmatpush1.bf16.msra.mxu0 %v7658_v13  ;;  %5569 = vmatpush1.bf16.msra.mxu1 %v7661_v26  ;;  %v7749_v13 = vld [vmem:[%s11374_s1 + $0x600] ss:$16 sps:$4 sm:$0xff]   ;;  %v9365_v26 = vrot.slane %v9145_v14, %v8881_v49  ;;  %v890_v14 = vcombine.high %v9176_v25, %v9176_v25  ;;  %v7763_v25 = vld [vmem:[%s11374_s1 + $0x644] ss:$16 sps:$4 sm:$0xff]  }
  0x88   :  { %5037 = vmatprep.subr.bf16.mxu0 %v7666_v27  ;;  %5570 = vmatprep.subr.bf16.mxu1 %v7669_v28  ;;  %v7752_v27 = vld [vmem:[%s11374_s1 + $0x608] ss:$16 sps:$4 sm:$0xff]   ;;  %v7757_v28 = vld [vmem:[%s11374_s1 + $0x624] ss:$16 sps:$4 sm:$0xff]  }
  0x8b   :  { %5038 = vmatpush1.bf16.msra.mxu0 %v7664_v29  ;;  %5571 = vmatpush1.bf16.msra.mxu1 %v7667_v30  ;;  %v7760_v29 = vld [vmem:[%s11374_s1 + $0x62c] ss:$16 sps:$4 sm:$0xff]   ;;  %v7755_v30 = vld [vmem:[%s11374_s1 + $0x620] ss:$16 sps:$4 sm:$0xff]  }
  0x8c   :  { %5039 = vmatprep.subr.bf16.mxu0 %v7672_v31  ;;  %5572 = vmatprep.subr.bf16.mxu1 %v7675_v32  ;;  %v7758_v31 = vld [vmem:[%s11374_s1 + $0x628] ss:$16 sps:$4 sm:$0xff]   ;;  %v7766_v32 = vld [vmem:[%s11374_s1 + $0x64c] ss:$16 sps:$4 sm:$0xff]  }
  0x8f   :  { %5040 = vmatpush1.bf16.msra.mxu0 %v7670_v33  ;;  %5573 = vmatpush1.bf16.msra.mxu1 %v7673_v34  ;;  %v7761_v33 = vld [vmem:[%s11374_s1 + $0x640] ss:$16 sps:$4 sm:$0xff]   ;;  %v7764_v34 = vld [vmem:[%s11374_s1 + $0x648] ss:$16 sps:$4 sm:$0xff]  }
  0x90   :  { %5041 = vmatprep.subr.bf16.mxu0 %v7678_v35  ;;  %5574 = vmatprep.subr.bf16.mxu1 %v7681_v36  ;;  %v7769_v35 = vld [vmem:[%s11374_s1 + $0x664] ss:$16 sps:$4 sm:$0xff]   ;;  %v7772_v36 = vld [vmem:[%s11374_s1 + $0x66c] ss:$16 sps:$4 sm:$0xff]  }
  0x93   :  { %5042 = vmatpush1.bf16.msra.mxu0 %v7676_v37  ;;  %5575 = vmatpush1.bf16.msra.mxu1 %v7679_v38  ;;  %v7767_v37 = vld [vmem:[%s11374_s1 + $0x660] ss:$16 sps:$4 sm:$0xff]   ;;  %v7770_v38 = vld [vmem:[%s11374_s1 + $0x668] ss:$16 sps:$4 sm:$0xff]  }
  0x94   :  { %5043 = vmatprep.subr.bf16.mxu0 %v7684_v39  ;;  %5576 = vmatprep.subr.bf16.mxu1 %v7687_v40  ;;  %v7775_v39 = vld [vmem:[%s11374_s1 + $0x684] ss:$16 sps:$4 sm:$0xff]   ;;  %v7778_v40 = vld [vmem:[%s11374_s1 + $0x68c] ss:$16 sps:$4 sm:$0xff]  }
  0x97   :  { %5044 = vmatpush1.bf16.msra.mxu0 %v7682_v41  ;;  %5577 = vmatpush1.bf16.msra.mxu1 %v7685_v43  ;;  %v7773_v41 = vld [vmem:[%s11374_s1 + $0x680] ss:$16 sps:$4 sm:$0xff]   ;;  %v7776_v43 = vld [vmem:[%s11374_s1 + $0x688] ss:$16 sps:$4 sm:$0xff]  }
  0x98   :  { %5045 = vmatprep.subr.bf16.mxu0 %v7690_v44  ;;  %5578 = vmatprep.subr.bf16.mxu1 %v7693_v45  ;;  %v7781_v44 = vld [vmem:[%s11374_s1 + $0x6a4] ss:$16 sps:$4 sm:$0xff]   ;;  %v7784_v45 = vld [vmem:[%s11374_s1 + $0x6ac] ss:$16 sps:$4 sm:$0xff]  }
  0x9b   :  { %5046 = vmatpush1.bf16.msra.mxu0 %v7688_v46  ;;  %5579 = vmatpush1.bf16.msra.mxu1 %v7691_v47  ;;  %v7779_v46 = vld [vmem:[%s11374_s1 + $0x6a0] ss:$16 sps:$4 sm:$0xff]   ;;  %v7782_v47 = vld [vmem:[%s11374_s1 + $0x6a8] ss:$16 sps:$4 sm:$0xff]  }
  0x9c   :  { %5047 = vmatprep.subr.bf16.mxu0 %v7696_v48  ;;  %5580 = vmatprep.subr.bf16.mxu1 %v7699_v50  ;;  %v7787_v48 = vld [vmem:[%s11374_s1 + $0x6c4] ss:$16 sps:$4 sm:$0xff]   ;;  %v7790_v50 = vld [vmem:[%s11374_s1 + $0x6cc] ss:$16 sps:$4 sm:$0xff]  }
  0x9f   :  { %5048 = vmatpush1.bf16.msra.mxu0 %v7694_v51  ;;  %5581 = vmatpush1.bf16.msra.mxu1 %v7697_v53  ;;  %v7785_v51 = vld [vmem:[%s11374_s1 + $0x6c0] ss:$16 sps:$4 sm:$0xff]   ;;  %v7788_v53 = vld [vmem:[%s11374_s1 + $0x6c8] ss:$16 sps:$4 sm:$0xff]  }
  0xa0   :  { %5049 = vmatprep.subr.bf16.mxu0 %v7702_v54  ;;  %5582 = vmatprep.subr.bf16.mxu1 %v7705_v55  ;;  %v7793_v54 = vld [vmem:[%s11374_s1 + $0x6e4] ss:$16 sps:$4 sm:$0xff]   ;;  %v7796_v55 = vld [vmem:[%s11374_s1 + $0x6ec] ss:$16 sps:$4 sm:$0xff]  }
  0xa3   :  { %5050 = vmatpush1.bf16.msra.mxu0 %v7700_v56  ;;  %5583 = vmatpush1.bf16.msra.mxu1 %v7703_v57  ;;  %v7791_v56 = vld [vmem:[%s11374_s1 + $0x6e0] ss:$16 sps:$4 sm:$0xff]   ;;  %v7794_v57 = vld [vmem:[%s11374_s1 + $0x6e8] ss:$16 sps:$4 sm:$0xff]  }
  0xa4   :  { %5051 = vmatprep.subr.bf16.mxu0 %v7708_v58  ;;  %5584 = vmatprep.subr.bf16.mxu1 %v7711_v59  ;;  %v7799_v58 = vld [vmem:[%s11374_s1 + $0x704] ss:$16 sps:$4 sm:$0xff]   ;;  %v7802_v59 = vld [vmem:[%s11374_s1 + $0x70c] ss:$16 sps:$4 sm:$0xff]  }
  0xa7   :  { %5052 = vmatpush1.bf16.msra.mxu0 %v7706_v60  ;;  %5585 = vmatpush1.bf16.msra.mxu1 %v7709_v61  ;;  %v7797_v60 = vld [vmem:[%s11374_s1 + $0x700] ss:$16 sps:$4 sm:$0xff]   ;;  %v7800_v61 = vld [vmem:[%s11374_s1 + $0x708] ss:$16 sps:$4 sm:$0xff]  }
  0xa8   :  { %5053 = vmatprep.subr.bf16.mxu0 %v7714_v62  ;;  %5586 = vmatprep.subr.bf16.mxu1 %v7717_v63  ;;  %v7805_v62 = vld [vmem:[%s11374_s1 + $0x724] ss:$16 sps:$4 sm:$0xff]   ;;  %v7808_v63 = vld [vmem:[%s11374_s1 + $0x72c] ss:$16 sps:$4 sm:$0xff]  }
  0xab   :  { %5054 = vmatpush1.bf16.msra.mxu0 %v7712_v0  ;;  %5587 = vmatpush1.bf16.msra.mxu1 %v7715_v1  ;;  %v7803_v0 = vld [vmem:[%s11374_s1 + $0x720] ss:$16 sps:$4 sm:$0xff]   ;;  %v7806_v1 = vld [vmem:[%s11374_s1 + $0x728] ss:$16 sps:$4 sm:$0xff]  }
  0xac   :  { %5055 = vmatprep.subr.bf16.mxu0 %v7720_v2  ;;  %5588 = vmatprep.subr.bf16.mxu1 %v7723_v3  ;;  %v7811_v2 = vld [vmem:[%s11374_s1 + $0x744] ss:$16 sps:$4 sm:$0xff]   ;;  %v7814_v3 = vld [vmem:[%s11374_s1 + $0x74c] ss:$16 sps:$4 sm:$0xff]  }
  0xaf   :  { %5056 = vmatpush1.bf16.msra.mxu0 %v7718_v4  ;;  %5589 = vmatpush1.bf16.msra.mxu1 %v7721_v5  ;;  %v7809_v4 = vld [vmem:[%s11374_s1 + $0x740] ss:$16 sps:$4 sm:$0xff]   ;;  %v7812_v5 = vld [vmem:[%s11374_s1 + $0x748] ss:$16 sps:$4 sm:$0xff]  }
  0xb0   :  { %5057 = vmatprep.subr.bf16.mxu0 %v7726_v6  ;;  %5590 = vmatprep.subr.bf16.mxu1 %v7729_v7  ;;  %v7817_v6 = vld [vmem:[%s11374_s1 + $0x764] ss:$16 sps:$4 sm:$0xff]   ;;  %v7820_v7 = vld [vmem:[%s11374_s1 + $0x76c] ss:$16 sps:$4 sm:$0xff]  }
  0xb3   :  { %5058 = vmatpush1.bf16.msra.mxu0 %v7724_v8  ;;  %5591 = vmatpush1.bf16.msra.mxu1 %v7727_v9  ;;  %v7815_v8 = vld [vmem:[%s11374_s1 + $0x760] ss:$16 sps:$4 sm:$0xff]   ;;  %v7818_v9 = vld [vmem:[%s11374_s1 + $0x768] ss:$16 sps:$4 sm:$0xff]  }
  0xb4   :  { %5059 = vmatprep.subr.bf16.mxu0 %v7732_v10  ;;  %5592 = vmatprep.subr.bf16.mxu1 %v7735_v11  ;;  %v7823_v10 = vld [vmem:[%s11374_s1 + $0x784] ss:$16 sps:$4 sm:$0xff]   ;;  %v7826_v11 = vld [vmem:[%s11374_s1 + $0x78c] ss:$16 sps:$4 sm:$0xff]  }
  0xb7   :  { %5060 = vmatpush1.bf16.msra.mxu0 %v7730_v12  ;;  %5593 = vmatpush1.bf16.msra.mxu1 %v7733_v52  ;;  %v7821_v12 = vld [vmem:[%s11374_s1 + $0x780] ss:$16 sps:$4 sm:$0xff]   ;;  %v7824_v52 = vld [vmem:[%s11374_s1 + $0x788] ss:$16 sps:$4 sm:$0xff]  }
  0xb8   :  { %5061 = vmatprep.subr.bf16.mxu0 %v7738_v15  ;;  %5594 = vmatprep.subr.bf16.mxu1 %v7741_v16  ;;  %v7829_v15 = vld [vmem:[%s11374_s1 + $0x7a4] ss:$16 sps:$4 sm:$0xff]   ;;  %v7832_v16 = vld [vmem:[%s11374_s1 + $0x7ac] ss:$16 sps:$4 sm:$0xff]  }
  0xbb   :  { %5062 = vmatpush1.bf16.msra.mxu0 %v7736_v17  ;;  %5595 = vmatpush1.bf16.msra.mxu1 %v7739_v18  ;;  %v7827_v17 = vld [vmem:[%s11374_s1 + $0x7a0] ss:$16 sps:$4 sm:$0xff]   ;;  %v7830_v18 = vld [vmem:[%s11374_s1 + $0x7a8] ss:$16 sps:$4 sm:$0xff]  }
  0xbc   :  { %5063 = vmatprep.subr.bf16.mxu0 %v7744_v19  ;;  %5596 = vmatprep.subr.bf16.mxu1 %v7747_v20  ;;  %v7835_v19 = vld [vmem:[%s11374_s1 + $0x7c4] ss:$16 sps:$4 sm:$0xff]   ;;  %v7838_v20 = vld [vmem:[%s11374_s1 + $0x7cc] ss:$16 sps:$4 sm:$0xff]  }
  0xbf   :  { %5064 = vmatpush1.bf16.msra.mxu0 %v7742_v21  ;;  %5597 = vmatpush1.bf16.msra.mxu1 %v7745_v22  ;;  %v9539_v21 = vld.sshfl [vmem:[%s11373_s0 + $0x8] sm:$0xff pattern:$0x75316420]  ;;  %v7833_v22 = vld [vmem:[%s11374_s1 + $0x7c0] ss:$16 sps:$4 sm:$0xff]  }
  0xc0   :  { %5074 = vmatprep.subr.bf16.mxu0 %v7751_v23  ;;  %5607 = vmatprep.subr.bf16.mxu1 %v7754_v24  ;;  %v7836_v23 = vld [vmem:[%s11374_s1 + $0x7c8] ss:$16 sps:$4 sm:$0xff]   ;;  %v7841_v24 = vld [vmem:[%s11374_s1 + $0x7e4] ss:$16 sps:$4 sm:$0xff]  }
  0xc2   :  { %5066 = vmatmul.mubr.bf16.vlgmr.msra.gmra.mrb[0].mxu0 %v9365_v26  ;;  %5599 = vmatmul.mubr.bf16.vlgmr.msra.gmra.mrb[0].mxu1 %v9365_v26 }
  0xc3   :  { %5075 = vmatpush1.bf16.msra.mxu0 %v7749_v13  ;;  %5608 = vmatpush1.bf16.msra.mxu1 %v7752_v27  ;;  %v7844_v13 = vld [vmem:[%s11374_s1 + $0x7ec] ss:$16 sps:$4 sm:$0xff]   ;;  %v7839_v27 = vld [vmem:[%s11374_s1 + $0x7e0] ss:$16 sps:$4 sm:$0xff]  }
  0xc4   :  { %5076 = vmatprep.subr.bf16.mxu0 %v7757_v28  ;;  %5609 = vmatprep.subr.bf16.mxu1 %v7760_v29  ;;  %v7842_v28 = vld [vmem:[%s11374_s1 + $0x7e8] ss:$16 sps:$4 sm:$0xff]   ;;  %v7847_v29 = vld [vmem:[%s11374_s1 + $0x804] ss:$16 sps:$4 sm:$0xff]  }
  0xc5   :  { %5106 = vmatprep.mubr.bf16.mxu0 %v890_v14  ;;  %5639 = vmatprep.mubr.bf16.mxu1 %v890_v14  ;;  %v7850_v14 = vld [vmem:[%s11374_s1 + $0x80c] ss:$16 sps:$4 sm:$0xff]  }
  0xc7   :  { %5077 = vmatpush1.bf16.msra.mxu0 %v7755_v30  ;;  %5610 = vmatpush1.bf16.msra.mxu1 %v7758_v31  ;;  %v906_v30 = vcombine.high %v9539_v21, %v9539_v21  ;;  %v888_v31 = vcombine.high %v9365_v26, %v9365_v26  ;;  %v7856_v26 = vld [vmem:[%s11374_s1 + $0x82c] ss:$16 sps:$4 sm:$0xff]  }
  0xc8   :  { %5078 = vmatprep.subr.bf16.mxu0 %v7763_v25  ;;  %5611 = vmatprep.subr.bf16.mxu1 %v7766_v32  ;;  %v7845_v25 = vld [vmem:[%s11374_s1 + $0x800] ss:$16 sps:$4 sm:$0xff]   ;;  %v7848_v32 = vld [vmem:[%s11374_s1 + $0x808] ss:$16 sps:$4 sm:$0xff]  }
  0xcb   :  { %5079 = vmatpush1.bf16.msra.mxu0 %v7761_v33  ;;  %5612 = vmatpush1.bf16.msra.mxu1 %v7764_v34  ;;  %v7853_v33 = vld [vmem:[%s11374_s1 + $0x824] ss:$16 sps:$4 sm:$0xff]   ;;  %v9582_v34 = vrot.slane %v906_v30, %v8881_v49 }
  0xcc   :  { %5080 = vmatprep.subr.bf16.mxu0 %v7769_v35  ;;  %5613 = vmatprep.subr.bf16.mxu1 %v7772_v36  ;;  %v7851_v35 = vld [vmem:[%s11374_s1 + $0x820] ss:$16 sps:$4 sm:$0xff]   ;;  %v7854_v36 = vld [vmem:[%s11374_s1 + $0x828] ss:$16 sps:$4 sm:$0xff]   ;;  %v7937_v30 = vld [vmem:[%s11374_s1 + $0x9e4] ss:$16 sps:$4 sm:$0xff]  }
  0xcf   :  { %5081 = vmatpush1.bf16.msra.mxu0 %v7767_v37  ;;  %5614 = vmatpush1.bf16.msra.mxu1 %v7770_v38  ;;  %v7859_v37 = vld [vmem:[%s11374_s1 + $0x844] ss:$16 sps:$4 sm:$0xff]   ;;  %v7862_v38 = vld [vmem:[%s11374_s1 + $0x84c] ss:$16 sps:$4 sm:$0xff]  }
  0xd0   :  { %5082 = vmatprep.subr.bf16.mxu0 %v7775_v39  ;;  %5615 = vmatprep.subr.bf16.mxu1 %v7778_v40  ;;  %v7857_v39 = vld [vmem:[%s11374_s1 + $0x840] ss:$16 sps:$4 sm:$0xff]   ;;  %v7860_v40 = vld [vmem:[%s11374_s1 + $0x848] ss:$16 sps:$4 sm:$0xff]  }
  0xd3   :  { %5083 = vmatpush1.bf16.msra.mxu0 %v7773_v41  ;;  %5616 = vmatpush1.bf16.msra.mxu1 %v7776_v43  ;;  %v7865_v41 = vld [vmem:[%s11374_s1 + $0x864] ss:$16 sps:$4 sm:$0xff]   ;;  %v7868_v43 = vld [vmem:[%s11374_s1 + $0x86c] ss:$16 sps:$4 sm:$0xff]  }
  0xd4   :  { %5084 = vmatprep.subr.bf16.mxu0 %v7781_v44  ;;  %5617 = vmatprep.subr.bf16.mxu1 %v7784_v45  ;;  %v7863_v44 = vld [vmem:[%s11374_s1 + $0x860] ss:$16 sps:$4 sm:$0xff]   ;;  %v7866_v45 = vld [vmem:[%s11374_s1 + $0x868] ss:$16 sps:$4 sm:$0xff]  }
  0xd7   :  { %5085 = vmatpush1.bf16.msra.mxu0 %v7779_v46  ;;  %5618 = vmatpush1.bf16.msra.mxu1 %v7782_v47  ;;  %v7871_v46 = vld [vmem:[%s11374_s1 + $0x884] ss:$16 sps:$4 sm:$0xff]   ;;  %v7874_v47 = vld [vmem:[%s11374_s1 + $0x88c] ss:$16 sps:$4 sm:$0xff]  }
  0xd8   :  { %5086 = vmatprep.subr.bf16.mxu0 %v7787_v48  ;;  %5619 = vmatprep.subr.bf16.mxu1 %v7790_v50  ;;  %v7869_v48 = vld [vmem:[%s11374_s1 + $0x880] ss:$16 sps:$4 sm:$0xff]   ;;  %v7872_v50 = vld [vmem:[%s11374_s1 + $0x888] ss:$16 sps:$4 sm:$0xff]  }
  0xdb   :  { %5087 = vmatpush1.bf16.msra.mxu0 %v7785_v51  ;;  %5620 = vmatpush1.bf16.msra.mxu1 %v7788_v53  ;;  %v7877_v51 = vld [vmem:[%s11374_s1 + $0x8a4] ss:$16 sps:$4 sm:$0xff]   ;;  %v7880_v53 = vld [vmem:[%s11374_s1 + $0x8ac] ss:$16 sps:$4 sm:$0xff]  }
  0xdc   :  { %5088 = vmatprep.subr.bf16.mxu0 %v7793_v54  ;;  %5621 = vmatprep.subr.bf16.mxu1 %v7796_v55  ;;  %v7875_v54 = vld [vmem:[%s11374_s1 + $0x8a0] ss:$16 sps:$4 sm:$0xff]   ;;  %v7878_v55 = vld [vmem:[%s11374_s1 + $0x8a8] ss:$16 sps:$4 sm:$0xff]  }
  0xdf   :  { %5089 = vmatpush1.bf16.msra.mxu0 %v7791_v56  ;;  %5622 = vmatpush1.bf16.msra.mxu1 %v7794_v57  ;;  %v7883_v56 = vld [vmem:[%s11374_s1 + $0x8c4] ss:$16 sps:$4 sm:$0xff]   ;;  %v7886_v57 = vld [vmem:[%s11374_s1 + $0x8cc] ss:$16 sps:$4 sm:$0xff]  }
  0xe0   :  { %5090 = vmatprep.subr.bf16.mxu0 %v7799_v58  ;;  %5623 = vmatprep.subr.bf16.mxu1 %v7802_v59  ;;  %v7881_v58 = vld [vmem:[%s11374_s1 + $0x8c0] ss:$16 sps:$4 sm:$0xff]   ;;  %v7884_v59 = vld [vmem:[%s11374_s1 + $0x8c8] ss:$16 sps:$4 sm:$0xff]  }
  0xe3   :  { %5091 = vmatpush1.bf16.msra.mxu0 %v7797_v60  ;;  %5624 = vmatpush1.bf16.msra.mxu1 %v7800_v61  ;;  %v7889_v60 = vld [vmem:[%s11374_s1 + $0x8e4] ss:$16 sps:$4 sm:$0xff]   ;;  %v7892_v61 = vld [vmem:[%s11374_s1 + $0x8ec] ss:$16 sps:$4 sm:$0xff]  }
  0xe4   :  { %5092 = vmatprep.subr.bf16.mxu0 %v7805_v62  ;;  %5625 = vmatprep.subr.bf16.mxu1 %v7808_v63  ;;  %v7887_v62 = vld [vmem:[%s11374_s1 + $0x8e0] ss:$16 sps:$4 sm:$0xff]   ;;  %v7890_v63 = vld [vmem:[%s11374_s1 + $0x8e8] ss:$16 sps:$4 sm:$0xff]  }
  0xe7   :  { %5093 = vmatpush1.bf16.msra.mxu0 %v7803_v0  ;;  %5626 = vmatpush1.bf16.msra.mxu1 %v7806_v1  ;;  %v7895_v0 = vld [vmem:[%s11374_s1 + $0x904] ss:$16 sps:$4 sm:$0xff]   ;;  %v7898_v1 = vld [vmem:[%s11374_s1 + $0x90c] ss:$16 sps:$4 sm:$0xff]  }
  0xe8   :  { %5094 = vmatprep.subr.bf16.mxu0 %v7811_v2  ;;  %5627 = vmatprep.subr.bf16.mxu1 %v7814_v3  ;;  %v7893_v2 = vld [vmem:[%s11374_s1 + $0x900] ss:$16 sps:$4 sm:$0xff]   ;;  %v7896_v3 = vld [vmem:[%s11374_s1 + $0x908] ss:$16 sps:$4 sm:$0xff]  }
  0xeb   :  { %5095 = vmatpush1.bf16.msra.mxu0 %v7809_v4  ;;  %5628 = vmatpush1.bf16.msra.mxu1 %v7812_v5  ;;  %v7901_v4 = vld [vmem:[%s11374_s1 + $0x924] ss:$16 sps:$4 sm:$0xff]   ;;  %v7904_v5 = vld [vmem:[%s11374_s1 + $0x92c] ss:$16 sps:$4 sm:$0xff]  }
  0xec   :  { %5096 = vmatprep.subr.bf16.mxu0 %v7817_v6  ;;  %5629 = vmatprep.subr.bf16.mxu1 %v7820_v7  ;;  %v7899_v6 = vld [vmem:[%s11374_s1 + $0x920] ss:$16 sps:$4 sm:$0xff]   ;;  %v7902_v7 = vld [vmem:[%s11374_s1 + $0x928] ss:$16 sps:$4 sm:$0xff]  }
  0xef   :  { %5097 = vmatpush1.bf16.msra.mxu0 %v7815_v8  ;;  %5630 = vmatpush1.bf16.msra.mxu1 %v7818_v9  ;;  %v7907_v8 = vld [vmem:[%s11374_s1 + $0x944] ss:$16 sps:$4 sm:$0xff]   ;;  %v7910_v9 = vld [vmem:[%s11374_s1 + $0x94c] ss:$16 sps:$4 sm:$0xff]  }
  0xf0   :  { %5098 = vmatprep.subr.bf16.mxu0 %v7823_v10  ;;  %5631 = vmatprep.subr.bf16.mxu1 %v7826_v11  ;;  %v7905_v10 = vld [vmem:[%s11374_s1 + $0x940] ss:$16 sps:$4 sm:$0xff]   ;;  %v7908_v11 = vld [vmem:[%s11374_s1 + $0x948] ss:$16 sps:$4 sm:$0xff]  }
  0xf3   :  { %5099 = vmatpush1.bf16.msra.mxu0 %v7821_v12  ;;  %5632 = vmatpush1.bf16.msra.mxu1 %v7824_v52  ;;  %v7913_v12 = vld [vmem:[%s11374_s1 + $0x964] ss:$16 sps:$4 sm:$0xff]   ;;  %v7916_v52 = vld [vmem:[%s11374_s1 + $0x96c] ss:$16 sps:$4 sm:$0xff]  }
  0xf4   :  { %5100 = vmatprep.subr.bf16.mxu0 %v7829_v15  ;;  %5633 = vmatprep.subr.bf16.mxu1 %v7832_v16  ;;  %v7911_v15 = vld [vmem:[%s11374_s1 + $0x960] ss:$16 sps:$4 sm:$0xff]   ;;  %v7914_v16 = vld [vmem:[%s11374_s1 + $0x968] ss:$16 sps:$4 sm:$0xff]  }
  0xf7   :  { %5101 = vmatpush1.bf16.msra.mxu0 %v7827_v17  ;;  %5634 = vmatpush1.bf16.msra.mxu1 %v7830_v18  ;;  %v7919_v17 = vld [vmem:[%s11374_s1 + $0x984] ss:$16 sps:$4 sm:$0xff]   ;;  %v7922_v18 = vld [vmem:[%s11374_s1 + $0x98c] ss:$16 sps:$4 sm:$0xff]  }
  0xf8   :  { %5102 = vmatprep.subr.bf16.mxu0 %v7835_v19  ;;  %5635 = vmatprep.subr.bf16.mxu1 %v7838_v20  ;;  %v7917_v19 = vld [vmem:[%s11374_s1 + $0x980] ss:$16 sps:$4 sm:$0xff]   ;;  %v7920_v20 = vld [vmem:[%s11374_s1 + $0x988] ss:$16 sps:$4 sm:$0xff]  }
  0xfb   :  { %5103 = vmatpush1.bf16.msra.mxu0 %v7833_v22  ;;  %5636 = vmatpush1.bf16.msra.mxu1 %v7836_v23  ;;  %v7925_v22 = vld [vmem:[%s11374_s1 + $0x9a4] ss:$16 sps:$4 sm:$0xff]   ;;  %v7928_v23 = vld [vmem:[%s11374_s1 + $0x9ac] ss:$16 sps:$4 sm:$0xff]  }
  0xfc   :  { %5104 = vmatprep.subr.bf16.mxu0 %v7841_v24  ;;  %5637 = vmatprep.subr.bf16.mxu1 %v7844_v13  ;;  %v7923_v24 = vld [vmem:[%s11374_s1 + $0x9a0] ss:$16 sps:$4 sm:$0xff]   ;;  %v7926_v13 = vld [vmem:[%s11374_s1 + $0x9a8] ss:$16 sps:$4 sm:$0xff]  }
  0xff   :  { %5105 = vmatpush1.bf16.msra.mxu0 %v7839_v27  ;;  %5638 = vmatpush1.bf16.msra.mxu1 %v7842_v28  ;;  %v7931_v27 = vld [vmem:[%s11374_s1 + $0x9c4] ss:$16 sps:$4 sm:$0xff]   ;;  %v7934_v28 = vld [vmem:[%s11374_s1 + $0x9cc] ss:$16 sps:$4 sm:$0xff]  }
 0x100   :  { %5115 = vmatprep.subr.bf16.mxu0 %v7847_v29  ;;  %5648 = vmatprep.subr.bf16.mxu1 %v7850_v14  ;;  %v7929_v29 = vld [vmem:[%s11374_s1 + $0x9c0] ss:$16 sps:$4 sm:$0xff]   ;;  %v7932_v14 = vld [vmem:[%s11374_s1 + $0x9c8] ss:$16 sps:$4 sm:$0xff]  }
 0x102   :  { %5107 = vmatmul.mubr.bf16.vlgmr.msra.gmra.mrb[0].mxu0 %v888_v31  ;;  %5640 = vmatmul.mubr.bf16.vlgmr.msra.gmra.mrb[0].mxu1 %v888_v31  ;;  %v7940_v31 = vld [vmem:[%s11374_s1 + $0x9ec] ss:$16 sps:$4 sm:$0xff]  }
 0x103   :  { %5116 = vmatpush1.bf16.msra.mxu0 %v7845_v25  ;;  %5649 = vmatpush1.bf16.msra.mxu1 %v7848_v32  ;;  %v7935_v25 = vld [vmem:[%s11374_s1 + $0x9e0] ss:$16 sps:$4 sm:$0xff]   ;;  %v7938_v32 = vld [vmem:[%s11374_s1 + $0x9e8] ss:$16 sps:$4 sm:$0xff]  }
 0x104   :  { %5117 = vmatprep.subr.bf16.mxu0 %v7853_v33  ;;  %5650 = vmatprep.subr.bf16.mxu1 %v7856_v26  ;;  %v7943_v33 = vld [vmem:[%s11374_s1 + $0xa04] ss:$16 sps:$4 sm:$0xff]   ;;  %v7946_v26 = vld [vmem:[%s11374_s1 + $0xa0c] ss:$16 sps:$4 sm:$0xff]  }
 0x105   :  { %5147 = vmatprep.mubr.bf16.mxu0 %v9582_v34  ;;  %5680 = vmatprep.mubr.bf16.mxu1 %v9582_v34 }
 0x107   :  { %5118 = vmatpush1.bf16.msra.mxu0 %v7851_v35  ;;  %5651 = vmatpush1.bf16.msra.mxu1 %v7854_v36  ;;  %v9768_v35 = vrot.slane %v9539_v21, %v8881_v49  ;;  %v7941_v36 = vld [vmem:[%s11374_s1 + $0xa00] ss:$16 sps:$4 sm:$0xff]   ;;  %v7952_v21 = vld [vmem:[%s11374_s1 + $0xa2c] ss:$16 sps:$4 sm:$0xff]  }
 0x108   :  { %5119 = vmatprep.subr.bf16.mxu0 %v7859_v37  ;;  %5652 = vmatprep.subr.bf16.mxu1 %v7862_v38  ;;  %v7944_v37 = vld [vmem:[%s11374_s1 + $0xa08] ss:$16 sps:$4 sm:$0xff]   ;;  %v7949_v38 = vld [vmem:[%s11374_s1 + $0xa24] ss:$16 sps:$4 sm:$0xff]  }
 0x10b   :  { %5120 = vmatpush1.bf16.msra.mxu0 %v7857_v39  ;;  %5653 = vmatpush1.bf16.msra.mxu1 %v7860_v40  ;;  %v938_v39 = vcombine.high %v9582_v34, %v9582_v34  ;;  %v7947_v40 = vld [vmem:[%s11374_s1 + $0xa20] ss:$16 sps:$4 sm:$0xff]   ;;  %v7955_v34 = vld [vmem:[%s11374_s1 + $0xa44] ss:$16 sps:$4 sm:$0xff]  }
 0x10c   :  { %5121 = vmatprep.subr.bf16.mxu0 %v7865_v41  ;;  %5654 = vmatprep.subr.bf16.mxu1 %v7868_v43  ;;  %v7950_v41 = vld [vmem:[%s11374_s1 + $0xa28] ss:$16 sps:$4 sm:$0xff]   ;;  %v7958_v43 = vld [vmem:[%s11374_s1 + $0xa4c] ss:$16 sps:$4 sm:$0xff]  }
 0x10f   :  { %5122 = vmatpush1.bf16.msra.mxu0 %v7863_v44  ;;  %5655 = vmatpush1.bf16.msra.mxu1 %v7866_v45  ;;  %v7953_v44 = vld [vmem:[%s11374_s1 + $0xa40] ss:$16 sps:$4 sm:$0xff]   ;;  %v7956_v45 = vld [vmem:[%s11374_s1 + $0xa48] ss:$16 sps:$4 sm:$0xff]  }
 0x110   :  { %5123 = vmatprep.subr.bf16.mxu0 %v7871_v46  ;;  %5656 = vmatprep.subr.bf16.mxu1 %v7874_v47  ;;  %v7961_v46 = vld [vmem:[%s11374_s1 + $0xa64] ss:$16 sps:$4 sm:$0xff]   ;;  %v7964_v47 = vld [vmem:[%s11374_s1 + $0xa6c] ss:$16 sps:$4 sm:$0xff]  }
 0x113   :  { %5124 = vmatpush1.bf16.msra.mxu0 %v7869_v48  ;;  %5657 = vmatpush1.bf16.msra.mxu1 %v7872_v50  ;;  %v7959_v48 = vld [vmem:[%s11374_s1 + $0xa60] ss:$16 sps:$4 sm:$0xff]   ;;  %v7962_v50 = vld [vmem:[%s11374_s1 + $0xa68] ss:$16 sps:$4 sm:$0xff]  }
 0x114   :  { %5125 = vmatprep.subr.bf16.mxu0 %v7877_v51  ;;  %5658 = vmatprep.subr.bf16.mxu1 %v7880_v53  ;;  %v7967_v51 = vld [vmem:[%s11374_s1 + $0xa84] ss:$16 sps:$4 sm:$0xff]   ;;  %v7970_v53 = vld [vmem:[%s11374_s1 + $0xa8c] ss:$16 sps:$4 sm:$0xff]  }
 0x117   :  { %5126 = vmatpush1.bf16.msra.mxu0 %v7875_v54  ;;  %5659 = vmatpush1.bf16.msra.mxu1 %v7878_v55  ;;  %v7965_v54 = vld [vmem:[%s11374_s1 + $0xa80] ss:$16 sps:$4 sm:$0xff]   ;;  %v7968_v55 = vld [vmem:[%s11374_s1 + $0xa88] ss:$16 sps:$4 sm:$0xff]  }
 0x118   :  { %5127 = vmatprep.subr.bf16.mxu0 %v7883_v56  ;;  %5660 = vmatprep.subr.bf16.mxu1 %v7886_v57  ;;  %v7973_v56 = vld [vmem:[%s11374_s1 + $0xaa4] ss:$16 sps:$4 sm:$0xff]   ;;  %v7976_v57 = vld [vmem:[%s11374_s1 + $0xaac] ss:$16 sps:$4 sm:$0xff]  }
 0x11b   :  { %5128 = vmatpush1.bf16.msra.mxu0 %v7881_v58  ;;  %5661 = vmatpush1.bf16.msra.mxu1 %v7884_v59  ;;  %v7971_v58 = vld [vmem:[%s11374_s1 + $0xaa0] ss:$16 sps:$4 sm:$0xff]   ;;  %v7974_v59 = vld [vmem:[%s11374_s1 + $0xaa8] ss:$16 sps:$4 sm:$0xff]  }
 0x11c   :  { %5129 = vmatprep.subr.bf16.mxu0 %v7889_v60  ;;  %5662 = vmatprep.subr.bf16.mxu1 %v7892_v61  ;;  %v7979_v60 = vld [vmem:[%s11374_s1 + $0xac4] ss:$16 sps:$4 sm:$0xff]   ;;  %v7982_v61 = vld [vmem:[%s11374_s1 + $0xacc] ss:$16 sps:$4 sm:$0xff]  }
 0x11f   :  { %5130 = vmatpush1.bf16.msra.mxu0 %v7887_v62  ;;  %5663 = vmatpush1.bf16.msra.mxu1 %v7890_v63  ;;  %v7977_v62 = vld [vmem:[%s11374_s1 + $0xac0] ss:$16 sps:$4 sm:$0xff]   ;;  %v7980_v63 = vld [vmem:[%s11374_s1 + $0xac8] ss:$16 sps:$4 sm:$0xff]  }
 0x120   :  { %5131 = vmatprep.subr.bf16.mxu0 %v7895_v0  ;;  %5664 = vmatprep.subr.bf16.mxu1 %v7898_v1  ;;  %v7985_v0 = vld [vmem:[%s11374_s1 + $0xae4] ss:$16 sps:$4 sm:$0xff]   ;;  %v7988_v1 = vld [vmem:[%s11374_s1 + $0xaec] ss:$16 sps:$4 sm:$0xff]  }
 0x123   :  { %5132 = vmatpush1.bf16.msra.mxu0 %v7893_v2  ;;  %5665 = vmatpush1.bf16.msra.mxu1 %v7896_v3  ;;  %v7983_v2 = vld [vmem:[%s11374_s1 + $0xae0] ss:$16 sps:$4 sm:$0xff]   ;;  %v7986_v3 = vld [vmem:[%s11374_s1 + $0xae8] ss:$16 sps:$4 sm:$0xff]  }
 0x124   :  { %5133 = vmatprep.subr.bf16.mxu0 %v7901_v4  ;;  %5666 = vmatprep.subr.bf16.mxu1 %v7904_v5  ;;  %v7991_v4 = vld [vmem:[%s11374_s1 + $0xb04] ss:$16 sps:$4 sm:$0xff]   ;;  %v7994_v5 = vld [vmem:[%s11374_s1 + $0xb0c] ss:$16 sps:$4 sm:$0xff]  }
 0x127   :  { %5134 = vmatpush1.bf16.msra.mxu0 %v7899_v6  ;;  %5667 = vmatpush1.bf16.msra.mxu1 %v7902_v7  ;;  %v7989_v6 = vld [vmem:[%s11374_s1 + $0xb00] ss:$16 sps:$4 sm:$0xff]   ;;  %v7992_v7 = vld [vmem:[%s11374_s1 + $0xb08] ss:$16 sps:$4 sm:$0xff]  }
 0x128   :  { %5135 = vmatprep.subr.bf16.mxu0 %v7907_v8  ;;  %5668 = vmatprep.subr.bf16.mxu1 %v7910_v9  ;;  %v7997_v8 = vld [vmem:[%s11374_s1 + $0xb24] ss:$16 sps:$4 sm:$0xff]   ;;  %v8000_v9 = vld [vmem:[%s11374_s1 + $0xb2c] ss:$16 sps:$4 sm:$0xff]  }
 0x12b   :  { %5136 = vmatpush1.bf16.msra.mxu0 %v7905_v10  ;;  %5669 = vmatpush1.bf16.msra.mxu1 %v7908_v11  ;;  %v7995_v10 = vld [vmem:[%s11374_s1 + $0xb20] ss:$16 sps:$4 sm:$0xff]   ;;  %v7998_v11 = vld [vmem:[%s11374_s1 + $0xb28] ss:$16 sps:$4 sm:$0xff]  }
 0x12c   :  { %5137 = vmatprep.subr.bf16.mxu0 %v7913_v12  ;;  %5670 = vmatprep.subr.bf16.mxu1 %v7916_v52  ;;  %v8003_v12 = vld [vmem:[%s11374_s1 + $0xb44] ss:$16 sps:$4 sm:$0xff]   ;;  %v8006_v52 = vld [vmem:[%s11374_s1 + $0xb4c] ss:$16 sps:$4 sm:$0xff]  }
 0x12f   :  { %5138 = vmatpush1.bf16.msra.mxu0 %v7911_v15  ;;  %5671 = vmatpush1.bf16.msra.mxu1 %v7914_v16  ;;  %v8001_v15 = vld [vmem:[%s11374_s1 + $0xb40] ss:$16 sps:$4 sm:$0xff]   ;;  %v8004_v16 = vld [vmem:[%s11374_s1 + $0xb48] ss:$16 sps:$4 sm:$0xff]  }
 0x130   :  { %5139 = vmatprep.subr.bf16.mxu0 %v7919_v17  ;;  %5672 = vmatprep.subr.bf16.mxu1 %v7922_v18  ;;  %v8009_v17 = vld [vmem:[%s11374_s1 + $0xb64] ss:$16 sps:$4 sm:$0xff]   ;;  %v8012_v18 = vld [vmem:[%s11374_s1 + $0xb6c] ss:$16 sps:$4 sm:$0xff]  }
 0x133   :  { %5140 = vmatpush1.bf16.msra.mxu0 %v7917_v19  ;;  %5673 = vmatpush1.bf16.msra.mxu1 %v7920_v20  ;;  %v8007_v19 = vld [vmem:[%s11374_s1 + $0xb60] ss:$16 sps:$4 sm:$0xff]   ;;  %v8010_v20 = vld [vmem:[%s11374_s1 + $0xb68] ss:$16 sps:$4 sm:$0xff]  }
 0x134   :  { %5141 = vmatprep.subr.bf16.mxu0 %v7925_v22  ;;  %5674 = vmatprep.subr.bf16.mxu1 %v7928_v23  ;;  %v8015_v22 = vld [vmem:[%s11374_s1 + $0xb84] ss:$16 sps:$4 sm:$0xff]   ;;  %v8018_v23 = vld [vmem:[%s11374_s1 + $0xb8c] ss:$16 sps:$4 sm:$0xff]  }
 0x137   :  { %5142 = vmatpush1.bf16.msra.mxu0 %v7923_v24  ;;  %5675 = vmatpush1.bf16.msra.mxu1 %v7926_v13  ;;  %v8013_v24 = vld [vmem:[%s11374_s1 + $0xb80] ss:$16 sps:$4 sm:$0xff]   ;;  %v8016_v13 = vld [vmem:[%s11374_s1 + $0xb88] ss:$16 sps:$4 sm:$0xff]  }
 0x138   :  { %5143 = vmatprep.subr.bf16.mxu0 %v7931_v27  ;;  %5676 = vmatprep.subr.bf16.mxu1 %v7934_v28  ;;  %v8021_v27 = vld [vmem:[%s11374_s1 + $0xba4] ss:$16 sps:$4 sm:$0xff]   ;;  %v8024_v28 = vld [vmem:[%s11374_s1 + $0xbac] ss:$16 sps:$4 sm:$0xff]  }
 0x13b   :  { %5144 = vmatpush1.bf16.msra.mxu0 %v7929_v29  ;;  %5677 = vmatpush1.bf16.msra.mxu1 %v7932_v14  ;;  %v8019_v29 = vld [vmem:[%s11374_s1 + $0xba0] ss:$16 sps:$4 sm:$0xff]   ;;  %v8022_v14 = vld [vmem:[%s11374_s1 + $0xba8] ss:$16 sps:$4 sm:$0xff]  }
 0x13c   :  { %5145 = vmatprep.subr.bf16.mxu0 %v7937_v30  ;;  %5678 = vmatprep.subr.bf16.mxu1 %v7940_v31  ;;  %v8027_v30 = vld [vmem:[%s11374_s1 + $0xbc4] ss:$16 sps:$4 sm:$0xff]   ;;  %v8030_v31 = vld [vmem:[%s11374_s1 + $0xbcc] ss:$16 sps:$4 sm:$0xff]  }
 0x13f   :  { %5146 = vmatpush1.bf16.msra.mxu0 %v7935_v25  ;;  %5679 = vmatpush1.bf16.msra.mxu1 %v7938_v32  ;;  %v8675_v25 = vld [vmem:[%s11373_s0 + $0x8] sm:$0xff] }
 0x140   :  { %5156 = vmatprep.subr.bf16.mxu0 %v7943_v33  ;;  %5689 = vmatprep.subr.bf16.mxu1 %v7946_v26  ;;  %v891_v32 = vcombine.high %v8675_v25, %v8675_v25  ;;  %v8025_v33 = vld [vmem:[%s11374_s1 + $0xbc0] ss:$16 sps:$4 sm:$0xff]   ;;  %v8028_v26 = vld [vmem:[%s11374_s1 + $0xbc8] ss:$16 sps:$4 sm:$0xff]  }
 0x141   :  { %v8109_v25 = vld [vmem:[%s11374_s1 + $0xd80] ss:$16 sps:$4 sm:$0xff]  }
 0x142   :  { %5148 = vmatmul.mubr.bf16.vlgmr.msra.gmra.mrb[0].mxu0 %v9768_v35  ;;  %5681 = vmatmul.mubr.bf16.vlgmr.msra.gmra.mrb[0].mxu1 %v9768_v35 }
 0x143   :  { %5157 = vmatpush1.bf16.msra.mxu0 %v7941_v36  ;;  %5690 = vmatpush1.bf16.msra.mxu1 %v7944_v37  ;;  %v8033_v36 = vld [vmem:[%s11374_s1 + $0xbe4] ss:$16 sps:$4 sm:$0xff]   ;;  %v8036_v37 = vld [vmem:[%s11374_s1 + $0xbec] ss:$16 sps:$4 sm:$0xff]  }
 0x144   :  { %5158 = vmatprep.subr.bf16.mxu0 %v7949_v38  ;;  %5691 = vmatprep.subr.bf16.mxu1 %v7952_v21  ;;  %v9958_v38 = vrot.slane %v891_v32, %v8881_v49  ;;  %v8031_v21 = vld [vmem:[%s11374_s1 + $0xbe0] ss:$16 sps:$4 sm:$0xff]   ;;  %v8112_v32 = vld [vmem:[%s11374_s1 + $0xd88] ss:$16 sps:$4 sm:$0xff]  }
 0x145   :  { %5188 = vmatprep.mubr.bf16.mxu0 %v938_v39  ;;  %5721 = vmatprep.mubr.bf16.mxu1 %v938_v39  ;;  %v8034_v39 = vld [vmem:[%s11374_s1 + $0xbe8] ss:$16 sps:$4 sm:$0xff]  }
 0x147   :  { %5159 = vmatpush1.bf16.msra.mxu0 %v7947_v40  ;;  %5692 = vmatpush1.bf16.msra.mxu1 %v7950_v41  ;;  %v8039_v40 = vld [vmem:[%s11374_s1 + $0xc04] ss:$16 sps:$4 sm:$0xff]   ;;  %v8042_v41 = vld [vmem:[%s11374_s1 + $0xc0c] ss:$16 sps:$4 sm:$0xff]  }
 0x148   :  { %5160 = vmatprep.subr.bf16.mxu0 %v7955_v34  ;;  %5693 = vmatprep.subr.bf16.mxu1 %v7958_v43  ;;  %v907_v34 = vcombine.high %v9958_v38, %v9958_v38  ;;  %v936_v43 = vcombine.high %v9768_v35, %v9768_v35  ;;  %v8048_v35 = vld [vmem:[%s11374_s1 + $0xc2c] ss:$16 sps:$4 sm:$0xff]  }
 0x14b   :  { %5161 = vmatpush1.bf16.msra.mxu0 %v7953_v44  ;;  %5694 = vmatpush1.bf16.msra.mxu1 %v7956_v45  ;;  %v8037_v44 = vld [vmem:[%s11374_s1 + $0xc00] ss:$16 sps:$4 sm:$0xff]   ;;  %v8040_v45 = vld [vmem:[%s11374_s1 + $0xc08] ss:$16 sps:$4 sm:$0xff]  }
 0x14c   :  { %5162 = vmatprep.subr.bf16.mxu0 %v7961_v46  ;;  %5695 = vmatprep.subr.bf16.mxu1 %v7964_v47  ;;  %v8045_v46 = vld [vmem:[%s11374_s1 + $0xc24] ss:$16 sps:$4 sm:$0xff]   ;;  %v9989_v47 = vrot.slane %v907_v34, %v8881_v49 }
 0x14d   :  { %v8129_v34 = vld [vmem:[%s11374_s1 + $0xde4] ss:$16 sps:$4 sm:$0xff]  }
 0x14f   :  { %5163 = vmatpush1.bf16.msra.mxu0 %v7959_v48  ;;  %5696 = vmatpush1.bf16.msra.mxu1 %v7962_v50  ;;  %v8043_v48 = vld [vmem:[%s11374_s1 + $0xc20] ss:$16 sps:$4 sm:$0xff]   ;;  %v8046_v50 = vld [vmem:[%s11374_s1 + $0xc28] ss:$16 sps:$4 sm:$0xff]  }
 0x150   :  { %5164 = vmatprep.subr.bf16.mxu0 %v7967_v51  ;;  %5697 = vmatprep.subr.bf16.mxu1 %v7970_v53  ;;  %v8051_v51 = vld [vmem:[%s11374_s1 + $0xc44] ss:$16 sps:$4 sm:$0xff]   ;;  %v8054_v53 = vld [vmem:[%s11374_s1 + $0xc4c] ss:$16 sps:$4 sm:$0xff]  }
 0x153   :  { %5165 = vmatpush1.bf16.msra.mxu0 %v7965_v54  ;;  %5698 = vmatpush1.bf16.msra.mxu1 %v7968_v55  ;;  %v8049_v54 = vld [vmem:[%s11374_s1 + $0xc40] ss:$16 sps:$4 sm:$0xff]   ;;  %v8052_v55 = vld [vmem:[%s11374_s1 + $0xc48] ss:$16 sps:$4 sm:$0xff]  }
 0x154   :  { %5166 = vmatprep.subr.bf16.mxu0 %v7973_v56  ;;  %5699 = vmatprep.subr.bf16.mxu1 %v7976_v57  ;;  %v8057_v56 = vld [vmem:[%s11374_s1 + $0xc64] ss:$16 sps:$4 sm:$0xff]   ;;  %v8060_v57 = vld [vmem:[%s11374_s1 + $0xc6c] ss:$16 sps:$4 sm:$0xff]  }
 0x157   :  { %5167 = vmatpush1.bf16.msra.mxu0 %v7971_v58  ;;  %5700 = vmatpush1.bf16.msra.mxu1 %v7974_v59  ;;  %v8055_v58 = vld [vmem:[%s11374_s1 + $0xc60] ss:$16 sps:$4 sm:$0xff]   ;;  %v8058_v59 = vld [vmem:[%s11374_s1 + $0xc68] ss:$16 sps:$4 sm:$0xff]  }
 0x158   :  { %5168 = vmatprep.subr.bf16.mxu0 %v7979_v60  ;;  %5701 = vmatprep.subr.bf16.mxu1 %v7982_v61  ;;  %v8063_v60 = vld [vmem:[%s11374_s1 + $0xc84] ss:$16 sps:$4 sm:$0xff]   ;;  %v8066_v61 = vld [vmem:[%s11374_s1 + $0xc8c] ss:$16 sps:$4 sm:$0xff]  }
 0x15b   :  { %5169 = vmatpush1.bf16.msra.mxu0 %v7977_v62  ;;  %5702 = vmatpush1.bf16.msra.mxu1 %v7980_v63  ;;  %v8061_v62 = vld [vmem:[%s11374_s1 + $0xc80] ss:$16 sps:$4 sm:$0xff]   ;;  %v8064_v63 = vld [vmem:[%s11374_s1 + $0xc88] ss:$16 sps:$4 sm:$0xff]  }
 0x15c   :  { %5170 = vmatprep.subr.bf16.mxu0 %v7985_v0  ;;  %5703 = vmatprep.subr.bf16.mxu1 %v7988_v1  ;;  %v8069_v0 = vld [vmem:[%s11374_s1 + $0xca4] ss:$16 sps:$4 sm:$0xff]   ;;  %v8072_v1 = vld [vmem:[%s11374_s1 + $0xcac] ss:$16 sps:$4 sm:$0xff]  }
 0x15f   :  { %5171 = vmatpush1.bf16.msra.mxu0 %v7983_v2  ;;  %5704 = vmatpush1.bf16.msra.mxu1 %v7986_v3  ;;  %v8067_v2 = vld [vmem:[%s11374_s1 + $0xca0] ss:$16 sps:$4 sm:$0xff]   ;;  %v8070_v3 = vld [vmem:[%s11374_s1 + $0xca8] ss:$16 sps:$4 sm:$0xff]  }
 0x160   :  { %5172 = vmatprep.subr.bf16.mxu0 %v7991_v4  ;;  %5705 = vmatprep.subr.bf16.mxu1 %v7994_v5  ;;  %v8075_v4 = vld [vmem:[%s11374_s1 + $0xcc4] ss:$16 sps:$4 sm:$0xff]   ;;  %v8078_v5 = vld [vmem:[%s11374_s1 + $0xccc] ss:$16 sps:$4 sm:$0xff]  }
 0x163   :  { %5173 = vmatpush1.bf16.msra.mxu0 %v7989_v6  ;;  %5706 = vmatpush1.bf16.msra.mxu1 %v7992_v7  ;;  %v8073_v6 = vld [vmem:[%s11374_s1 + $0xcc0] ss:$16 sps:$4 sm:$0xff]   ;;  %v8076_v7 = vld [vmem:[%s11374_s1 + $0xcc8] ss:$16 sps:$4 sm:$0xff]  }
 0x164   :  { %5174 = vmatprep.subr.bf16.mxu0 %v7997_v8  ;;  %5707 = vmatprep.subr.bf16.mxu1 %v8000_v9  ;;  %v8081_v8 = vld [vmem:[%s11374_s1 + $0xce4] ss:$16 sps:$4 sm:$0xff]   ;;  %v8084_v9 = vld [vmem:[%s11374_s1 + $0xcec] ss:$16 sps:$4 sm:$0xff]  }
 0x167   :  { %5175 = vmatpush1.bf16.msra.mxu0 %v7995_v10  ;;  %5708 = vmatpush1.bf16.msra.mxu1 %v7998_v11  ;;  %v8079_v10 = vld [vmem:[%s11374_s1 + $0xce0] ss:$16 sps:$4 sm:$0xff]   ;;  %v8082_v11 = vld [vmem:[%s11374_s1 + $0xce8] ss:$16 sps:$4 sm:$0xff]  }
 0x168   :  { %5176 = vmatprep.subr.bf16.mxu0 %v8003_v12  ;;  %5709 = vmatprep.subr.bf16.mxu1 %v8006_v52  ;;  %v8087_v12 = vld [vmem:[%s11374_s1 + $0xd04] ss:$16 sps:$4 sm:$0xff]   ;;  %v8090_v52 = vld [vmem:[%s11374_s1 + $0xd0c] ss:$16 sps:$4 sm:$0xff]  }
 0x16b   :  { %5177 = vmatpush1.bf16.msra.mxu0 %v8001_v15  ;;  %5710 = vmatpush1.bf16.msra.mxu1 %v8004_v16  ;;  %v8085_v15 = vld [vmem:[%s11374_s1 + $0xd00] ss:$16 sps:$4 sm:$0xff]   ;;  %v8088_v16 = vld [vmem:[%s11374_s1 + $0xd08] ss:$16 sps:$4 sm:$0xff]  }
 0x16c   :  { %5178 = vmatprep.subr.bf16.mxu0 %v8009_v17  ;;  %5711 = vmatprep.subr.bf16.mxu1 %v8012_v18  ;;  %v8093_v17 = vld [vmem:[%s11374_s1 + $0xd24] ss:$16 sps:$4 sm:$0xff]   ;;  %v8096_v18 = vld [vmem:[%s11374_s1 + $0xd2c] ss:$16 sps:$4 sm:$0xff]  }
 0x16f   :  { %5179 = vmatpush1.bf16.msra.mxu0 %v8007_v19  ;;  %5712 = vmatpush1.bf16.msra.mxu1 %v8010_v20  ;;  %v8091_v19 = vld [vmem:[%s11374_s1 + $0xd20] ss:$16 sps:$4 sm:$0xff]   ;;  %v8094_v20 = vld [vmem:[%s11374_s1 + $0xd28] ss:$16 sps:$4 sm:$0xff]  }
 0x170   :  { %5180 = vmatprep.subr.bf16.mxu0 %v8015_v22  ;;  %5713 = vmatprep.subr.bf16.mxu1 %v8018_v23  ;;  %v8099_v22 = vld [vmem:[%s11374_s1 + $0xd44] ss:$16 sps:$4 sm:$0xff]   ;;  %v8102_v23 = vld [vmem:[%s11374_s1 + $0xd4c] ss:$16 sps:$4 sm:$0xff]  }
 0x173   :  { %5181 = vmatpush1.bf16.msra.mxu0 %v8013_v24  ;;  %5714 = vmatpush1.bf16.msra.mxu1 %v8016_v13  ;;  %v8097_v24 = vld [vmem:[%s11374_s1 + $0xd40] ss:$16 sps:$4 sm:$0xff]   ;;  %v8100_v13 = vld [vmem:[%s11374_s1 + $0xd48] ss:$16 sps:$4 sm:$0xff]  }
 0x174   :  { %5182 = vmatprep.subr.bf16.mxu0 %v8021_v27  ;;  %5715 = vmatprep.subr.bf16.mxu1 %v8024_v28  ;;  %v8105_v27 = vld [vmem:[%s11374_s1 + $0xd64] ss:$16 sps:$4 sm:$0xff]   ;;  %v8108_v28 = vld [vmem:[%s11374_s1 + $0xd6c] ss:$16 sps:$4 sm:$0xff]  }
 0x177   :  { %5183 = vmatpush1.bf16.msra.mxu0 %v8019_v29  ;;  %5716 = vmatpush1.bf16.msra.mxu1 %v8022_v14  ;;  %v8103_v29 = vld [vmem:[%s11374_s1 + $0xd60] ss:$16 sps:$4 sm:$0xff]   ;;  %v8106_v14 = vld [vmem:[%s11374_s1 + $0xd68] ss:$16 sps:$4 sm:$0xff]  }
 0x178   :  { %5184 = vmatprep.subr.bf16.mxu0 %v8027_v30  ;;  %5717 = vmatprep.subr.bf16.mxu1 %v8030_v31  ;;  %v8111_v30 = vld [vmem:[%s11374_s1 + $0xd84] ss:$16 sps:$4 sm:$0xff]   ;;  %v8114_v31 = vld [vmem:[%s11374_s1 + $0xd8c] ss:$16 sps:$4 sm:$0xff]  }
 0x17b   :  { %5185 = vmatpush1.bf16.msra.mxu0 %v8025_v33  ;;  %5718 = vmatpush1.bf16.msra.mxu1 %v8028_v26  ;;  %v8117_v33 = vld [vmem:[%s11374_s1 + $0xda4] ss:$16 sps:$4 sm:$0xff]   ;;  %v8120_v26 = vld [vmem:[%s11374_s1 + $0xdac] ss:$16 sps:$4 sm:$0xff]  }
 0x17c   :  { %5186 = vmatprep.subr.bf16.mxu0 %v8033_v36  ;;  %5719 = vmatprep.subr.bf16.mxu1 %v8036_v37  ;;  %v8115_v36 = vld [vmem:[%s11374_s1 + $0xda0] ss:$16 sps:$4 sm:$0xff]   ;;  %v8118_v37 = vld [vmem:[%s11374_s1 + $0xda8] ss:$16 sps:$4 sm:$0xff]  }
 0x17f   :  { %5187 = vmatpush1.bf16.msra.mxu0 %v8031_v21  ;;  %5720 = vmatpush1.bf16.msra.mxu1 %v8034_v39  ;;  %v8123_v21 = vld [vmem:[%s11374_s1 + $0xdc4] ss:$16 sps:$4 sm:$0xff]   ;;  %v8126_v39 = vld [vmem:[%s11374_s1 + $0xdcc] ss:$16 sps:$4 sm:$0xff]  }
 0x180   :  { %5197 = vmatprep.subr.bf16.mxu0 %v8039_v40  ;;  %5730 = vmatprep.subr.bf16.mxu1 %v8042_v41  ;;  %v8121_v40 = vld [vmem:[%s11374_s1 + $0xdc0] ss:$16 sps:$4 sm:$0xff]   ;;  %v8124_v41 = vld [vmem:[%s11374_s1 + $0xdc8] ss:$16 sps:$4 sm:$0xff]  }
 0x182   :  { %5189 = vmatmul.mubr.bf16.vlgmr.msra.gmra.mrb[0].mxu0 %v936_v43  ;;  %5722 = vmatmul.mubr.bf16.vlgmr.msra.gmra.mrb[0].mxu1 %v936_v43  ;;  %v8132_v43 = vld [vmem:[%s11374_s1 + $0xdec] ss:$16 sps:$4 sm:$0xff]  }
 0x183   :  { %5198 = vmatpush1.bf16.msra.mxu0 %v8037_v44  ;;  %5731 = vmatpush1.bf16.msra.mxu1 %v8040_v45  ;;  %v8127_v44 = vld [vmem:[%s11374_s1 + $0xde0] ss:$16 sps:$4 sm:$0xff]   ;;  %v8130_v45 = vld [vmem:[%s11374_s1 + $0xde8] ss:$16 sps:$4 sm:$0xff]  }
 0x184   :  { %5199 = vmatprep.subr.bf16.mxu0 %v8045_v46  ;;  %5732 = vmatprep.subr.bf16.mxu1 %v8048_v35  ;;  %v8136_v46 = vld [vmem:[%s11374_s1 + $0xe04] ss:$16 sps:$4 sm:$0xff]   ;;  %v8139_v35 = vld [vmem:[%s11374_s1 + $0xe0c] ss:$16 sps:$4 sm:$0xff]  }
 0x185   :  { %5229 = vmatprep.mubr.bf16.mxu0 %v9989_v47  ;;  %5762 = vmatprep.mubr.bf16.mxu1 %v9989_v47 }
 0x187   :  { %5200 = vmatpush1.bf16.msra.mxu0 %v8043_v48  ;;  %5733 = vmatpush1.bf16.msra.mxu1 %v8046_v50  ;;  %v10175_v48 = vrot.slane %v9958_v38, %v8881_v49  ;;  %v8134_v50 = vld [vmem:[%s11374_s1 + $0xe00] ss:$16 sps:$4 sm:$0xff]   ;;  %v8145_v38 = vld [vmem:[%s11374_s1 + $0xe2c] ss:$16 sps:$4 sm:$0xff]  }
 0x188   :  { %5201 = vmatprep.subr.bf16.mxu0 %v8051_v51  ;;  %5734 = vmatprep.subr.bf16.mxu1 %v8054_v53  ;;  %v8137_v51 = vld [vmem:[%s11374_s1 + $0xe08] ss:$16 sps:$4 sm:$0xff]   ;;  %v8142_v53 = vld [vmem:[%s11374_s1 + $0xe24] ss:$16 sps:$4 sm:$0xff]  }
 0x18b   :  { %5202 = vmatpush1.bf16.msra.mxu0 %v8049_v54  ;;  %5735 = vmatpush1.bf16.msra.mxu1 %v8052_v55  ;;  %v939_v54 = vcombine.high %v9989_v47, %v9989_v47  ;;  %v8140_v55 = vld [vmem:[%s11374_s1 + $0xe20] ss:$16 sps:$4 sm:$0xff]   ;;  %v8148_v47 = vld [vmem:[%s11374_s1 + $0xe44] ss:$16 sps:$4 sm:$0xff]  }
 0x18c   :  { %5203 = vmatprep.subr.bf16.mxu0 %v8057_v56  ;;  %5736 = vmatprep.subr.bf16.mxu1 %v8060_v57  ;;  %v8143_v56 = vld [vmem:[%s11374_s1 + $0xe28] ss:$16 sps:$4 sm:$0xff]   ;;  %v8151_v57 = vld [vmem:[%s11374_s1 + $0xe4c] ss:$16 sps:$4 sm:$0xff]  }
 0x18f   :  { %5204 = vmatpush1.bf16.msra.mxu0 %v8055_v58  ;;  %5737 = vmatpush1.bf16.msra.mxu1 %v8058_v59  ;;  %v8146_v58 = vld [vmem:[%s11374_s1 + $0xe40] ss:$16 sps:$4 sm:$0xff]   ;;  %v8149_v59 = vld [vmem:[%s11374_s1 + $0xe48] ss:$16 sps:$4 sm:$0xff]  }
 0x190   :  { %5205 = vmatprep.subr.bf16.mxu0 %v8063_v60  ;;  %5738 = vmatprep.subr.bf16.mxu1 %v8066_v61  ;;  %v8154_v60 = vld [vmem:[%s11374_s1 + $0xe64] ss:$16 sps:$4 sm:$0xff]   ;;  %v8157_v61 = vld [vmem:[%s11374_s1 + $0xe6c] ss:$16 sps:$4 sm:$0xff]  }
 0x193   :  { %5206 = vmatpush1.bf16.msra.mxu0 %v8061_v62  ;;  %5739 = vmatpush1.bf16.msra.mxu1 %v8064_v63  ;;  %v8152_v62 = vld [vmem:[%s11374_s1 + $0xe60] ss:$16 sps:$4 sm:$0xff]   ;;  %v8155_v63 = vld [vmem:[%s11374_s1 + $0xe68] ss:$16 sps:$4 sm:$0xff]  }
 0x194   :  { %5207 = vmatprep.subr.bf16.mxu0 %v8069_v0  ;;  %5740 = vmatprep.subr.bf16.mxu1 %v8072_v1  ;;  %v8160_v0 = vld [vmem:[%s11374_s1 + $0xe84] ss:$16 sps:$4 sm:$0xff]   ;;  %v8163_v1 = vld [vmem:[%s11374_s1 + $0xe8c] ss:$16 sps:$4 sm:$0xff]  }
 0x197   :  { %5208 = vmatpush1.bf16.msra.mxu0 %v8067_v2  ;;  %5741 = vmatpush1.bf16.msra.mxu1 %v8070_v3  ;;  %v8158_v2 = vld [vmem:[%s11374_s1 + $0xe80] ss:$16 sps:$4 sm:$0xff]   ;;  %v8161_v3 = vld [vmem:[%s11374_s1 + $0xe88] ss:$16 sps:$4 sm:$0xff]  }
 0x198   :  { %5209 = vmatprep.subr.bf16.mxu0 %v8075_v4  ;;  %5742 = vmatprep.subr.bf16.mxu1 %v8078_v5  ;;  %v8166_v4 = vld [vmem:[%s11374_s1 + $0xea4] ss:$16 sps:$4 sm:$0xff]   ;;  %v8169_v5 = vld [vmem:[%s11374_s1 + $0xeac] ss:$16 sps:$4 sm:$0xff]  }
 0x19b   :  { %5210 = vmatpush1.bf16.msra.mxu0 %v8073_v6  ;;  %5743 = vmatpush1.bf16.msra.mxu1 %v8076_v7  ;;  %v8164_v6 = vld [vmem:[%s11374_s1 + $0xea0] ss:$16 sps:$4 sm:$0xff]   ;;  %v8167_v7 = vld [vmem:[%s11374_s1 + $0xea8] ss:$16 sps:$4 sm:$0xff]  }
 0x19c   :  { %5211 = vmatprep.subr.bf16.mxu0 %v8081_v8  ;;  %5744 = vmatprep.subr.bf16.mxu1 %v8084_v9  ;;  %v8172_v8 = vld [vmem:[%s11374_s1 + $0xec4] ss:$16 sps:$4 sm:$0xff]   ;;  %v8175_v9 = vld [vmem:[%s11374_s1 + $0xecc] ss:$16 sps:$4 sm:$0xff]  }
 0x19f   :  { %5212 = vmatpush1.bf16.msra.mxu0 %v8079_v10  ;;  %5745 = vmatpush1.bf16.msra.mxu1 %v8082_v11  ;;  %v8170_v10 = vld [vmem:[%s11374_s1 + $0xec0] ss:$16 sps:$4 sm:$0xff]   ;;  %v8173_v11 = vld [vmem:[%s11374_s1 + $0xec8] ss:$16 sps:$4 sm:$0xff]  }
 0x1a0   :  { %5213 = vmatprep.subr.bf16.mxu0 %v8087_v12  ;;  %5746 = vmatprep.subr.bf16.mxu1 %v8090_v52  ;;  %v8178_v12 = vld [vmem:[%s11374_s1 + $0xee4] ss:$16 sps:$4 sm:$0xff]   ;;  %v8181_v52 = vld [vmem:[%s11374_s1 + $0xeec] ss:$16 sps:$4 sm:$0xff]  }
 0x1a3   :  { %5214 = vmatpush1.bf16.msra.mxu0 %v8085_v15  ;;  %5747 = vmatpush1.bf16.msra.mxu1 %v8088_v16  ;;  %v8176_v15 = vld [vmem:[%s11374_s1 + $0xee0] ss:$16 sps:$4 sm:$0xff]   ;;  %v8179_v16 = vld [vmem:[%s11374_s1 + $0xee8] ss:$16 sps:$4 sm:$0xff]  }
 0x1a4   :  { %5215 = vmatprep.subr.bf16.mxu0 %v8093_v17  ;;  %5748 = vmatprep.subr.bf16.mxu1 %v8096_v18  ;;  %v8184_v17 = vld [vmem:[%s11374_s1 + $0xf04] ss:$16 sps:$4 sm:$0xff]   ;;  %v8187_v18 = vld [vmem:[%s11374_s1 + $0xf0c] ss:$16 sps:$4 sm:$0xff]  }
 0x1a7   :  { %5216 = vmatpush1.bf16.msra.mxu0 %v8091_v19  ;;  %5749 = vmatpush1.bf16.msra.mxu1 %v8094_v20  ;;  %v8182_v19 = vld [vmem:[%s11374_s1 + $0xf00] ss:$16 sps:$4 sm:$0xff]   ;;  %v8185_v20 = vld [vmem:[%s11374_s1 + $0xf08] ss:$16 sps:$4 sm:$0xff]  }
 0x1a8   :  { %5217 = vmatprep.subr.bf16.mxu0 %v8099_v22  ;;  %5750 = vmatprep.subr.bf16.mxu1 %v8102_v23  ;;  %v8190_v22 = vld [vmem:[%s11374_s1 + $0xf24] ss:$16 sps:$4 sm:$0xff]   ;;  %v8193_v23 = vld [vmem:[%s11374_s1 + $0xf2c] ss:$16 sps:$4 sm:$0xff]  }
 0x1ab   :  { %5218 = vmatpush1.bf16.msra.mxu0 %v8097_v24  ;;  %5751 = vmatpush1.bf16.msra.mxu1 %v8100_v13  ;;  %v8188_v24 = vld [vmem:[%s11374_s1 + $0xf20] ss:$16 sps:$4 sm:$0xff]   ;;  %v8191_v13 = vld [vmem:[%s11374_s1 + $0xf28] ss:$16 sps:$4 sm:$0xff]  }
 0x1ac   :  { %5219 = vmatprep.subr.bf16.mxu0 %v8105_v27  ;;  %5752 = vmatprep.subr.bf16.mxu1 %v8108_v28  ;;  %v8196_v27 = vld [vmem:[%s11374_s1 + $0xf44] ss:$16 sps:$4 sm:$0xff]   ;;  %v8199_v28 = vld [vmem:[%s11374_s1 + $0xf4c] ss:$16 sps:$4 sm:$0xff]  }
 0x1af   :  { %5220 = vmatpush1.bf16.msra.mxu0 %v8103_v29  ;;  %5753 = vmatpush1.bf16.msra.mxu1 %v8106_v14  ;;  %v8194_v29 = vld [vmem:[%s11374_s1 + $0xf40] ss:$16 sps:$4 sm:$0xff]   ;;  %v8197_v14 = vld [vmem:[%s11374_s1 + $0xf48] ss:$16 sps:$4 sm:$0xff]  }
 0x1b0   :  { %5221 = vmatprep.subr.bf16.mxu0 %v8111_v30  ;;  %5754 = vmatprep.subr.bf16.mxu1 %v8114_v31  ;;  %v8202_v30 = vld [vmem:[%s11374_s1 + $0xf64] ss:$16 sps:$4 sm:$0xff]   ;;  %v8205_v31 = vld [vmem:[%s11374_s1 + $0xf6c] ss:$16 sps:$4 sm:$0xff]  }
 0x1b3   :  { %5222 = vmatpush1.bf16.msra.mxu0 %v8109_v25  ;;  %5755 = vmatpush1.bf16.msra.mxu1 %v8112_v32  ;;  %v8200_v25 = vld [vmem:[%s11374_s1 + $0xf60] ss:$16 sps:$4 sm:$0xff]   ;;  %v8203_v32 = vld [vmem:[%s11374_s1 + $0xf68] ss:$16 sps:$4 sm:$0xff]  }
 0x1b4   :  { %5223 = vmatprep.subr.bf16.mxu0 %v8117_v33  ;;  %5756 = vmatprep.subr.bf16.mxu1 %v8120_v26  ;;  %v8208_v33 = vld [vmem:[%s11374_s1 + $0xf84] ss:$16 sps:$4 sm:$0xff]   ;;  %v8211_v26 = vld [vmem:[%s11374_s1 + $0xf8c] ss:$16 sps:$4 sm:$0xff]  }
 0x1b7   :  { %5224 = vmatpush1.bf16.msra.mxu0 %v8115_v36  ;;  %5757 = vmatpush1.bf16.msra.mxu1 %v8118_v37 }
 0x1b8   :  { %5225 = vmatprep.subr.bf16.mxu0 %v8123_v21  ;;  %5758 = vmatprep.subr.bf16.mxu1 %v8126_v39 }
 0x1bb   :  { %5226 = vmatpush1.bf16.msra.mxu0 %v8121_v40  ;;  %5759 = vmatpush1.bf16.msra.mxu1 %v8124_v41 }
 0x1bc   :  { %5227 = vmatprep.subr.bf16.mxu0 %v8129_v34  ;;  %5760 = vmatprep.subr.bf16.mxu1 %v8132_v43 }
 0x1bf   :  { %5228 = vmatpush1.bf16.msra.mxu0 %v8127_v44  ;;  %5761 = vmatpush1.bf16.msra.mxu1 %v8130_v45 }
 0x1c0   :  { %5238 = vmatprep.subr.bf16.mxu0 %v8136_v46  ;;  %5771 = vmatprep.subr.bf16.mxu1 %v8139_v35 }
 0x1c2   :  { %5230 = vmatmul.mubr.bf16.vlgmr.msra.gmra.mrb[0].mxu0 %v10175_v48  ;;  %5763 = vmatmul.mubr.bf16.vlgmr.msra.gmra.mrb[0].mxu1 %v10175_v48 }
 0x1c3   :  { %5239 = vmatpush1.bf16.msra.mxu0 %v8134_v50  ;;  %5772 = vmatpush1.bf16.msra.mxu1 %v8137_v51 }
 0x1c4   :  { %5240 = vmatprep.subr.bf16.mxu0 %v8142_v53  ;;  %5773 = vmatprep.subr.bf16.mxu1 %v8145_v38 }
 0x1c5   :  { %5270 = vmatprep.mubr.bf16.mxu0 %v939_v54  ;;  %5803 = vmatprep.mubr.bf16.mxu1 %v939_v54 }
 0x1c7   :  { %5241 = vmatpush1.bf16.msra.mxu0 %v8140_v55  ;;  %5774 = vmatpush1.bf16.msra.mxu1 %v8143_v56 }
 0x1c8   :  { %5242 = vmatprep.subr.bf16.mxu0 %v8148_v47  ;;  %5775 = vmatprep.subr.bf16.mxu1 %v8151_v57 }
 0x1cb   :  { %5243 = vmatpush1.bf16.msra.mxu0 %v8146_v58  ;;  %5776 = vmatpush1.bf16.msra.mxu1 %v8149_v59 }
 0x1cc   :  { %5244 = vmatprep.subr.bf16.mxu0 %v8154_v60  ;;  %5777 = vmatprep.subr.bf16.mxu1 %v8157_v61 }
 0x1cf   :  { %5245 = vmatpush1.bf16.msra.mxu0 %v8152_v62  ;;  %5778 = vmatpush1.bf16.msra.mxu1 %v8155_v63 }
 0x1d0   :  { %5246 = vmatprep.subr.bf16.mxu0 %v8160_v0  ;;  %5779 = vmatprep.subr.bf16.mxu1 %v8163_v1 }
 0x1d3   :  { %5247 = vmatpush1.bf16.msra.mxu0 %v8158_v2  ;;  %5780 = vmatpush1.bf16.msra.mxu1 %v8161_v3 }
 0x1d4   :  { %5248 = vmatprep.subr.bf16.mxu0 %v8166_v4  ;;  %5781 = vmatprep.subr.bf16.mxu1 %v8169_v5 }
 0x1d7   :  { %5249 = vmatpush1.bf16.msra.mxu0 %v8164_v6  ;;  %5782 = vmatpush1.bf16.msra.mxu1 %v8167_v7 }
 0x1d8   :  { %5250 = vmatprep.subr.bf16.mxu0 %v8172_v8  ;;  %5783 = vmatprep.subr.bf16.mxu1 %v8175_v9 }
 0x1db   :  { %5251 = vmatpush1.bf16.msra.mxu0 %v8170_v10  ;;  %5784 = vmatpush1.bf16.msra.mxu1 %v8173_v11 }
 0x1dc   :  { %5252 = vmatprep.subr.bf16.mxu0 %v8178_v12  ;;  %5785 = vmatprep.subr.bf16.mxu1 %v8181_v52 }
 0x1df   :  { %5253 = vmatpush1.bf16.msra.mxu0 %v8176_v15  ;;  %5786 = vmatpush1.bf16.msra.mxu1 %v8179_v16 }
 0x1e0   :  { %5254 = vmatprep.subr.bf16.mxu0 %v8184_v17  ;;  %5787 = vmatprep.subr.bf16.mxu1 %v8187_v18 }
 0x1e3   :  { %5255 = vmatpush1.bf16.msra.mxu0 %v8182_v19  ;;  %5788 = vmatpush1.bf16.msra.mxu1 %v8185_v20 }
 0x1e4   :  { %5256 = vmatprep.subr.bf16.mxu0 %v8190_v22  ;;  %5789 = vmatprep.subr.bf16.mxu1 %v8193_v23 }
 0x1e7   :  { %5257 = vmatpush1.bf16.msra.mxu0 %v8188_v24  ;;  %5790 = vmatpush1.bf16.msra.mxu1 %v8191_v13 }
 0x1e8   :  { %5258 = vmatprep.subr.bf16.mxu0 %v8196_v27  ;;  %5791 = vmatprep.subr.bf16.mxu1 %v8199_v28 }
 0x1eb   :  { %5259 = vmatpush1.bf16.msra.mxu0 %v8194_v29  ;;  %5792 = vmatpush1.bf16.msra.mxu1 %v8197_v14 }
 0x1ec   :  { %5260 = vmatprep.subr.bf16.mxu0 %v8202_v30  ;;  %5793 = vmatprep.subr.bf16.mxu1 %v8205_v31 }
 0x1ed   :  { %12 = vsyncpa [#allocation3], 0  ;;  %v8206_v36 = vld [vmem:[%s11374_s1 + $0xf80] ss:$16 sps:$4 sm:$0xff]   ;;  %v8209_v37 = vld [vmem:[%s11374_s1 + $0xf88] ss:$16 sps:$4 sm:$0xff]   ;;  %v937_v47 = vcombine.high %v10175_v48, %v10175_v48 }
 0x1ee   :  { %v8214_v21 = vld [vmem:[%s11374_s1 + $0xfa4] ss:$16 sps:$4 sm:$0xff]   ;;  %v8217_v39 = vld [vmem:[%s11374_s1 + $0xfac] ss:$16 sps:$4 sm:$0xff]   ;;  %v8212_v40 = vld [vmem:[%s11374_s1 + $0xfa0] ss:$16 sps:$4 sm:$0xff]  }
 0x1ef   :  { %5261 = vmatpush1.bf16.msra.mxu0 %v8200_v25  ;;  %5794 = vmatpush1.bf16.msra.mxu1 %v8203_v32  ;;  %v8215_v41 = vld [vmem:[%s11374_s1 + $0xfa8] ss:$16 sps:$4 sm:$0xff]   ;;  %v8220_v34 = vld [vmem:[%s11374_s1 + $0xfc4] ss:$16 sps:$4 sm:$0xff]   ;;  %v8223_v43 = vld [vmem:[%s11374_s1 + $0xfcc] ss:$16 sps:$4 sm:$0xff]  }
 0x1f0   :  { %5262 = vmatprep.subr.bf16.mxu0 %v8208_v33  ;;  %5795 = vmatprep.subr.bf16.mxu1 %v8211_v26  ;;  %v10352_v44 = vld [vmem:[%s11373_s0 + $0x10] sm:$0xff]  ;;  %v8221_v46 = vld [vmem:[%s11374_s1 + $0xfc8] ss:$16 sps:$4 sm:$0xff]   ;;  %v8229_v50 = vld [vmem:[%s11374_s1 + $0xfec] ss:$16 sps:$4 sm:$0xff]   ;;  %vm4947_vm0 = vcmask 523264  }
 0x1f1   :  { %v8218_v45 = vld [vmem:[%s11374_s1 + $0xfc0] ss:$16 sps:$4 sm:$0xff]   ;;  %v8226_v35 = vld [vmem:[%s11374_s1 + $0xfe4] ss:$16 sps:$4 sm:$0xff]   ;;  %v10368_v51 = vrot.slane %v10352_v44, %v8881_v49  ;;  %v8227_v38 = vld [vmem:[%s11374_s1 + $0xfe8] ss:$16 sps:$4 sm:$0xff]  }
 0x1f2   :  { %v8224_v53 = vld [vmem:[%s11374_s1 + $0xfe0] ss:$16 sps:$4 sm:$0xff]   ;;  %v8232_v54 = vld [vmem:[%s11374_s1 + $0x1004] ss:$16 sps:$4 sm:$0xff]   ;;  %v8235_v55 = vld [vmem:[%s11374_s1 + $0x100c] ss:$16 sps:$4 sm:$0xff]  }
 0x1f3   :  { %5263 = vmatpush1.bf16.msra.mxu0 %v8206_v36  ;;  %5796 = vmatpush1.bf16.msra.mxu1 %v8209_v37  ;;  %v955_v56 = vcombine.high %v10368_v51, %v10368_v51  ;;  %v8230_v57 = vld [vmem:[%s11374_s1 + $0x1000] ss:$16 sps:$4 sm:$0xff]   ;;  %v8233_v58 = vld [vmem:[%s11374_s1 + $0x1008] ss:$16 sps:$4 sm:$0xff]   ;;  %v8238_v59 = vld [vmem:[%s11374_s1 + $0x1024] ss:$16 sps:$4 sm:$0xff]  }
 0x1f4   :  { %5264 = vmatprep.subr.bf16.mxu0 %v8214_v21  ;;  %5797 = vmatprep.subr.bf16.mxu1 %v8217_v39  ;;  %v8241_v48 = vld [vmem:[%s11374_s1 + $0x102c] ss:$16 sps:$4 sm:$0xff]   ;;  %v8236_v61 = vld [vmem:[%s11374_s1 + $0x1020] ss:$16 sps:$4 sm:$0xff]   ;;  %v8239_v62 = vld [vmem:[%s11374_s1 + $0x1028] ss:$16 sps:$4 sm:$0xff]  }
 0x1f5   :  { %v10399_v60 = vrot.slane %v955_v56, %v8881_v49  ;;  %v8244_v63 = vld [vmem:[%s11374_s1 + $0x1044] ss:$16 sps:$4 sm:$0xff]   ;;  %v8247_v0 = vld [vmem:[%s11374_s1 + $0x104c] ss:$16 sps:$4 sm:$0xff]   ;;  %v8242_v1 = vld [vmem:[%s11374_s1 + $0x1040] ss:$16 sps:$4 sm:$0xff]  }
 0x1f6   :  { %v8245_v2 = vld [vmem:[%s11374_s1 + $0x1048] ss:$16 sps:$4 sm:$0xff]   ;;  %v8250_v3 = vld [vmem:[%s11374_s1 + $0x1064] ss:$16 sps:$4 sm:$0xff]   ;;  %v8253_v4 = vld [vmem:[%s11374_s1 + $0x106c] ss:$16 sps:$4 sm:$0xff]  }
 0x1f7   :  { %5265 = vmatpush1.bf16.msra.mxu0 %v8212_v40  ;;  %5798 = vmatpush1.bf16.msra.mxu1 %v8215_v41  ;;  %v8248_v5 = vld [vmem:[%s11374_s1 + $0x1060] ss:$16 sps:$4 sm:$0xff]   ;;  %v8251_v6 = vld [vmem:[%s11374_s1 + $0x1068] ss:$16 sps:$4 sm:$0xff]   ;;  %v8256_v7 = vld [vmem:[%s11374_s1 + $0x1084] ss:$16 sps:$4 sm:$0xff]  }
 0x1f8   :  { %5266 = vmatprep.subr.bf16.mxu0 %v8220_v34  ;;  %5799 = vmatprep.subr.bf16.mxu1 %v8223_v43  ;;  %v8259_v8 = vld [vmem:[%s11374_s1 + $0x108c] ss:$16 sps:$4 sm:$0xff]   ;;  %v8254_v9 = vld [vmem:[%s11374_s1 + $0x1080] ss:$16 sps:$4 sm:$0xff]   ;;  %v8257_v10 = vld [vmem:[%s11374_s1 + $0x1088] ss:$16 sps:$4 sm:$0xff]  }
 0x1f9   :  { %v8262_v11 = vld [vmem:[%s11374_s1 + $0x10a4] ss:$16 sps:$4 sm:$0xff]   ;;  %v8265_v12 = vld [vmem:[%s11374_s1 + $0x10ac] ss:$16 sps:$4 sm:$0xff]   ;;  %v8260_v52 = vld [vmem:[%s11374_s1 + $0x10a0] ss:$16 sps:$4 sm:$0xff]  }
 0x1fa   :  { %v8263_v15 = vld [vmem:[%s11374_s1 + $0x10a8] ss:$16 sps:$4 sm:$0xff]   ;;  %v8268_v16 = vld [vmem:[%s11374_s1 + $0x10c4] ss:$16 sps:$4 sm:$0xff]   ;;  %v8271_v17 = vld [vmem:[%s11374_s1 + $0x10cc] ss:$16 sps:$4 sm:$0xff]  }
 0x1fb   :  { %5267 = vmatpush1.bf16.msra.mxu0 %v8218_v45  ;;  %5800 = vmatpush1.bf16.msra.mxu1 %v8221_v46  ;;  %v8266_v18 = vld [vmem:[%s11374_s1 + $0x10c0] ss:$16 sps:$4 sm:$0xff]   ;;  %v8269_v19 = vld [vmem:[%s11374_s1 + $0x10c8] ss:$16 sps:$4 sm:$0xff]   ;;  %v8274_v20 = vld [vmem:[%s11374_s1 + $0x10e4] ss:$16 sps:$4 sm:$0xff]  }
 0x1fc   :  { %5268 = vmatprep.subr.bf16.mxu0 %v8226_v35  ;;  %5801 = vmatprep.subr.bf16.mxu1 %v8229_v50  ;;  %v8277_v22 = vld [vmem:[%s11374_s1 + $0x10ec] ss:$16 sps:$4 sm:$0xff]   ;;  %v8272_v23 = vld [vmem:[%s11374_s1 + $0x10e0] ss:$16 sps:$4 sm:$0xff]   ;;  %v8275_v24 = vld [vmem:[%s11374_s1 + $0x10e8] ss:$16 sps:$4 sm:$0xff]  }
 0x1fd   :  { %v8280_v13 = vld [vmem:[%s11374_s1 + $0x1104] ss:$16 sps:$4 sm:$0xff]   ;;  %v8283_v27 = vld [vmem:[%s11374_s1 + $0x110c] ss:$16 sps:$4 sm:$0xff]   ;;  %v8278_v28 = vld [vmem:[%s11374_s1 + $0x1100] ss:$16 sps:$4 sm:$0xff]  }
 0x1fe   :  { %v8281_v29 = vld [vmem:[%s11374_s1 + $0x1108] ss:$16 sps:$4 sm:$0xff]   ;;  %v8286_v14 = vld [vmem:[%s11374_s1 + $0x1124] ss:$16 sps:$4 sm:$0xff]   ;;  %v8289_v30 = vld [vmem:[%s11374_s1 + $0x112c] ss:$16 sps:$4 sm:$0xff]  }
 0x1ff   :  { %5269 = vmatpush1.bf16.msra.mxu0 %v8224_v53  ;;  %5802 = vmatpush1.bf16.msra.mxu1 %v8227_v38  ;;  %v8284_v31 = vld [vmem:[%s11374_s1 + $0x1120] ss:$16 sps:$4 sm:$0xff]   ;;  %v8287_v25 = vld [vmem:[%s11374_s1 + $0x1128] ss:$16 sps:$4 sm:$0xff]   ;;  %v8292_v32 = vld [vmem:[%s11374_s1 + $0x1144] ss:$16 sps:$4 sm:$0xff]  }
 0x200   :  { %5279 = vmatprep.subr.bf16.mxu0 %v8232_v54  ;;  %5812 = vmatprep.subr.bf16.mxu1 %v8235_v55  ;;  %v8295_v33 = vld [vmem:[%s11374_s1 + $0x114c] ss:$16 sps:$4 sm:$0xff]   ;;  %v8290_v26 = vld [vmem:[%s11374_s1 + $0x1140] ss:$16 sps:$4 sm:$0xff]   ;;  %v8293_v36 = vld [vmem:[%s11374_s1 + $0x1148] ss:$16 sps:$4 sm:$0xff]  }
 0x201   :  { %v8298_v37 = vld [vmem:[%s11374_s1 + $0x1164] ss:$16 sps:$4 sm:$0xff]   ;;  %v8301_v21 = vld [vmem:[%s11374_s1 + $0x116c] ss:$16 sps:$4 sm:$0xff]   ;;  %v8296_v39 = vld [vmem:[%s11374_s1 + $0x1160] ss:$16 sps:$4 sm:$0xff]  }
 0x202   :  { %5271 = vmatmul.mubr.bf16.vlgmr.msra.gmra.mrb[0].mxu0 %v937_v47  ;;  %5804 = vmatmul.mubr.bf16.vlgmr.msra.gmra.mrb[0].mxu1 %v937_v47  ;;  %v8299_v40 = vld [vmem:[%s11374_s1 + $0x1168] ss:$16 sps:$4 sm:$0xff]   ;;  %v8304_v41 = vld [vmem:[%s11374_s1 + $0x1184] ss:$16 sps:$4 sm:$0xff]   ;;  %v8307_v34 = vld [vmem:[%s11374_s1 + $0x118c] ss:$16 sps:$4 sm:$0xff]  }
 0x203   :  { %5280 = vmatpush1.bf16.msra.mxu0 %v8230_v57  ;;  %5813 = vmatpush1.bf16.msra.mxu1 %v8233_v58  ;;  %v8302_v43 = vld [vmem:[%s11374_s1 + $0x1180] ss:$16 sps:$4 sm:$0xff]   ;;  %v8305_v45 = vld [vmem:[%s11374_s1 + $0x1188] ss:$16 sps:$4 sm:$0xff]   ;;  %v8310_v46 = vld [vmem:[%s11374_s1 + $0x11a4] ss:$16 sps:$4 sm:$0xff]  }
 0x204   :  { %5281 = vmatprep.subr.bf16.mxu0 %v8238_v59  ;;  %5814 = vmatprep.subr.bf16.mxu1 %v8241_v48  ;;  %v8313_v35 = vld [vmem:[%s11374_s1 + $0x11ac] ss:$16 sps:$4 sm:$0xff]   ;;  %v8308_v50 = vld [vmem:[%s11374_s1 + $0x11a0] ss:$16 sps:$4 sm:$0xff]   ;;  %v8311_v53 = vld [vmem:[%s11374_s1 + $0x11a8] ss:$16 sps:$4 sm:$0xff]  }
 0x205   :  { %5311 = vmatprep.mubr.bf16.mxu0 %v10399_v60  ;;  %5844 = vmatprep.mubr.bf16.mxu1 %v10399_v60  ;;  %v8316_v38 = vld [vmem:[%s11374_s1 + $0x11c4] ss:$16 sps:$4 sm:$0xff]   ;;  %v8319_v54 = vld [vmem:[%s11374_s1 + $0x11cc] ss:$16 sps:$4 sm:$0xff]   ;;  %v8314_v55 = vld [vmem:[%s11374_s1 + $0x11c0] ss:$16 sps:$4 sm:$0xff]  }
 0x206   :  { %v8317_v56 = vld [vmem:[%s11374_s1 + $0x11c8] ss:$16 sps:$4 sm:$0xff]   ;;  %v8322_v47 = vld [vmem:[%s11374_s1 + $0x11e4] ss:$16 sps:$4 sm:$0xff]   ;;  %v8325_v57 = vld [vmem:[%s11374_s1 + $0x11ec] ss:$16 sps:$4 sm:$0xff]  }
 0x207   :  { %5282 = vmatpush1.bf16.msra.mxu0 %v8236_v61  ;;  %5815 = vmatpush1.bf16.msra.mxu1 %v8239_v62  ;;  %v8320_v58 = vld [vmem:[%s11374_s1 + $0x11e0] ss:$16 sps:$4 sm:$0xff]   ;;  %v8323_v59 = vld [vmem:[%s11374_s1 + $0x11e8] ss:$16 sps:$4 sm:$0xff]   ;;  %v8328_v48 = vld [vmem:[%s11374_s1 + $0x1204] ss:$16 sps:$4 sm:$0xff]   ;;  %v10585_v62 = vrot.slane %v10368_v51, %v8881_v49 }
 0x208   :  { %5283 = vmatprep.subr.bf16.mxu0 %v8244_v63  ;;  %5816 = vmatprep.subr.bf16.mxu1 %v8247_v0  ;;  %v8331_v61 = vld [vmem:[%s11374_s1 + $0x120c] ss:$16 sps:$4 sm:$0xff]   ;;  %v8326_v63 = vld [vmem:[%s11374_s1 + $0x1200] ss:$16 sps:$4 sm:$0xff]   ;;  %v8329_v0 = vld [vmem:[%s11374_s1 + $0x1208] ss:$16 sps:$4 sm:$0xff]  }
 0x209   :  { %v8337_v51 = vld [vmem:[%s11374_s1 + $0x122c] ss:$16 sps:$4 sm:$0xff]   ;;  %vm8704_vm1 = vmmov 0   ;;  %s8705_s15 = smov [#allocation2]   ;;  %vm6452_vm2 = vcmask 41984  }
 0x20b   :  { %5284 = vmatpush1.bf16.msra.mxu0 %v8242_v1  ;;  %5817 = vmatpush1.bf16.msra.mxu1 %v8245_v2  ;;  %v8334_v1 = vld [vmem:[%s11374_s1 + $0x1224] ss:$16 sps:$4 sm:$0xff]   ;;  %v987_v2 = vcombine.high %v10399_v60, %v10399_v60 }
 0x20c   :  { %5285 = vmatprep.subr.bf16.mxu0 %v8250_v3  ;;  %5818 = vmatprep.subr.bf16.mxu1 %v8253_v4  ;;  %v8332_v3 = vld [vmem:[%s11374_s1 + $0x1220] ss:$16 sps:$4 sm:$0xff]   ;;  %v8335_v4 = vld [vmem:[%s11374_s1 + $0x1228] ss:$16 sps:$4 sm:$0xff]   ;;  %v8340_v60 = vld [vmem:[%s11374_s1 + $0x1244] ss:$16 sps:$4 sm:$0xff]  }
 0x20f   :  { %5286 = vmatpush1.bf16.msra.mxu0 %v8248_v5  ;;  %5819 = vmatpush1.bf16.msra.mxu1 %v8251_v6  ;;  %v8343_v5 = vld [vmem:[%s11374_s1 + $0x124c] ss:$16 sps:$4 sm:$0xff]   ;;  %v8338_v6 = vld [vmem:[%s11374_s1 + $0x1240] ss:$16 sps:$4 sm:$0xff]  }
 0x210   :  { %5287 = vmatprep.subr.bf16.mxu0 %v8256_v7  ;;  %5820 = vmatprep.subr.bf16.mxu1 %v8259_v8  ;;  %v8341_v7 = vld [vmem:[%s11374_s1 + $0x1248] ss:$16 sps:$4 sm:$0xff]   ;;  %v8346_v8 = vld [vmem:[%s11374_s1 + $0x1264] ss:$16 sps:$4 sm:$0xff]  }
 0x213   :  { %5288 = vmatpush1.bf16.msra.mxu0 %v8254_v9  ;;  %5821 = vmatpush1.bf16.msra.mxu1 %v8257_v10  ;;  %v8349_v9 = vld [vmem:[%s11374_s1 + $0x126c] ss:$16 sps:$4 sm:$0xff]   ;;  %v8344_v10 = vld [vmem:[%s11374_s1 + $0x1260] ss:$16 sps:$4 sm:$0xff]  }
 0x214   :  { %5289 = vmatprep.subr.bf16.mxu0 %v8262_v11  ;;  %5822 = vmatprep.subr.bf16.mxu1 %v8265_v12  ;;  %v8347_v11 = vld [vmem:[%s11374_s1 + $0x1268] ss:$16 sps:$4 sm:$0xff]   ;;  %v8352_v12 = vld [vmem:[%s11374_s1 + $0x1284] ss:$16 sps:$4 sm:$0xff]  }
 0x217   :  { %5290 = vmatpush1.bf16.msra.mxu0 %v8260_v52  ;;  %5823 = vmatpush1.bf16.msra.mxu1 %v8263_v15  ;;  %v8355_v52 = vld [vmem:[%s11374_s1 + $0x128c] ss:$16 sps:$4 sm:$0xff]   ;;  %v8350_v15 = vld [vmem:[%s11374_s1 + $0x1280] ss:$16 sps:$4 sm:$0xff]  }
 0x218   :  { %5291 = vmatprep.subr.bf16.mxu0 %v8268_v16  ;;  %5824 = vmatprep.subr.bf16.mxu1 %v8271_v17  ;;  %v8353_v16 = vld [vmem:[%s11374_s1 + $0x1288] ss:$16 sps:$4 sm:$0xff]   ;;  %v8358_v17 = vld [vmem:[%s11374_s1 + $0x12a4] ss:$16 sps:$4 sm:$0xff]  }
 0x21b   :  { %5292 = vmatpush1.bf16.msra.mxu0 %v8266_v18  ;;  %5825 = vmatpush1.bf16.msra.mxu1 %v8269_v19  ;;  %v8361_v18 = vld [vmem:[%s11374_s1 + $0x12ac] ss:$16 sps:$4 sm:$0xff]   ;;  %v8356_v19 = vld [vmem:[%s11374_s1 + $0x12a0] ss:$16 sps:$4 sm:$0xff]  }
 0x21c   :  { %5293 = vmatprep.subr.bf16.mxu0 %v8274_v20  ;;  %5826 = vmatprep.subr.bf16.mxu1 %v8277_v22  ;;  %v8359_v20 = vld [vmem:[%s11374_s1 + $0x12a8] ss:$16 sps:$4 sm:$0xff]   ;;  %v8364_v22 = vld [vmem:[%s11374_s1 + $0x12c4] ss:$16 sps:$4 sm:$0xff]  }
 0x21f   :  { %5294 = vmatpush1.bf16.msra.mxu0 %v8272_v23  ;;  %5827 = vmatpush1.bf16.msra.mxu1 %v8275_v24  ;;  %v8367_v23 = vld [vmem:[%s11374_s1 + $0x12cc] ss:$16 sps:$4 sm:$0xff]   ;;  %v8362_v24 = vld [vmem:[%s11374_s1 + $0x12c0] ss:$16 sps:$4 sm:$0xff]  }
 0x220   :  { %5295 = vmatprep.subr.bf16.mxu0 %v8280_v13  ;;  %5828 = vmatprep.subr.bf16.mxu1 %v8283_v27  ;;  %v8365_v13 = vld [vmem:[%s11374_s1 + $0x12c8] ss:$16 sps:$4 sm:$0xff]   ;;  %v8370_v27 = vld [vmem:[%s11374_s1 + $0x12e4] ss:$16 sps:$4 sm:$0xff]  }
 0x223   :  { %5296 = vmatpush1.bf16.msra.mxu0 %v8278_v28  ;;  %5829 = vmatpush1.bf16.msra.mxu1 %v8281_v29  ;;  %v8373_v28 = vld [vmem:[%s11374_s1 + $0x12ec] ss:$16 sps:$4 sm:$0xff]   ;;  %v8368_v29 = vld [vmem:[%s11374_s1 + $0x12e0] ss:$16 sps:$4 sm:$0xff]  }
 0x224   :  { %5297 = vmatprep.subr.bf16.mxu0 %v8286_v14  ;;  %5830 = vmatprep.subr.bf16.mxu1 %v8289_v30  ;;  %v8371_v14 = vld [vmem:[%s11374_s1 + $0x12e8] ss:$16 sps:$4 sm:$0xff]   ;;  %v8376_v30 = vld [vmem:[%s11374_s1 + $0x1304] ss:$16 sps:$4 sm:$0xff]  }
 0x227   :  { %5298 = vmatpush1.bf16.msra.mxu0 %v8284_v31  ;;  %5831 = vmatpush1.bf16.msra.mxu1 %v8287_v25  ;;  %v8379_v31 = vld [vmem:[%s11374_s1 + $0x130c] ss:$16 sps:$4 sm:$0xff]   ;;  %v8374_v25 = vld [vmem:[%s11374_s1 + $0x1300] ss:$16 sps:$4 sm:$0xff]  }
 0x228   :  { %5299 = vmatprep.subr.bf16.mxu0 %v8292_v32  ;;  %5832 = vmatprep.subr.bf16.mxu1 %v8295_v33  ;;  %v8377_v32 = vld [vmem:[%s11374_s1 + $0x1308] ss:$16 sps:$4 sm:$0xff]   ;;  %v8382_v33 = vld [vmem:[%s11374_s1 + $0x1324] ss:$16 sps:$4 sm:$0xff]  }
 0x22b   :  { %5300 = vmatpush1.bf16.msra.mxu0 %v8290_v26  ;;  %5833 = vmatpush1.bf16.msra.mxu1 %v8293_v36  ;;  %v8385_v26 = vld [vmem:[%s11374_s1 + $0x132c] ss:$16 sps:$4 sm:$0xff]   ;;  %v8380_v36 = vld [vmem:[%s11374_s1 + $0x1320] ss:$16 sps:$4 sm:$0xff]  }
 0x22c   :  { %5301 = vmatprep.subr.bf16.mxu0 %v8298_v37  ;;  %5834 = vmatprep.subr.bf16.mxu1 %v8301_v21  ;;  %v8383_v37 = vld [vmem:[%s11374_s1 + $0x1328] ss:$16 sps:$4 sm:$0xff]   ;;  %v8388_v21 = vld [vmem:[%s11374_s1 + $0x1344] ss:$16 sps:$4 sm:$0xff]  }
 0x22f   :  { %5302 = vmatpush1.bf16.msra.mxu0 %v8296_v39  ;;  %5835 = vmatpush1.bf16.msra.mxu1 %v8299_v40  ;;  %v8391_v39 = vld [vmem:[%s11374_s1 + $0x134c] ss:$16 sps:$4 sm:$0xff]   ;;  %v8386_v40 = vld [vmem:[%s11374_s1 + $0x1340] ss:$16 sps:$4 sm:$0xff]  }
 0x230   :  { %5303 = vmatprep.subr.bf16.mxu0 %v8304_v41  ;;  %5836 = vmatprep.subr.bf16.mxu1 %v8307_v34  ;;  %v8389_v41 = vld [vmem:[%s11374_s1 + $0x1348] ss:$16 sps:$4 sm:$0xff]   ;;  %v8394_v34 = vld [vmem:[%s11374_s1 + $0x1364] ss:$16 sps:$4 sm:$0xff]  }
 0x233   :  { %5304 = vmatpush1.bf16.msra.mxu0 %v8302_v43  ;;  %5837 = vmatpush1.bf16.msra.mxu1 %v8305_v45  ;;  %v8397_v43 = vld [vmem:[%s11374_s1 + $0x136c] ss:$16 sps:$4 sm:$0xff]   ;;  %v8392_v45 = vld [vmem:[%s11374_s1 + $0x1360] ss:$16 sps:$4 sm:$0xff]  }
 0x234   :  { %5305 = vmatprep.subr.bf16.mxu0 %v8310_v46  ;;  %5838 = vmatprep.subr.bf16.mxu1 %v8313_v35  ;;  %v8395_v46 = vld [vmem:[%s11374_s1 + $0x1368] ss:$16 sps:$4 sm:$0xff]   ;;  %v8400_v35 = vld [vmem:[%s11374_s1 + $0x1384] ss:$16 sps:$4 sm:$0xff]  }
 0x237   :  { %5306 = vmatpush1.bf16.msra.mxu0 %v8308_v50  ;;  %5839 = vmatpush1.bf16.msra.mxu1 %v8311_v53  ;;  %v8403_v50 = vld [vmem:[%s11374_s1 + $0x138c] ss:$16 sps:$4 sm:$0xff]   ;;  %v8398_v53 = vld [vmem:[%s11374_s1 + $0x1380] ss:$16 sps:$4 sm:$0xff]  }
 0x238   :  { %5307 = vmatprep.subr.bf16.mxu0 %v8316_v38  ;;  %5840 = vmatprep.subr.bf16.mxu1 %v8319_v54  ;;  %v8401_v38 = vld [vmem:[%s11374_s1 + $0x1388] ss:$16 sps:$4 sm:$0xff]   ;;  %v8406_v54 = vld [vmem:[%s11374_s1 + $0x13a4] ss:$16 sps:$4 sm:$0xff]  }
 0x23b   :  { %5308 = vmatpush1.bf16.msra.mxu0 %v8314_v55  ;;  %5841 = vmatpush1.bf16.msra.mxu1 %v8317_v56  ;;  %v8409_v55 = vld [vmem:[%s11374_s1 + $0x13ac] ss:$16 sps:$4 sm:$0xff]   ;;  %v8404_v56 = vld [vmem:[%s11374_s1 + $0x13a0] ss:$16 sps:$4 sm:$0xff]  }
 0x23c   :  { %5309 = vmatprep.subr.bf16.mxu0 %v8322_v47  ;;  %5842 = vmatprep.subr.bf16.mxu1 %v8325_v57  ;;  %v8407_v47 = vld [vmem:[%s11374_s1 + $0x13a8] ss:$16 sps:$4 sm:$0xff]   ;;  %v8412_v57 = vld [vmem:[%s11374_s1 + $0x13c4] ss:$16 sps:$4 sm:$0xff]  }
 0x23f   :  { %5310 = vmatpush1.bf16.msra.mxu0 %v8320_v58  ;;  %5843 = vmatpush1.bf16.msra.mxu1 %v8323_v59  ;;  %v8415_v58 = vld [vmem:[%s11374_s1 + $0x13cc] ss:$16 sps:$4 sm:$0xff]   ;;  %v940_v59 = vcombine.high %v10352_v44, %v10352_v44 }
 0x240   :  { %5320 = vmatprep.subr.bf16.mxu0 %v8328_v48  ;;  %5853 = vmatprep.subr.bf16.mxu1 %v8331_v61  ;;  %v8410_v48 = vld [vmem:[%s11374_s1 + $0x13c0] ss:$16 sps:$4 sm:$0xff]   ;;  %v8413_v61 = vld [vmem:[%s11374_s1 + $0x13c8] ss:$16 sps:$4 sm:$0xff]   ;;  %v8421_v44 = vld [vmem:[%s11374_s1 + $0x13ec] ss:$16 sps:$4 sm:$0xff]  }
 0x242   :  { %5312 = vmatmul.mubr.bf16.vlgmr.msra.gmra.mrb[0].mxu0 %v10585_v62  ;;  %5845 = vmatmul.mubr.bf16.vlgmr.msra.gmra.mrb[0].mxu1 %v10585_v62 }
 0x243   :  { %5321 = vmatpush1.bf16.msra.mxu0 %v8326_v63  ;;  %5854 = vmatpush1.bf16.msra.mxu1 %v8329_v0  ;;  %v8418_v63 = vld [vmem:[%s11374_s1 + $0x13e4] ss:$16 sps:$4 sm:$0xff]   ;;  %v10774_v0 = vrot.slane %v940_v59, %v8881_v49  ;;  %v8497_v59 = vld [vmem:[%s11374_s1 + $0x1588] ss:$16 sps:$4 sm:$0xff]  }
 0x244   :  { %5322 = vmatprep.subr.bf16.mxu0 %v8334_v1  ;;  %5855 = vmatprep.subr.bf16.mxu1 %v8337_v51  ;;  %v8416_v1 = vld [vmem:[%s11374_s1 + $0x13e0] ss:$16 sps:$4 sm:$0xff]   ;;  %v8419_v51 = vld [vmem:[%s11374_s1 + $0x13e8] ss:$16 sps:$4 sm:$0xff]  }
 0x245   :  { %5352 = vmatprep.mubr.bf16.mxu0 %v987_v2  ;;  %5885 = vmatprep.mubr.bf16.mxu1 %v987_v2  ;;  %v8424_v2 = vld [vmem:[%s11374_s1 + $0x1404] ss:$16 sps:$4 sm:$0xff]  }
 0x247   :  { %5323 = vmatpush1.bf16.msra.mxu0 %v8332_v3  ;;  %5856 = vmatpush1.bf16.msra.mxu1 %v8335_v4  ;;  %v8427_v3 = vld [vmem:[%s11374_s1 + $0x140c] ss:$16 sps:$4 sm:$0xff]   ;;  %v956_v4 = vcombine.high %v10774_v0, %v10774_v0 }
 0x248   :  { %5324 = vmatprep.subr.bf16.mxu0 %v8340_v60  ;;  %5857 = vmatprep.subr.bf16.mxu1 %v8343_v5  ;;  %v985_v60 = vcombine.high %v10585_v62, %v10585_v62  ;;  %v8422_v5 = vld [vmem:[%s11374_s1 + $0x1400] ss:$16 sps:$4 sm:$0xff]   ;;  %v8433_v62 = vld [vmem:[%s11374_s1 + $0x142c] ss:$16 sps:$4 sm:$0xff]  }
 0x24b   :  { %5325 = vmatpush1.bf16.msra.mxu0 %v8338_v6  ;;  %5858 = vmatpush1.bf16.msra.mxu1 %v8341_v7  ;;  %v8425_v6 = vld [vmem:[%s11374_s1 + $0x1408] ss:$16 sps:$4 sm:$0xff]   ;;  %v8430_v7 = vld [vmem:[%s11374_s1 + $0x1424] ss:$16 sps:$4 sm:$0xff]  }
 0x24c   :  { %5326 = vmatprep.subr.bf16.mxu0 %v8346_v8  ;;  %5859 = vmatprep.subr.bf16.mxu1 %v8349_v9  ;;  %v10805_v8 = vrot.slane %v956_v4, %v8881_v49  ;;  %v8428_v9 = vld [vmem:[%s11374_s1 + $0x1420] ss:$16 sps:$4 sm:$0xff]   ;;  %v8514_v4 = vld [vmem:[%s11374_s1 + $0x15e4] ss:$16 sps:$4 sm:$0xff]  }
 0x24f   :  { %5327 = vmatpush1.bf16.msra.mxu0 %v8344_v10  ;;  %5860 = vmatpush1.bf16.msra.mxu1 %v8347_v11  ;;  %v8431_v10 = vld [vmem:[%s11374_s1 + $0x1428] ss:$16 sps:$4 sm:$0xff]   ;;  %v8436_v11 = vld [vmem:[%s11374_s1 + $0x1444] ss:$16 sps:$4 sm:$0xff]  }
 0x250   :  { %5328 = vmatprep.subr.bf16.mxu0 %v8352_v12  ;;  %5861 = vmatprep.subr.bf16.mxu1 %v8355_v52  ;;  %v8439_v12 = vld [vmem:[%s11374_s1 + $0x144c] ss:$16 sps:$4 sm:$0xff]   ;;  %v8434_v52 = vld [vmem:[%s11374_s1 + $0x1440] ss:$16 sps:$4 sm:$0xff]  }
 0x253   :  { %5329 = vmatpush1.bf16.msra.mxu0 %v8350_v15  ;;  %5862 = vmatpush1.bf16.msra.mxu1 %v8353_v16  ;;  %v8437_v15 = vld [vmem:[%s11374_s1 + $0x1448] ss:$16 sps:$4 sm:$0xff]   ;;  %v8442_v16 = vld [vmem:[%s11374_s1 + $0x1464] ss:$16 sps:$4 sm:$0xff]  }
 0x254   :  { %5330 = vmatprep.subr.bf16.mxu0 %v8358_v17  ;;  %5863 = vmatprep.subr.bf16.mxu1 %v8361_v18  ;;  %v8445_v17 = vld [vmem:[%s11374_s1 + $0x146c] ss:$16 sps:$4 sm:$0xff]   ;;  %v8440_v18 = vld [vmem:[%s11374_s1 + $0x1460] ss:$16 sps:$4 sm:$0xff]  }
 0x257   :  { %5331 = vmatpush1.bf16.msra.mxu0 %v8356_v19  ;;  %5864 = vmatpush1.bf16.msra.mxu1 %v8359_v20  ;;  %v8443_v19 = vld [vmem:[%s11374_s1 + $0x1468] ss:$16 sps:$4 sm:$0xff]   ;;  %v8448_v20 = vld [vmem:[%s11374_s1 + $0x1484] ss:$16 sps:$4 sm:$0xff]  }
 0x258   :  { %5332 = vmatprep.subr.bf16.mxu0 %v8364_v22  ;;  %5865 = vmatprep.subr.bf16.mxu1 %v8367_v23  ;;  %v8451_v22 = vld [vmem:[%s11374_s1 + $0x148c] ss:$16 sps:$4 sm:$0xff]   ;;  %v8446_v23 = vld [vmem:[%s11374_s1 + $0x1480] ss:$16 sps:$4 sm:$0xff]  }
 0x25b   :  { %5333 = vmatpush1.bf16.msra.mxu0 %v8362_v24  ;;  %5866 = vmatpush1.bf16.msra.mxu1 %v8365_v13  ;;  %v8449_v24 = vld [vmem:[%s11374_s1 + $0x1488] ss:$16 sps:$4 sm:$0xff]   ;;  %v8454_v13 = vld [vmem:[%s11374_s1 + $0x14a4] ss:$16 sps:$4 sm:$0xff]  }
 0x25c   :  { %5334 = vmatprep.subr.bf16.mxu0 %v8370_v27  ;;  %5867 = vmatprep.subr.bf16.mxu1 %v8373_v28  ;;  %v8457_v27 = vld [vmem:[%s11374_s1 + $0x14ac] ss:$16 sps:$4 sm:$0xff]   ;;  %v8452_v28 = vld [vmem:[%s11374_s1 + $0x14a0] ss:$16 sps:$4 sm:$0xff]  }
 0x25f   :  { %5335 = vmatpush1.bf16.msra.mxu0 %v8368_v29  ;;  %5868 = vmatpush1.bf16.msra.mxu1 %v8371_v14  ;;  %v8455_v29 = vld [vmem:[%s11374_s1 + $0x14a8] ss:$16 sps:$4 sm:$0xff]   ;;  %v8460_v14 = vld [vmem:[%s11374_s1 + $0x14c4] ss:$16 sps:$4 sm:$0xff]  }
 0x260   :  { %5336 = vmatprep.subr.bf16.mxu0 %v8376_v30  ;;  %5869 = vmatprep.subr.bf16.mxu1 %v8379_v31  ;;  %v8463_v30 = vld [vmem:[%s11374_s1 + $0x14cc] ss:$16 sps:$4 sm:$0xff]   ;;  %v8458_v31 = vld [vmem:[%s11374_s1 + $0x14c0] ss:$16 sps:$4 sm:$0xff]  }
 0x263   :  { %5337 = vmatpush1.bf16.msra.mxu0 %v8374_v25  ;;  %5870 = vmatpush1.bf16.msra.mxu1 %v8377_v32  ;;  %v8461_v25 = vld [vmem:[%s11374_s1 + $0x14c8] ss:$16 sps:$4 sm:$0xff]   ;;  %v8466_v32 = vld [vmem:[%s11374_s1 + $0x14e4] ss:$16 sps:$4 sm:$0xff]  }
 0x264   :  { %5338 = vmatprep.subr.bf16.mxu0 %v8382_v33  ;;  %5871 = vmatprep.subr.bf16.mxu1 %v8385_v26  ;;  %v8469_v33 = vld [vmem:[%s11374_s1 + $0x14ec] ss:$16 sps:$4 sm:$0xff]   ;;  %v8464_v26 = vld [vmem:[%s11374_s1 + $0x14e0] ss:$16 sps:$4 sm:$0xff]  }
 0x267   :  { %5339 = vmatpush1.bf16.msra.mxu0 %v8380_v36  ;;  %5872 = vmatpush1.bf16.msra.mxu1 %v8383_v37  ;;  %v8467_v36 = vld [vmem:[%s11374_s1 + $0x14e8] ss:$16 sps:$4 sm:$0xff]   ;;  %v8472_v37 = vld [vmem:[%s11374_s1 + $0x1504] ss:$16 sps:$4 sm:$0xff]  }
 0x268   :  { %5340 = vmatprep.subr.bf16.mxu0 %v8388_v21  ;;  %5873 = vmatprep.subr.bf16.mxu1 %v8391_v39  ;;  %v8475_v21 = vld [vmem:[%s11374_s1 + $0x150c] ss:$16 sps:$4 sm:$0xff]   ;;  %v8470_v39 = vld [vmem:[%s11374_s1 + $0x1500] ss:$16 sps:$4 sm:$0xff]  }
 0x26b   :  { %5341 = vmatpush1.bf16.msra.mxu0 %v8386_v40  ;;  %5874 = vmatpush1.bf16.msra.mxu1 %v8389_v41  ;;  %v8473_v40 = vld [vmem:[%s11374_s1 + $0x1508] ss:$16 sps:$4 sm:$0xff]   ;;  %v8478_v41 = vld [vmem:[%s11374_s1 + $0x1524] ss:$16 sps:$4 sm:$0xff]  }
 0x26c   :  { %5342 = vmatprep.subr.bf16.mxu0 %v8394_v34  ;;  %5875 = vmatprep.subr.bf16.mxu1 %v8397_v43  ;;  %v8481_v34 = vld [vmem:[%s11374_s1 + $0x152c] ss:$16 sps:$4 sm:$0xff]   ;;  %v8476_v43 = vld [vmem:[%s11374_s1 + $0x1520] ss:$16 sps:$4 sm:$0xff]  }
 0x26f   :  { %5343 = vmatpush1.bf16.msra.mxu0 %v8392_v45  ;;  %5876 = vmatpush1.bf16.msra.mxu1 %v8395_v46  ;;  %v8479_v45 = vld [vmem:[%s11374_s1 + $0x1528] ss:$16 sps:$4 sm:$0xff]   ;;  %v8484_v46 = vld [vmem:[%s11374_s1 + $0x1544] ss:$16 sps:$4 sm:$0xff]  }
 0x270   :  { %5344 = vmatprep.subr.bf16.mxu0 %v8400_v35  ;;  %5877 = vmatprep.subr.bf16.mxu1 %v8403_v50  ;;  %v8487_v35 = vld [vmem:[%s11374_s1 + $0x154c] ss:$16 sps:$4 sm:$0xff]   ;;  %v8482_v50 = vld [vmem:[%s11374_s1 + $0x1540] ss:$16 sps:$4 sm:$0xff]  }
 0x273   :  { %5345 = vmatpush1.bf16.msra.mxu0 %v8398_v53  ;;  %5878 = vmatpush1.bf16.msra.mxu1 %v8401_v38  ;;  %v8485_v53 = vld [vmem:[%s11374_s1 + $0x1548] ss:$16 sps:$4 sm:$0xff]   ;;  %v8490_v38 = vld [vmem:[%s11374_s1 + $0x1564] ss:$16 sps:$4 sm:$0xff]  }
 0x274   :  { %5346 = vmatprep.subr.bf16.mxu0 %v8406_v54  ;;  %5879 = vmatprep.subr.bf16.mxu1 %v8409_v55  ;;  %v8493_v54 = vld [vmem:[%s11374_s1 + $0x156c] ss:$16 sps:$4 sm:$0xff]   ;;  %v8488_v55 = vld [vmem:[%s11374_s1 + $0x1560] ss:$16 sps:$4 sm:$0xff]  }
 0x277   :  { %5347 = vmatpush1.bf16.msra.mxu0 %v8404_v56  ;;  %5880 = vmatpush1.bf16.msra.mxu1 %v8407_v47  ;;  %v8491_v56 = vld [vmem:[%s11374_s1 + $0x1568] ss:$16 sps:$4 sm:$0xff]   ;;  %v8496_v47 = vld [vmem:[%s11374_s1 + $0x1584] ss:$16 sps:$4 sm:$0xff]  }
 0x278   :  { %5348 = vmatprep.subr.bf16.mxu0 %v8412_v57  ;;  %5881 = vmatprep.subr.bf16.mxu1 %v8415_v58  ;;  %v8499_v57 = vld [vmem:[%s11374_s1 + $0x158c] ss:$16 sps:$4 sm:$0xff]   ;;  %v8494_v58 = vld [vmem:[%s11374_s1 + $0x1580] ss:$16 sps:$4 sm:$0xff]  }
 0x27b   :  { %5349 = vmatpush1.bf16.msra.mxu0 %v8410_v48  ;;  %5882 = vmatpush1.bf16.msra.mxu1 %v8413_v61  ;;  %v8502_v48 = vld [vmem:[%s11374_s1 + $0x15a4] ss:$16 sps:$4 sm:$0xff]   ;;  %v8505_v61 = vld [vmem:[%s11374_s1 + $0x15ac] ss:$16 sps:$4 sm:$0xff]  }
 0x27c   :  { %5350 = vmatprep.subr.bf16.mxu0 %v8418_v63  ;;  %5883 = vmatprep.subr.bf16.mxu1 %v8421_v44  ;;  %v8500_v63 = vld [vmem:[%s11374_s1 + $0x15a0] ss:$16 sps:$4 sm:$0xff]   ;;  %v8503_v44 = vld [vmem:[%s11374_s1 + $0x15a8] ss:$16 sps:$4 sm:$0xff]  }
 0x27f   :  { %5351 = vmatpush1.bf16.msra.mxu0 %v8416_v1  ;;  %5884 = vmatpush1.bf16.msra.mxu1 %v8419_v51  ;;  %v8508_v1 = vld [vmem:[%s11374_s1 + $0x15c4] ss:$16 sps:$4 sm:$0xff]   ;;  %v8511_v51 = vld [vmem:[%s11374_s1 + $0x15cc] ss:$16 sps:$4 sm:$0xff]  }
 0x280   :  { %5361 = vmatprep.subr.bf16.mxu0 %v8424_v2  ;;  %5894 = vmatprep.subr.bf16.mxu1 %v8427_v3  ;;  %v8506_v2 = vld [vmem:[%s11374_s1 + $0x15c0] ss:$16 sps:$4 sm:$0xff]   ;;  %v8509_v3 = vld [vmem:[%s11374_s1 + $0x15c8] ss:$16 sps:$4 sm:$0xff]  }
 0x282   :  { %5353 = vmatmul.mubr.bf16.vlgmr.msra.gmra.mrb[0].mxu0 %v985_v60  ;;  %5886 = vmatmul.mubr.bf16.vlgmr.msra.gmra.mrb[0].mxu1 %v985_v60  ;;  %v8517_v60 = vld [vmem:[%s11374_s1 + $0x15ec] ss:$16 sps:$4 sm:$0xff]  }
 0x283   :  { %5362 = vmatpush1.bf16.msra.mxu0 %v8422_v5  ;;  %5895 = vmatpush1.bf16.msra.mxu1 %v8425_v6  ;;  %v8512_v5 = vld [vmem:[%s11374_s1 + $0x15e0] ss:$16 sps:$4 sm:$0xff]   ;;  %v8515_v6 = vld [vmem:[%s11374_s1 + $0x15e8] ss:$16 sps:$4 sm:$0xff]  }
 0x284   :  { %5363 = vmatprep.subr.bf16.mxu0 %v8430_v7  ;;  %5896 = vmatprep.subr.bf16.mxu1 %v8433_v62  ;;  %v8521_v7 = vld [vmem:[%s11374_s1 + $0x1604] ss:$16 sps:$4 sm:$0xff]   ;;  %v8524_v62 = vld [vmem:[%s11374_s1 + $0x160c] ss:$16 sps:$4 sm:$0xff]  }
 0x285   :  { %5393 = vmatprep.mubr.bf16.mxu0 %v10805_v8  ;;  %5926 = vmatprep.mubr.bf16.mxu1 %v10805_v8 }
 0x287   :  { %5364 = vmatpush1.bf16.msra.mxu0 %v8428_v9  ;;  %5897 = vmatpush1.bf16.msra.mxu1 %v8431_v10  ;;  %v10991_v9 = vrot.slane %v10774_v0, %v8881_v49  ;;  %v8519_v10 = vld [vmem:[%s11374_s1 + $0x1600] ss:$16 sps:$4 sm:$0xff]   ;;  %v8530_v0 = vld [vmem:[%s11374_s1 + $0x162c] ss:$16 sps:$4 sm:$0xff]  }
 0x288   :  { %5365 = vmatprep.subr.bf16.mxu0 %v8436_v11  ;;  %5898 = vmatprep.subr.bf16.mxu1 %v8439_v12  ;;  %v8522_v11 = vld [vmem:[%s11374_s1 + $0x1608] ss:$16 sps:$4 sm:$0xff]   ;;  %v8527_v12 = vld [vmem:[%s11374_s1 + $0x1624] ss:$16 sps:$4 sm:$0xff]  }
 0x28b   :  { %5366 = vmatpush1.bf16.msra.mxu0 %v8434_v52  ;;  %5899 = vmatpush1.bf16.msra.mxu1 %v8437_v15  ;;  %v988_v52 = vcombine.high %v10805_v8, %v10805_v8  ;;  %v8525_v15 = vld [vmem:[%s11374_s1 + $0x1620] ss:$16 sps:$4 sm:$0xff]   ;;  %v8533_v8 = vld [vmem:[%s11374_s1 + $0x1644] ss:$16 sps:$4 sm:$0xff]  }
 0x28c   :  { %5367 = vmatprep.subr.bf16.mxu0 %v8442_v16  ;;  %5900 = vmatprep.subr.bf16.mxu1 %v8445_v17  ;;  %v8528_v16 = vld [vmem:[%s11374_s1 + $0x1628] ss:$16 sps:$4 sm:$0xff]   ;;  %v8536_v17 = vld [vmem:[%s11374_s1 + $0x164c] ss:$16 sps:$4 sm:$0xff]  }
 0x28f   :  { %5368 = vmatpush1.bf16.msra.mxu0 %v8440_v18  ;;  %5901 = vmatpush1.bf16.msra.mxu1 %v8443_v19  ;;  %v8531_v18 = vld [vmem:[%s11374_s1 + $0x1640] ss:$16 sps:$4 sm:$0xff]   ;;  %v8534_v19 = vld [vmem:[%s11374_s1 + $0x1648] ss:$16 sps:$4 sm:$0xff]  }
 0x290   :  { %5369 = vmatprep.subr.bf16.mxu0 %v8448_v20  ;;  %5902 = vmatprep.subr.bf16.mxu1 %v8451_v22  ;;  %v8539_v20 = vld [vmem:[%s11374_s1 + $0x1664] ss:$16 sps:$4 sm:$0xff]   ;;  %v8542_v22 = vld [vmem:[%s11374_s1 + $0x166c] ss:$16 sps:$4 sm:$0xff]  }
 0x293   :  { %5370 = vmatpush1.bf16.msra.mxu0 %v8446_v23  ;;  %5903 = vmatpush1.bf16.msra.mxu1 %v8449_v24  ;;  %v8537_v23 = vld [vmem:[%s11374_s1 + $0x1660] ss:$16 sps:$4 sm:$0xff]   ;;  %v8540_v24 = vld [vmem:[%s11374_s1 + $0x1668] ss:$16 sps:$4 sm:$0xff]  }
 0x294   :  { %5371 = vmatprep.subr.bf16.mxu0 %v8454_v13  ;;  %5904 = vmatprep.subr.bf16.mxu1 %v8457_v27  ;;  %v8545_v13 = vld [vmem:[%s11374_s1 + $0x1684] ss:$16 sps:$4 sm:$0xff]   ;;  %v8548_v27 = vld [vmem:[%s11374_s1 + $0x168c] ss:$16 sps:$4 sm:$0xff]  }
 0x297   :  { %5372 = vmatpush1.bf16.msra.mxu0 %v8452_v28  ;;  %5905 = vmatpush1.bf16.msra.mxu1 %v8455_v29  ;;  %v8543_v28 = vld [vmem:[%s11374_s1 + $0x1680] ss:$16 sps:$4 sm:$0xff]   ;;  %v8546_v29 = vld [vmem:[%s11374_s1 + $0x1688] ss:$16 sps:$4 sm:$0xff]  }
 0x298   :  { %5373 = vmatprep.subr.bf16.mxu0 %v8460_v14  ;;  %5906 = vmatprep.subr.bf16.mxu1 %v8463_v30  ;;  %v8551_v14 = vld [vmem:[%s11374_s1 + $0x16a4] ss:$16 sps:$4 sm:$0xff]   ;;  %v8554_v30 = vld [vmem:[%s11374_s1 + $0x16ac] ss:$16 sps:$4 sm:$0xff]  }
 0x29b   :  { %5374 = vmatpush1.bf16.msra.mxu0 %v8458_v31  ;;  %5907 = vmatpush1.bf16.msra.mxu1 %v8461_v25  ;;  %v8549_v31 = vld [vmem:[%s11374_s1 + $0x16a0] ss:$16 sps:$4 sm:$0xff]   ;;  %v8552_v25 = vld [vmem:[%s11374_s1 + $0x16a8] ss:$16 sps:$4 sm:$0xff]  }
 0x29c   :  { %5375 = vmatprep.subr.bf16.mxu0 %v8466_v32  ;;  %5908 = vmatprep.subr.bf16.mxu1 %v8469_v33  ;;  %v8557_v32 = vld [vmem:[%s11374_s1 + $0x16c4] ss:$16 sps:$4 sm:$0xff]   ;;  %v8560_v33 = vld [vmem:[%s11374_s1 + $0x16cc] ss:$16 sps:$4 sm:$0xff]  }
 0x29f   :  { %5376 = vmatpush1.bf16.msra.mxu0 %v8464_v26  ;;  %5909 = vmatpush1.bf16.msra.mxu1 %v8467_v36  ;;  %v8555_v26 = vld [vmem:[%s11374_s1 + $0x16c0] ss:$16 sps:$4 sm:$0xff]   ;;  %v8558_v36 = vld [vmem:[%s11374_s1 + $0x16c8] ss:$16 sps:$4 sm:$0xff]  }
 0x2a0   :  { %5377 = vmatprep.subr.bf16.mxu0 %v8472_v37  ;;  %5910 = vmatprep.subr.bf16.mxu1 %v8475_v21  ;;  %v8563_v37 = vld [vmem:[%s11374_s1 + $0x16e4] ss:$16 sps:$4 sm:$0xff]   ;;  %v8566_v21 = vld [vmem:[%s11374_s1 + $0x16ec] ss:$16 sps:$4 sm:$0xff]  }
 0x2a3   :  { %5378 = vmatpush1.bf16.msra.mxu0 %v8470_v39  ;;  %5911 = vmatpush1.bf16.msra.mxu1 %v8473_v40  ;;  %v8561_v39 = vld [vmem:[%s11374_s1 + $0x16e0] ss:$16 sps:$4 sm:$0xff]   ;;  %v8564_v40 = vld [vmem:[%s11374_s1 + $0x16e8] ss:$16 sps:$4 sm:$0xff]  }
 0x2a4   :  { %5379 = vmatprep.subr.bf16.mxu0 %v8478_v41  ;;  %5912 = vmatprep.subr.bf16.mxu1 %v8481_v34  ;;  %v8569_v41 = vld [vmem:[%s11374_s1 + $0x1704] ss:$16 sps:$4 sm:$0xff]   ;;  %v8572_v34 = vld [vmem:[%s11374_s1 + $0x170c] ss:$16 sps:$4 sm:$0xff]  }
 0x2a7   :  { %5380 = vmatpush1.bf16.msra.mxu0 %v8476_v43  ;;  %5913 = vmatpush1.bf16.msra.mxu1 %v8479_v45  ;;  %v8567_v43 = vld [vmem:[%s11374_s1 + $0x1700] ss:$16 sps:$4 sm:$0xff]   ;;  %v8570_v45 = vld [vmem:[%s11374_s1 + $0x1708] ss:$16 sps:$4 sm:$0xff]  }
 0x2a8   :  { %5381 = vmatprep.subr.bf16.mxu0 %v8484_v46  ;;  %5914 = vmatprep.subr.bf16.mxu1 %v8487_v35  ;;  %v8575_v46 = vld [vmem:[%s11374_s1 + $0x1724] ss:$16 sps:$4 sm:$0xff]   ;;  %v8578_v35 = vld [vmem:[%s11374_s1 + $0x172c] ss:$16 sps:$4 sm:$0xff]  }
 0x2ab   :  { %5382 = vmatpush1.bf16.msra.mxu0 %v8482_v50  ;;  %5915 = vmatpush1.bf16.msra.mxu1 %v8485_v53  ;;  %v8573_v50 = vld [vmem:[%s11374_s1 + $0x1720] ss:$16 sps:$4 sm:$0xff]   ;;  %v8576_v53 = vld [vmem:[%s11374_s1 + $0x1728] ss:$16 sps:$4 sm:$0xff]  }
 0x2ac   :  { %5383 = vmatprep.subr.bf16.mxu0 %v8490_v38  ;;  %5916 = vmatprep.subr.bf16.mxu1 %v8493_v54  ;;  %v8581_v38 = vld [vmem:[%s11374_s1 + $0x1744] ss:$16 sps:$4 sm:$0xff]   ;;  %v8584_v54 = vld [vmem:[%s11374_s1 + $0x174c] ss:$16 sps:$4 sm:$0xff]  }
 0x2af   :  { %5384 = vmatpush1.bf16.msra.mxu0 %v8488_v55  ;;  %5917 = vmatpush1.bf16.msra.mxu1 %v8491_v56  ;;  %v8579_v55 = vld [vmem:[%s11374_s1 + $0x1740] ss:$16 sps:$4 sm:$0xff]   ;;  %v8582_v56 = vld [vmem:[%s11374_s1 + $0x1748] ss:$16 sps:$4 sm:$0xff]  }
 0x2b0   :  { %5385 = vmatprep.subr.bf16.mxu0 %v8496_v47  ;;  %5918 = vmatprep.subr.bf16.mxu1 %v8499_v57  ;;  %v8587_v47 = vld [vmem:[%s11374_s1 + $0x1764] ss:$16 sps:$4 sm:$0xff]   ;;  %v8590_v57 = vld [vmem:[%s11374_s1 + $0x176c] ss:$16 sps:$4 sm:$0xff]  }
 0x2b3   :  { %5386 = vmatpush1.bf16.msra.mxu0 %v8494_v58  ;;  %5919 = vmatpush1.bf16.msra.mxu1 %v8497_v59  ;;  %v8585_v58 = vld [vmem:[%s11374_s1 + $0x1760] ss:$16 sps:$4 sm:$0xff]   ;;  %v8588_v59 = vld [vmem:[%s11374_s1 + $0x1768] ss:$16 sps:$4 sm:$0xff]  }
 0x2b4   :  { %5387 = vmatprep.subr.bf16.mxu0 %v8502_v48  ;;  %5920 = vmatprep.subr.bf16.mxu1 %v8505_v61  ;;  %v8593_v48 = vld [vmem:[%s11374_s1 + $0x1784] ss:$16 sps:$4 sm:$0xff]   ;;  %v8596_v61 = vld [vmem:[%s11374_s1 + $0x178c] ss:$16 sps:$4 sm:$0xff]  }
 0x2b7   :  { %5388 = vmatpush1.bf16.msra.mxu0 %v8500_v63  ;;  %5921 = vmatpush1.bf16.msra.mxu1 %v8503_v44  ;;  %v8591_v63 = vld [vmem:[%s11374_s1 + $0x1780] ss:$16 sps:$4 sm:$0xff]   ;;  %v8594_v44 = vld [vmem:[%s11374_s1 + $0x1788] ss:$16 sps:$4 sm:$0xff]  }
 0x2b8   :  { %5389 = vmatprep.subr.bf16.mxu0 %v8508_v1  ;;  %5922 = vmatprep.subr.bf16.mxu1 %v8511_v51  ;;  %v8599_v1 = vld [vmem:[%s11374_s1 + $0x17a4] ss:$16 sps:$4 sm:$0xff]   ;;  %v8602_v51 = vld [vmem:[%s11374_s1 + $0x17ac] ss:$16 sps:$4 sm:$0xff]  }
 0x2bb   :  { %5390 = vmatpush1.bf16.msra.mxu0 %v8506_v2  ;;  %5923 = vmatpush1.bf16.msra.mxu1 %v8509_v3  ;;  %v8597_v2 = vld [vmem:[%s11374_s1 + $0x17a0] ss:$16 sps:$4 sm:$0xff]   ;;  %v8600_v3 = vld [vmem:[%s11374_s1 + $0x17a8] ss:$16 sps:$4 sm:$0xff]  }
 0x2bc   :  { %5391 = vmatprep.subr.bf16.mxu0 %v8514_v4  ;;  %5924 = vmatprep.subr.bf16.mxu1 %v8517_v60  ;;  %v8605_v4 = vld [vmem:[%s11374_s1 + $0x17c4] ss:$16 sps:$4 sm:$0xff]   ;;  %v8608_v60 = vld [vmem:[%s11374_s1 + $0x17cc] ss:$16 sps:$4 sm:$0xff]  }
 0x2bf   :  { %5392 = vmatpush1.bf16.msra.mxu0 %v8512_v5  ;;  %5925 = vmatpush1.bf16.msra.mxu1 %v8515_v6  ;;  %v8603_v5 = vld [vmem:[%s11374_s1 + $0x17c0] ss:$16 sps:$4 sm:$0xff]   ;;  %v8606_v6 = vld [vmem:[%s11374_s1 + $0x17c8] ss:$16 sps:$4 sm:$0xff]  }
 0x2c0   :  { %5402 = vmatprep.subr.bf16.mxu0 %v8521_v7  ;;  %5935 = vmatprep.subr.bf16.mxu1 %v8524_v62  ;;  %v8611_v7 = vld [vmem:[%s11374_s1 + $0x17e4] ss:$16 sps:$4 sm:$0xff]   ;;  %v8614_v62 = vld [vmem:[%s11374_s1 + $0x17ec] ss:$16 sps:$4 sm:$0xff]  }
 0x2c2   :  { %5394 = vmatmul.mubr.bf16.vlgmr.msra.gmra.mrb[0].mxu0 %v10991_v9  ;;  %5927 = vmatmul.mubr.bf16.vlgmr.msra.gmra.mrb[0].mxu1 %v10991_v9 }
 0x2c3   :  { %5403 = vmatpush1.bf16.msra.mxu0 %v8519_v10  ;;  %5936 = vmatpush1.bf16.msra.mxu1 %v8522_v11  ;;  %v8609_v10 = vld [vmem:[%s11374_s1 + $0x17e0] ss:$16 sps:$4 sm:$0xff]   ;;  %v8612_v11 = vld [vmem:[%s11374_s1 + $0x17e8] ss:$16 sps:$4 sm:$0xff]  }
 0x2c4   :  { %5404 = vmatprep.subr.bf16.mxu0 %v8527_v12  ;;  %5937 = vmatprep.subr.bf16.mxu1 %v8530_v0  ;;  %v8617_v12 = vld [vmem:[%s11374_s1 + $0x1804] ss:$16 sps:$4 sm:$0xff]   ;;  %v8620_v0 = vld [vmem:[%s11374_s1 + $0x180c] ss:$16 sps:$4 sm:$0xff]  }
 0x2c5   :  { %5434 = vmatprep.mubr.bf16.mxu0 %v988_v52  ;;  %5967 = vmatprep.mubr.bf16.mxu1 %v988_v52  ;;  %v986_v52 = vcombine.high %v10991_v9, %v10991_v9  ;;  %v8626_v9 = vld [vmem:[%s11374_s1 + $0x182c] ss:$16 sps:$4 sm:$0xff]  }
 0x2c7   :  { %5405 = vmatpush1.bf16.msra.mxu0 %v8525_v15  ;;  %5938 = vmatpush1.bf16.msra.mxu1 %v8528_v16  ;;  %v8615_v15 = vld [vmem:[%s11374_s1 + $0x1800] ss:$16 sps:$4 sm:$0xff]   ;;  %v8618_v16 = vld [vmem:[%s11374_s1 + $0x1808] ss:$16 sps:$4 sm:$0xff]  }
 0x2c8   :  { %5406 = vmatprep.subr.bf16.mxu0 %v8533_v8  ;;  %5939 = vmatprep.subr.bf16.mxu1 %v8536_v17  ;;  %v8623_v8 = vld [vmem:[%s11374_s1 + $0x1824] ss:$16 sps:$4 sm:$0xff]   ;;  %v8621_v17 = vld [vmem:[%s11374_s1 + $0x1820] ss:$16 sps:$4 sm:$0xff]  }
 0x2cb   :  { %5407 = vmatpush1.bf16.msra.mxu0 %v8531_v18  ;;  %5940 = vmatpush1.bf16.msra.mxu1 %v8534_v19  ;;  %v8624_v18 = vld [vmem:[%s11374_s1 + $0x1828] ss:$16 sps:$4 sm:$0xff]   ;;  %v8629_v19 = vld [vmem:[%s11374_s1 + $0x1844] ss:$16 sps:$4 sm:$0xff]  }
 0x2cc   :  { %5408 = vmatprep.subr.bf16.mxu0 %v8539_v20  ;;  %5941 = vmatprep.subr.bf16.mxu1 %v8542_v22  ;;  %v8632_v20 = vld [vmem:[%s11374_s1 + $0x184c] ss:$16 sps:$4 sm:$0xff]   ;;  %v8702_v22 = vmov 0  }
 0x2cf   :  { %5409 = vmatpush1.bf16.msra.mxu0 %v8537_v23  ;;  %5942 = vmatpush1.bf16.msra.mxu1 %v8540_v24  ;;  %v8627_v23 = vld [vmem:[%s11374_s1 + $0x1840] ss:$16 sps:$4 sm:$0xff]   ;;  %v8630_v24 = vld [vmem:[%s11374_s1 + $0x1848] ss:$16 sps:$4 sm:$0xff]  }
 0x2d0   :  { %5410 = vmatprep.subr.bf16.mxu0 %v8545_v13  ;;  %5943 = vmatprep.subr.bf16.mxu1 %v8548_v27  ;;  %v8635_v13 = vld [vmem:[%s11374_s1 + $0x1864] ss:$16 sps:$4 sm:$0xff]   ;;  %v8638_v27 = vld [vmem:[%s11374_s1 + $0x186c] ss:$16 sps:$4 sm:$0xff]  }
 0x2d3   :  { %5411 = vmatpush1.bf16.msra.mxu0 %v8543_v28  ;;  %5944 = vmatpush1.bf16.msra.mxu1 %v8546_v29  ;;  %v8633_v28 = vld [vmem:[%s11374_s1 + $0x1860] ss:$16 sps:$4 sm:$0xff]   ;;  %v8636_v29 = vld [vmem:[%s11374_s1 + $0x1868] ss:$16 sps:$4 sm:$0xff]  }
 0x2d4   :  { %5412 = vmatprep.subr.bf16.mxu0 %v8551_v14  ;;  %5945 = vmatprep.subr.bf16.mxu1 %v8554_v30  ;;  %v6468_v14 = vld.sshfl [vmem:[%s11373_s0 + $0x18] sm:$0x1 pattern:$0x75316420]  ;;  %v8639_v30 = vld [vmem:[%s11376_s3 + $0x40] sm:$0xff]  }
 0x2d7   :  { %5413 = vmatpush1.bf16.msra.mxu0 %v8549_v31  ;;  %5946 = vmatpush1.bf16.msra.mxu1 %v8552_v25  ;;  %v8640_v31 = vld [vmem:[%s11376_s3 + $0xc0] sm:$0xff]   ;;  %v1002_v25 = vrot.slane %v6468_v14, %v8881_v49  ;;  %v8644_v49 = vld [vmem:[%s11376_s3 + $0xc8] sm:$0xff]  }
 0x2d8   :  { %5414 = vmatprep.subr.bf16.mxu0 %v8557_v32  ;;  %5947 = vmatprep.subr.bf16.mxu1 %v8560_v33  ;;  %v8641_v32 = vld [vmem:[%s11376_s3] sm:$0xff]  }
 0x2d9   :  { %v8642_v33 = vld [vmem:[%s11376_s3 + $0x80] sm:$0xff]  }
 0x2db   :  { %5415 = vmatpush1.bf16.msra.mxu0 %v8555_v26  ;;  %5948 = vmatpush1.bf16.msra.mxu1 %v8558_v36  ;;  %v8643_v26 = vld [vmem:[%s11376_s3 + $0x48] sm:$0xff]  }
 0x2dc   :  { %5416 = vmatprep.subr.bf16.mxu0 %v8563_v37  ;;  %5949 = vmatprep.subr.bf16.mxu1 %v8566_v21  ;;  %v8645_v36 = vld [vmem:[%s11376_s3 + $0x8] sm:$0xff]   ;;  %v8647_v21 = vld [vmem:[%s11376_s3 + $0x50] sm:$0xff]  }
 0x2dd   :  { %v8646_v37 = vld [vmem:[%s11376_s3 + $0x88] sm:$0xff]  }
 0x2df   :  { %5417 = vmatpush1.bf16.msra.mxu0 %v8561_v39  ;;  %5950 = vmatpush1.bf16.msra.mxu1 %v8564_v40  ;;  %v8648_v39 = vld [vmem:[%s11376_s3 + $0xd0] sm:$0xff]  }
 0x2e0   :  { %5418 = vmatprep.subr.bf16.mxu0 %v8569_v41  ;;  %5951 = vmatprep.subr.bf16.mxu1 %v8572_v34  ;;  %v8649_v40 = vld [vmem:[%s11376_s3 + $0x10] sm:$0xff]   ;;  %v8651_v34 = vld [vmem:[%s11376_s3 + $0x58] sm:$0xff]  }
 0x2e1   :  { %v8650_v41 = vld [vmem:[%s11376_s3 + $0x90] sm:$0xff]  }
 0x2e3   :  { %5419 = vmatpush1.bf16.msra.mxu0 %v8567_v43  ;;  %5952 = vmatpush1.bf16.msra.mxu1 %v8570_v45  ;;  %v8652_v43 = vld [vmem:[%s11376_s3 + $0xd8] sm:$0xff]  }
 0x2e4   :  { %5420 = vmatprep.subr.bf16.mxu0 %v8575_v46  ;;  %5953 = vmatprep.subr.bf16.mxu1 %v8578_v35  ;;  %v8653_v45 = vld [vmem:[%s11376_s3 + $0x18] sm:$0xff]   ;;  %v8655_v35 = vld [vmem:[%s11376_s3 + $0x60] sm:$0xff]  }
 0x2e5   :  { %v8654_v46 = vld [vmem:[%s11376_s3 + $0x98] sm:$0xff]  }
 0x2e7   :  { %5421 = vmatpush1.bf16.msra.mxu0 %v8573_v50  ;;  %5954 = vmatpush1.bf16.msra.mxu1 %v8576_v53  ;;  %v8656_v50 = vld [vmem:[%s11376_s3 + $0xe0] sm:$0xff]  }
 0x2e8   :  { %5422 = vmatprep.subr.bf16.mxu0 %v8581_v38  ;;  %5955 = vmatprep.subr.bf16.mxu1 %v8584_v54  ;;  %v8657_v53 = vld [vmem:[%s11376_s3 + $0x20] sm:$0xff]   ;;  %v8659_v54 = vld [vmem:[%s11376_s3 + $0x68] sm:$0xff]  }
 0x2e9   :  { %v8658_v38 = vld [vmem:[%s11376_s3 + $0xa0] sm:$0xff]  }
 0x2eb   :  { %5423 = vmatpush1.bf16.msra.mxu0 %v8579_v55  ;;  %5956 = vmatpush1.bf16.msra.mxu1 %v8582_v56  ;;  %v8660_v55 = vld [vmem:[%s11376_s3 + $0xe8] sm:$0xff]  }
 0x2ec   :  { %5424 = vmatprep.subr.bf16.mxu0 %v8587_v47  ;;  %5957 = vmatprep.subr.bf16.mxu1 %v8590_v57  ;;  %v8661_v56 = vld [vmem:[%s11376_s3 + $0x28] sm:$0xff]   ;;  %v8663_v57 = vld [vmem:[%s11376_s3 + $0x70] sm:$0xff]  }
 0x2ed   :  { %v8662_v47 = vld [vmem:[%s11376_s3 + $0xa8] sm:$0xff]  }
 0x2ef   :  { %5425 = vmatpush1.bf16.msra.mxu0 %v8585_v58  ;;  %5958 = vmatpush1.bf16.msra.mxu1 %v8588_v59  ;;  %v8664_v58 = vld [vmem:[%s11376_s3 + $0xf0] sm:$0xff]  }
 0x2f0   :  { %5426 = vmatprep.subr.bf16.mxu0 %v8593_v48  ;;  %5959 = vmatprep.subr.bf16.mxu1 %v8596_v61  ;;  %v8665_v59 = vld [vmem:[%s11376_s3 + $0x30] sm:$0xff]   ;;  %v8667_v61 = vld [vmem:[%s11376_s3 + $0x78] sm:$0xff]  }
 0x2f1   :  { %v8666_v48 = vld [vmem:[%s11376_s3 + $0xb0] sm:$0xff]  }
 0x2f3   :  { %5427 = vmatpush1.bf16.msra.mxu0 %v8591_v63  ;;  %5960 = vmatpush1.bf16.msra.mxu1 %v8594_v44  ;;  %v8668_v63 = vld [vmem:[%s11376_s3 + $0xf8] sm:$0xff]  }
 0x2f4   :  { %5428 = vmatprep.subr.bf16.mxu0 %v8599_v1  ;;  %5961 = vmatprep.subr.bf16.mxu1 %v8602_v51  ;;  %v8669_v44 = vld [vmem:[%s11376_s3 + $0x38] sm:$0xff]   ;;  %v8703_v51 = vmov 0.0  }
 0x2f5   :  { %v8670_v1 = vld [vmem:[%s11376_s3 + $0xb8] sm:$0xff]  }
 0x2f7   :  { %5429 = vmatpush1.bf16.msra.mxu0 %v8597_v2  ;;  %5962 = vmatpush1.bf16.msra.mxu1 %v8600_v3  ;;  %v820_v2 = vsub.s32 0, %v8863_v42  ;;  %v828_v3 = vsub.s32 2, %v8863_v42 }
 0x2f8   :  { %5430 = vmatprep.subr.bf16.mxu0 %v8605_v4  ;;  %5963 = vmatprep.subr.bf16.mxu1 %v8608_v60  ;;  %v816_v4 = vld [vmem:[%s11375_s2] sm:$0xf]  ;;  %v824_v60 = vsub.s32 1, %v8863_v42 }
 0x2fb   :  { %5431 = vmatpush1.bf16.msra.mxu0 %v8603_v5  ;;  %5964 = vmatpush1.bf16.msra.mxu1 %v8606_v6  ;;  %v832_v5 = vsub.s32 3, %v8863_v42  ;;  %v821_v6 = vrot.slane %v816_v4, %v820_v2 }
 0x2fc   :  { %5432 = vmatprep.subr.bf16.mxu0 %v8611_v7  ;;  %5965 = vmatprep.subr.bf16.mxu1 %v8614_v62  ;;  %v829_v7 = vrot.slane %v816_v4, %v828_v3  ;;  %v825_v62 = vrot.slane %v816_v4, %v824_v60 }
 0x2ff   :  { %5433 = vmatpush1.bf16.msra.mxu0 %v8609_v10  ;;  %5966 = vmatpush1.bf16.msra.mxu1 %v8612_v11  ;;  %v833_v10 = vrot.slane %v816_v4, %v832_v5 }
 0x300   :  { %5443 = vmatprep.subr.bf16.mxu0 %v8617_v12  ;;  %5976 = vmatprep.subr.bf16.mxu1 %v8620_v0 }
 0x302   :  { %5435 = vmatmul.mubr.bf16.vlgmr.msra.gmra.mrb[0].mxu0 %v986_v52  ;;  %5968 = vmatmul.mubr.bf16.vlgmr.msra.gmra.mrb[0].mxu1 %v986_v52 }
 0x303   :  { %5444 = vmatpush1.bf16.msra.mxu0 %v8615_v15  ;;  %5977 = vmatpush1.bf16.msra.mxu1 %v8618_v16 }
 0x304   :  { %5445 = vmatprep.subr.bf16.mxu0 %v8623_v8  ;;  %5978 = vmatprep.subr.bf16.mxu1 %v8626_v9 }
 0x305   :  { %5475 = vmatprep.mubr.bf16.mxu0 %v8702_v22  ;;  %6008 = vmatprep.mubr.bf16.mxu1 %v8702_v22 }
 0x307   :  { %5446 = vmatpush1.bf16.msra.mxu0 %v8621_v17  ;;  %5979 = vmatpush1.bf16.msra.mxu1 %v8624_v18 }
 0x308   :  { %5447 = vmatprep.subr.bf16.mxu0 %v8629_v19  ;;  %5980 = vmatprep.subr.bf16.mxu1 %v8632_v20 }
 0x30b   :  { %5448 = vmatpush1.bf16.msra.mxu0 %v8627_v23  ;;  %5981 = vmatpush1.bf16.msra.mxu1 %v8630_v24 }
 0x30c   :  { %5449 = vmatprep.subr.bf16.mxu0 %v8635_v13  ;;  %5982 = vmatprep.subr.bf16.mxu1 %v8638_v27 }
 0x30f   :  { %5450 = vmatpush1.bf16.msra.mxu0 %v8633_v28  ;;  %5983 = vmatpush1.bf16.msra.mxu1 %v8636_v29  ;;  %v8671_v28 = vld [vmem:[%s11378_s5] sm:$0xff]  }
 0x310   :  { %7294 = vmatprep.subr.bf16.mxu0 %v8639_v30  ;;  %7316 = vmatprep.subr.bf16.mxu1 %v8640_v31  ;;  %v8672_v30 = vld [vmem:[%s11378_s5 + $0x8] sm:$0xff]   ;;  %v8673_v31 = vld [vmem:[%s11378_s5 + $0x10] sm:$0xff]  }
 0x312   :  { %7253 = vmatmul.mubr.msk.bf16.vlgmr.msra.gmra.mrb[0].mxu0 %vm4947_vm0, %v1002_v25  ;;  %7254 = vmatmul.mubr.msk.bf16.vlgmr.msra.gmra.mrb[0].mxu1 %vm4947_vm0, %v1002_v25  ;;  %v8674_v25 = vld [vmem:[%s11378_s5 + $0x18] sm:$0xff]  }
 0x313   :  { %7295 = vmatpush3.bf16.msra.mxu0 %v8641_v32  ;;  %7317 = vmatpush3.bf16.msra.mxu1 %v8642_v33 }
 0x314   :  { %7296 = vmatprep.subr.bf16.mxu0 %v8643_v26  ;;  %7318 = vmatprep.subr.bf16.mxu1 %v8644_v49  ;;  %v7255_v26 = vld [vmem:[%s11377_s4] ss:$0 sm:$0xff]  ;;  %s6460_s4 = sshll.u32 %s8705_s15, 4  ;;  %s6461_s4 = int_to_ptr.vmem [resolvable:$true] %s6460_s4 }
 0x315   :  { %s8677_s16 = scalar_lea.vmem %s6461_s4, 32  ;;  %p8682_p1 = scmp.lt.s32.totalorder %s6461_s4, %s6461_s4 }
 0x316   :  { %p8678_p0 = scmp.ne.s32.totalorder %s6461_s4, %s8677_s16  ;;  %p8683_p2 = scmp.lt.s32.totalorder %s8677_s16, %s8677_s16 }
 0x317   :  { %7297 = vmatpush3.bf16.msra.mxu0 %v8645_v36  ;;  %7319 = vmatpush3.bf16.msra.mxu1 %v8646_v37 }
 0x318   :  { %7298 = vmatprep.subr.bf16.mxu0 %v8647_v21  ;;  %7320 = vmatprep.subr.bf16.mxu1 %v8648_v39  ;;  %p8684_p3 = por %p8683_p2, %p8682_p1 }
 0x31a   :  { %p8685_p4 = pnand %p8684_p3, %p8678_p0 }
 0x31b   :  { %7299 = vmatpush3.bf16.msra.mxu0 %v8649_v40  ;;  %7321 = vmatpush3.bf16.msra.mxu1 %v8650_v41 }
 0x31c   :  { %7300 = vmatprep.subr.bf16.mxu0 %v8651_v34  ;;  %7322 = vmatprep.subr.bf16.mxu1 %v8652_v43 }
 0x31f   :  { %7301 = vmatpush3.bf16.msra.mxu0 %v8653_v45  ;;  %7323 = vmatpush3.bf16.msra.mxu1 %v8654_v46 }
 0x320   :  { %7302 = vmatprep.subr.bf16.mxu0 %v8655_v35  ;;  %7324 = vmatprep.subr.bf16.mxu1 %v8656_v50  ;;  %v7288_v50 = vld [vmem:[%s11379_s6] ss:$0 sm:$0xff] }
 0x323   :  { %7303 = vmatpush3.bf16.msra.mxu0 %v8657_v53  ;;  %7325 = vmatpush3.bf16.msra.mxu1 %v8658_v38 }
 0x324   :  { %7304 = vmatprep.subr.bf16.mxu0 %v8659_v54  ;;  %7326 = vmatprep.subr.bf16.mxu1 %v8660_v55 }
 0x327   :  { %7305 = vmatpush3.bf16.msra.mxu0 %v8661_v56  ;;  %7327 = vmatpush3.bf16.msra.mxu1 %v8662_v47 }
 0x328   :  { %7306 = vmatprep.subr.bf16.mxu0 %v8663_v57  ;;  %7328 = vmatprep.subr.bf16.mxu1 %v8664_v58 }
 0x32b   :  { %7307 = vmatpush3.bf16.msra.mxu0 %v8665_v59  ;;  %7329 = vmatpush3.bf16.msra.mxu1 %v8666_v48 }
 0x32c   :  { %7308 = vmatprep.subr.bf16.mxu0 %v8667_v61  ;;  %7330 = vmatprep.subr.bf16.mxu1 %v8668_v63 }
 0x32f   :  { %7309 = vmatpush3.bf16.msra.mxu0 %v8669_v44  ;;  %7331 = vmatpush3.bf16.msra.mxu1 %v8670_v1 }
 0x330   :  { %7343 = vmatprep.subr.bf16.mxu0 %v8703_v51 }
 0x3e5   :  { %v5477_v11 = vpop.f32.mrb[0].mxu0  ;;  %v6010_v12 = vpop.f32.mrb[0].mxu1 }
 0x3e6   :  { %v7355_v0 = vadd.f32 %v5477_v11, %v821_v6  ;;  %v7357_v52 = vadd.f32 %v6010_v12, %v829_v7  ;;  %v5479_v15 = vpop.f32.mrb[1].mxu0  ;;  %v6012_v16 = vpop.f32.mrb[1].mxu1 }
 0x3e7   :  { %v7356_v8 = vadd.f32 %v5479_v15, %v825_v62  ;;  %v7358_v9 = vadd.f32 %v6012_v16, %v833_v10  ;;  %v5481_v17 = vpop.f32.mrb[2].mxu0  ;;  %v6014_v18 = vpop.f32.mrb[2].mxu1 }
 0x3e8   :  { %v6017_v19 = vmax.f32 %v7355_v0, 0.0  ;;  %v6019_v20 = vmax.f32 %v7357_v52, 0.0  ;;  %v5482_v22 = vpop.f32.mrb[3].mxu0  ;;  %v6015_v23 = vpop.f32.mrb[3].mxu1 }
 0x3e9   :  { %v6018_v24 = vmax.f32 %v7356_v8, 0.0  ;;  %v6020_v42 = vmax.f32 %v7358_v9, 0.0 }
 0x3ea   :  { %v6021_v29 = vpack.c.bf16 %v6017_v19, %v6017_v19  ;;  %v6023_v14 = vpack.c.bf16 %v6019_v20, %v6019_v20 }
 0x3eb   :  { %v6022_v13 = vpack.c.bf16 %v6018_v24, %v6018_v24  ;;  %v6024_v27 = vpack.c.bf16 %v6020_v42, %v6020_v42 }
 0x3ed   :  { %6320 = vmatprep.mubr.bf16.mxu0 %v6022_v13  ;;  %6360 = vmatprep.mubr.bf16.mxu1 %v6024_v27 }
 0x3ee   :  { %6321 = vmatmul.mubr.bf16.vlgmr.msra.gmra.mrb[4].mxu0 %v6021_v29  ;;  %6361 = vmatmul.mubr.bf16.vlgmr.msra.gmra.mrb[4].mxu1 %v6023_v14 }
 0x3ef   :  { %7344 = vmatpush3.bf16.msra.mxu0 %v8671_v28  ;;  %7351 = vmatprep.mubr.msk.bf16.mxu0 %vm8704_vm1, %v8703_v51 }
 0x3f0   :  { %7345 = vmatprep.subr.bf16.mxu0 %v8703_v51 }
 0x3f3   :  { %7346 = vmatpush3.bf16.msra.mxu0 %v8672_v30 }
 0x3f4   :  { %7347 = vmatprep.subr.bf16.mxu0 %v8703_v51 }
 0x3f7   :  { %7348 = vmatpush3.bf16.msra.mxu0 %v8673_v31 }
 0x3f8   :  { %7349 = vmatprep.subr.bf16.mxu0 %v8703_v51 }
 0x3fb   :  { %7350 = vmatpush3.bf16.msra.mxu0 %v8674_v25 }
 0x4c1   :  { %v7310_v32 = vpop.f32.mrb[4].mxu0  ;;  %v7332_v33 = vpop.f32.mrb[4].mxu1 }
 0x4c2   :  { %v7311_v49 = vpop.f32.mrb[5].mxu0  ;;  %v7333_v36 = vpop.f32.mrb[5].mxu1 }
 0x4c3   :  { %v7312_v37 = vadd.f32 %v7311_v49, %v7310_v32  ;;  %v7334_v21 = vadd.f32 %v7333_v36, %v7332_v33  ;;  %v7313_v39 = vpop.f32.mrb[6].mxu0  ;;  %v7335_v40 = vpop.f32.mrb[6].mxu1 }
 0x4c4   :  { %v7314_v41 = vpop.f32.mrb[7].mxu0  ;;  %v7336_v34 = vpop.f32.mrb[7].mxu1 }
 0x4c5   :  { %v6323_v43 = vadd.f32 %v7312_v37, %v7255_v26 }
 0x4c7   :  { %v6363_v45 = vadd.f32 %v7334_v21, %v6323_v43 }
 0x4c9   :  { %v6368_v46 = vmax.f32 %v6363_v45, 0.0 }
 0x4cb   :  { %v6369_v35 = vpack.c.bf16 %v6368_v46, %v6368_v46 }
 0x4cd   :  { %7352 = vmatmul.mubr.msk.bf16.vlgmr.msra.gmra.mrb[8].mxu0 %vm4947_vm0, %v6369_v35 }
 0x5a0   :  { %v6446_v53 = vpop.f32.mrb[8].mxu0 }
 0x5a1   :  { %v6447_v38 = vadd.f32 %v7288_v50, %v6446_v53  ;;  %v7353_v54 = vpop.f32.mrb[9].mxu0 }
 0x5a2   :  { %v6449_v55 = vpop.f32.mrb[10].mxu0 }
 0x5a3   :  { %v7354_v56 = vpop.f32.mrb[11].mxu0  ;;  %6453 = vst.msk [vmem:[#allocation2] sm:$0x3] %vm6452_vm2, %v6447_v38 }
 0x5a4   :  { %8688 = shalt.err (!%p8685_p4)
}
 0x5a5   :  { %s8689_s6 = scalar_lea.hbm %s11380_s7, 32 }
 0x5a6   :  { %p8690_p5 = scmp.ne.s32.totalorder %s11380_s7, %s8689_s6  ;;  %p8693_p6 = scmp.lt.u32.totalorder %s8689_s6, %s11380_s7 }
 0x5a8   :  { %p8695_p7 = pnand %p8693_p6, %p8690_p5 }
 0x5aa   :  { %8698 = shalt.err (!%p8695_p7)
}
 0x5ab   :  { %6463 = dma.vmem_to_hbm [thread:$0]  %s6461_s4, 32, %s11380_s7, [#allocation3]  }
 0x5ac   :  { %8699 = dma.done.wait [#allocation3], 32  }
 0x5ad   :  { %8700 = vsyncadd [#allocation3], 4294967264 }
 0x5ae   :  { %6467 = vsyncpa [#allocation3], 1 }

</bundles_post_ra>
